<compile_context>
chip_gen: v6e
topology: v6e:2x2x1
jax: 0.10.0
libtpu: 0.0.40
codegen_flags: <defaults>
</compile_context>

<pallas_src>
import functools

import jax
import jax.numpy as jnp
from jax.experimental import pallas as pl
from jax.experimental.pallas import tpu as pltpu

EPS = 1e-5  # nn.LayerNorm default eps

# Flip to jnp.bfloat16 on v6e/v7x for ~2-4x MXU throughput and halved matmul-operand
# traffic (softmax / LayerNorm / accumulation stay f32); relax the accuracy check
# in __main__ to ~5e-2 when doing so.
MXU_DTYPE = jnp.float32

# Row tile for the linear / fused-FFN kernels. 256 keeps the fused FFN working set
# (x, 4E-wide hidden, both weights, output, double-buffered activations) inside
# v7x's 64 MiB VMEM at production widths; 512-1024 is fine on v5e/v6e.
TILE_M = 256

# Batches (each with all heads) processed per attention grid step; amortizes the
# ~0.35us per-grid-step overhead over many tiny (L, Dh) matmuls.
ATTN_TB = 8


# ---------------------------------------------------------------------------
# In-kernel helpers
# ---------------------------------------------------------------------------
def _mm(a, b):
    return jnp.dot(a.astype(MXU_DTYPE), b.astype(MXU_DTYPE),
                   preferred_element_type=jnp.float32)


def _layer_norm(y, g, b):
    mu = jnp.mean(y, axis=-1, keepdims=True)
    var = jnp.mean((y - mu) ** 2, axis=-1, keepdims=True)
    return (y - mu) * jax.lax.rsqrt(var + EPS) * g + b


# ---------------------------------------------------------------------------
# Pallas kernels
# ---------------------------------------------------------------------------
def _linear_kernel(x_ref, w_ref, b_ref, o_ref):
    # (TM, E) @ (E, F) + (1, F)
    o_ref[...] = _mm(x_ref[...], w_ref[...]) + b_ref[...]


def _attn_kernel(q_ref, kv_ref, o_ref, *, num_heads, head_dim):
    # q: (TB, L, E)   kv: (TB, S, 2E)   o: (TB, L, E)
    # All heads of TB batch elements per grid step; scale already folded into wq.
    q = q_ref[...]
    kv = kv_ref[...]
    e = num_heads * head_dim
    outs = []
    for h in range(num_heads):                      # small static unroll
        lo = h * head_dim
        q_h = q[:, :, lo:lo + head_dim]             # (TB, L, Dh)
        k_h = kv[:, :, lo:lo + head_dim]            # (TB, S, Dh)
        v_h = kv[:, :, e + lo:e + lo + head_dim]    # (TB, S, Dh)
        s = jax.lax.dot_general(                    # (TB, L, S)
            q_h.astype(MXU_DTYPE), k_h.astype(MXU_DTYPE),
            (((2,), (2,)), ((0,), (0,))),
            preferred_element_type=jnp.float32)
        m = jnp.max(s, axis=-1, keepdims=True)
        p = jnp.exp(s - m)
        p = p * pl.reciprocal(jnp.sum(p, axis=-1, keepdims=True), approx=True)
        outs.append(jax.lax.dot_general(            # (TB, L, Dh)
            p.astype(MXU_DTYPE), v_h.astype(MXU_DTYPE),
            (((2,), (1,)), ((0,), (0,))),
            preferred_element_type=jnp.float32))
    o_ref[...] = jnp.concatenate(outs, axis=-1)     # lane-dense (TB, L, E) store


def _proj_res_ln_kernel(a_ref, w_ref, b_ref, res_ref, g_ref, bb_ref, o_ref):
    # out_proj(attn) + residual, then LayerNorm (f32 math)
    y = _mm(a_ref[...], w_ref[...]) + b_ref[...] + res_ref[...]
    o_ref[...] = _layer_norm(y, g_ref[...], bb_ref[...])


def _ffn_res_ln_kernel(x_ref, w1_ref, b1_ref, w2_ref, b2_ref, g_ref, bb_ref, o_ref):
    # x + Linear(ReLU(Linear(x))), then LayerNorm (f32 math)
    x = x_ref[...]
    h = jnp.maximum(_mm(x, w1_ref[...]) + b1_ref[...], 0.0)
    z = x + _mm(h, w2_ref[...]) + b2_ref[...]
    o_ref[...] = _layer_norm(z, g_ref[...], bb_ref[...])


# ---------------------------------------------------------------------------
# pallas_call wrappers
# ---------------------------------------------------------------------------
def _parallel(n):
    return pltpu.CompilerParams(dimension_semantics=("parallel",) * n)


def linear(x, w, b):
    M, E = x.shape
    F = w.shape[1]
    tm = min(TILE_M, M)
    return pl.pallas_call(
        _linear_kernel,
        out_shape=jax.ShapeDtypeStruct((M, F), jnp.float32),
        grid=(pl.cdiv(M, tm),),
        in_specs=[pl.BlockSpec((tm, E), lambda i: (i, 0)),
                  pl.BlockSpec((E, F), lambda i: (0, 0)),
                  pl.BlockSpec((1, F), lambda i: (0, 0))],
        out_specs=pl.BlockSpec((tm, F), lambda i: (i, 0)),
        compiler_params=_parallel(1),
    )(x, w, b.reshape(1, -1))


def mha_core(q, kv, num_heads):
    # q: (B, L, E)   kv: (B, S, 2E)
    B, L, E = q.shape
    S = kv.shape[1]
    tb = min(ATTN_TB, B)
    kern = functools.partial(_attn_kernel, num_heads=num_heads,
                             head_dim=E // num_heads)
    return pl.pallas_call(
        kern,
        out_shape=jax.ShapeDtypeStruct((B, L, E), jnp.float32),
        grid=(pl.cdiv(B, tb),),
        in_specs=[pl.BlockSpec((tb, L, E), lambda i: (i, 0, 0)),
                  pl.BlockSpec((tb, S, 2 * E), lambda i: (i, 0, 0))],
        out_specs=pl.BlockSpec((tb, L, E), lambda i: (i, 0, 0)),
        compiler_params=_parallel(1),
    )(q, kv)


def proj_res_ln(a, w, b, res, g, beta):
    M, E = res.shape
    tm = min(TILE_M, M)
    return pl.pallas_call(
        _proj_res_ln_kernel,
        out_shape=jax.ShapeDtypeStruct((M, E), jnp.float32),
        grid=(pl.cdiv(M, tm),),
        in_specs=[pl.BlockSpec((tm, E), lambda i: (i, 0)),
                  pl.BlockSpec((E, E), lambda i: (0, 0)),
                  pl.BlockSpec((1, E), lambda i: (0, 0)),
                  pl.BlockSpec((tm, E), lambda i: (i, 0)),
                  pl.BlockSpec((1, E), lambda i: (0, 0)),
                  pl.BlockSpec((1, E), lambda i: (0, 0))],
        out_specs=pl.BlockSpec((tm, E), lambda i: (i, 0)),
        compiler_params=_parallel(1),
    )(a, w, b.reshape(1, -1), res, g.reshape(1, -1), beta.reshape(1, -1))


def ffn_res_ln(x, w1, b1, w2, b2, g, beta):
    M, E = x.shape
    F = w1.shape[1]
    tm = min(TILE_M, M)
    return pl.pallas_call(
        _ffn_res_ln_kernel,
        out_shape=jax.ShapeDtypeStruct((M, E), jnp.float32),
        grid=(pl.cdiv(M, tm),),
        in_specs=[pl.BlockSpec((tm, E), lambda i: (i, 0)),
                  pl.BlockSpec((E, F), lambda i: (0, 0)),
                  pl.BlockSpec((1, F), lambda i: (0, 0)),
                  pl.BlockSpec((F, E), lambda i: (0, 0)),
                  pl.BlockSpec((1, E), lambda i: (0, 0)),
                  pl.BlockSpec((1, E), lambda i: (0, 0)),
                  pl.BlockSpec((1, E), lambda i: (0, 0))],
        out_specs=pl.BlockSpec((tm, E), lambda i: (i, 0)),
        compiler_params=_parallel(1),
    )(x, w1, b1.reshape(1, -1), w2, b2.reshape(1, -1),
      g.reshape(1, -1), beta.reshape(1, -1))


# ---------------------------------------------------------------------------
# STT_Block / STT_Layer (Pallas path) — batch-first internal layout (B, L, E)
# ---------------------------------------------------------------------------
def stt_block(p, tgt, src, num_heads):
    Bb, L, E = tgt.shape
    S = src.shape[1]
    Dh = E // num_heads
    scale = 1.0 / float(Dh) ** 0.5

    tgt_flat = tgt.reshape(Bb * L, E)
    if tgt is src:
        # Self-attention: one fused (E, 3E) projection; input slab read once.
        w_qkv = jnp.concatenate([p["wq"] * scale, p["wk"], p["wv"]], axis=1)
        b_qkv = jnp.concatenate([p["bq"] * scale, p["bk"], p["bv"]])
        qkv = linear(tgt_flat, w_qkv, b_qkv).reshape(Bb, L, 3 * E)
        q, kv = qkv[..., :E], qkv[..., E:]
    else:
        # Cross-attention: Q from tgt, fused (E, 2E) KV from src.
        w_kv = jnp.concatenate([p["wk"], p["wv"]], axis=1)
        b_kv = jnp.concatenate([p["bk"], p["bv"]])
        q = linear(tgt_flat, p["wq"] * scale, p["bq"] * scale).reshape(Bb, L, E)
        kv = linear(src.reshape(Bb * S, E), w_kv, b_kv).reshape(Bb, S, 2 * E)

    attn = mha_core(q, kv, num_heads).reshape(Bb * L, E)          # (B*L, E)
    y = proj_res_ln(attn, p["wo"], p["bo"], tgt_flat, p["g1"], p["beta1"])
    out = ffn_res_ln(y, p["w1"], p["b1"], p["w2"], p["b2"], p["g2"], p["beta2"])
    return out.reshape(Bb, L, E)


def _stt_layer_impl(params, x, num_heads, block_fn):
    # Batch-first equivalents of the PyTorch permutes (same (b, n) / (b, t) batch
    # grouping, sequence axis kept second) — verified index-by-index.
    B, N, T, C = x.shape
    x_temp = x.reshape(B * N, T, C)                                       # batch=(b,n), seq=T
    x_spatio = x.transpose(0, 2, 1, 3).reshape(B * T, N, C)               # batch=(b,t), seq=N

    x_temp = block_fn(params["spatio_attention"], x_temp, x_temp, num_heads)
    x_spatio = block_fn(params["temporal_attention"], x_spatio, x_spatio, num_heads)

    x_spatio_feat = x_spatio.reshape(B, T, N, C).transpose(0, 2, 1, 3).reshape(B * N, T, C)
    x_temp_out = block_fn(params["temporal_cross_attention"], x_temp, x_spatio_feat, num_heads)

    x_temp_feat = x_temp.reshape(B, N, T, C).transpose(0, 2, 1, 3).reshape(B * T, N, C)
    x_spatio_out = block_fn(params["spatio_cross_attention"], x_spatio, x_temp_feat, num_heads)

    x_spatio_out = x_spatio_out.reshape(B, T, N, C).transpose(0, 2, 1, 3)  # (B, N, T, C)
    x_temp_out = x_temp_out.reshape(B, N, T, C)                            # (B, N, T, C)
    return x_temp_out + x_spatio_out


def stt_layer(params, x, num_heads):
    return _stt_layer_impl(params, x, num_heads, stt_block)


# ---------------------------------------------------------------------------
# Pure-JAX reference (correctness check only) — same batch-first interface
# ---------------------------------------------------------------------------
def _layer_norm_ref(x, g, b):
    mu = x.mean(-1, keepdims=True)
    var = ((x - mu) ** 2).mean(-1, keepdims=True)
    return (x - mu) * jax.lax.rsqrt(var + EPS) * g + b


def ref_block(p, tgt, src, num_heads):
    Bb, L, E = tgt.shape
    S = src.shape[1]
    Dh = E // num_heads
    scale = 1.0 / float(Dh) ** 0.5
    q = (tgt @ p["wq"] + p["bq"]).reshape(Bb, L, num_heads, Dh).transpose(0, 2, 1, 3)
    k = (src @ p["wk"] + p["bk"]).reshape(Bb, S, num_heads, Dh).transpose(0, 2, 1, 3)
    v = (src @ p["wv"] + p["bv"]).reshape(Bb, S, num_heads, Dh).transpose(0, 2, 1, 3)
    s = jnp.einsum("bhld,bhsd->bhls", q, k) * scale
    a = jnp.einsum("bhls,bhsd->bhld", jax.nn.softmax(s, axis=-1), v)
    a = a.transpose(0, 2, 1, 3).reshape(Bb, L, E)
    y = _layer_norm_ref(a @ p["wo"] + p["bo"] + tgt, p["g1"], p["beta1"])
    z = y + jnp.maximum(y @ p["w1"] + p["b1"], 0.0) @ p["w2"] + p["b2"]
    return _layer_norm_ref(z, p["g2"], p["beta2"])


def ref_layer(params, x, num_heads):
    return _stt_layer_impl(params, x, num_heads, ref_block)


# ---------------------------------------------------------------------------
# Deterministic parameter init (synthetic weights, no checkpoint)
# ---------------------------------------------------------------------------
def init_block_params(key, embed_dim):
    E = embed_dim
    ks = jax.random.split(key, 8)
    s = 1.0 / jnp.sqrt(E).astype(jnp.float32)
    return {
        "wq": jax.random.normal(ks[0], (E, E), jnp.float32) * s,
        "wk": jax.random.normal(ks[1], (E, E), jnp.float32) * s,
        "wv": jax.random.normal(ks[2], (E, E), jnp.float32) * s,
        "bq": jnp.zeros((E,), jnp.float32),
        "bk": jnp.zeros((E,), jnp.float32),
        "bv": jnp.zeros((E,), jnp.float32),
        "wo": jax.random.normal(ks[3], (E, E), jnp.float32) * s,
        "bo": jax.random.normal(ks[4], (E,), jnp.float32) * 0.01,
        "w1": jax.random.normal(ks[5], (E, 4 * E), jnp.float32) * s,
        "b1": jnp.zeros((4 * E,), jnp.float32),
        "w2": jax.random.normal(ks[6], (4 * E, E), jnp.float32) * (0.5 * s),
        "b2": jax.random.normal(ks[7], (E,), jnp.float32) * 0.01,
        "g1": jnp.ones((E,), jnp.float32),
        "beta1": jnp.zeros((E,), jnp.float32),
        "g2": jnp.ones((E,), jnp.float32),
        "beta2": jnp.zeros((E,), jnp.float32),
    }


if __name__ == "__main__":
    B, N, T, C, H = 2, 4, 8, 32, 4
    key = jax.random.PRNGKey(0)
    kx, kp = jax.random.split(key)
    x = jax.random.normal(kx, (B, N, T, C), jnp.float32)

    names = ["spatio_attention", "temporal_attention",
             "spatio_cross_attention", "temporal_cross_attention"]
    pkeys = jax.random.split(kp, 4)
    params = {n: init_block_params(k, C) for n, k in zip(names, pkeys)}

    fn = jax.jit(functools.partial(stt_layer, num_heads=H))
    out = jax.block_until_ready(fn(params, x))

    ref = ref_layer(params, x, H)
    assert out.shape == (B, N, T, C), out.shape
    max_err = float(jnp.max(jnp.abs(out - ref)))
    # Tolerance covers fp reassociation + the EUP approx-reciprocal softmax denom
    # (structural bugs would produce O(1) errors). Relax to ~5e-2 if MXU_DTYPE=bf16.
    assert jnp.allclose(out, ref, atol=2e-2, rtol=2e-2), f"max_err={max_err}"

    print("KERNEL_OK")
</pallas_src>

<mosaic_0001>
module attributes {stable_mosaic.version = 11 : i64} {
  func.func @_linear_kernel(%arg0: i32, %arg1: memref<64x32xf32, #tpu.memory_space<vmem>>, %arg2: memref<32x96xf32, #tpu.memory_space<vmem>>, %arg3: memref<1x96xf32, #tpu.memory_space<vmem>>, %arg4: memref<64x96xf32, #tpu.memory_space<vmem>>) attributes {dimension_semantics = [#tpu.dimension_semantics<parallel>], iteration_bounds = array<i64: 1>, scalar_prefetch = 0 : i64, scratch_operands = 0 : i64, tpu.core_type = #tpu.core_type<tc>, window_params = [{transform_indices = @transform_0, window_bounds = array<i64: 64, 32>}, {pipeline_mode = #tpu.pipeline_mode<synchronous>, transform_indices = @transform_1, window_bounds = array<i64: 32, 96>}, {pipeline_mode = #tpu.pipeline_mode<synchronous>, transform_indices = @transform_2, window_bounds = array<i64: 1, 96>}, {transform_indices = @transform_3, window_bounds = array<i64: 64, 96>}]} {
    %c0 = arith.constant 0 : index
    %c0_0 = arith.constant 0 : index
    %0 = vector.load %arg1[%c0, %c0_0] : memref<64x32xf32, #tpu.memory_space<vmem>>, vector<64x32xf32>
    %c0_1 = arith.constant 0 : index
    %c0_2 = arith.constant 0 : index
    %1 = vector.load %arg2[%c0_1, %c0_2] : memref<32x96xf32, #tpu.memory_space<vmem>>, vector<32x96xf32>
    %cst = arith.constant dense<0.000000e+00> : vector<64x96xf32>
    %2 = tpu.matmul %0, %1, %cst {dimension_numbers = #tpu.dot_dimension_numbers<[1], [0], [0], [1], [0, 0, 1, 1], [], []>} : vector<64x32xf32>, vector<32x96xf32>, vector<64x96xf32> -> vector<64x96xf32>
    %c0_3 = arith.constant 0 : index
    %c0_4 = arith.constant 0 : index
    %3 = vector.load %arg3[%c0_3, %c0_4] : memref<1x96xf32, #tpu.memory_space<vmem>>, vector<1x96xf32>
    %4 = vector.broadcast %3 : vector<1x96xf32> to vector<64x96xf32>
    %5 = arith.addf %2, %4 : vector<64x96xf32>
    %c0_5 = arith.constant 0 : index
    %c0_6 = arith.constant 0 : index
    %6 = vector.load %arg4[%c0_5, %c0_6] : memref<64x96xf32, #tpu.memory_space<vmem>>, vector<64x96xf32>
    tpu.vector_store %arg4[%c0_5, %c0_6], %5 {strides = array<i32>} : memref<64x96xf32, #tpu.memory_space<vmem>>, vector<64x96xf32>,
    return
  }
  func.func @transform_0(%arg0: i32) -> (i32, i32) {
    %c0_i32 = arith.constant 0 : i32
    %c0_i32_0 = arith.constant 0 : i32
    return %arg0, %c0_i32 : i32, i32
  }
  func.func @transform_1(%arg0: i32) -> (i32, i32) {
    %c0_i32 = arith.constant 0 : i32
    %c0_i32_0 = arith.constant 0 : i32
    %c0_i32_1 = arith.constant 0 : i32
    return %c0_i32, %c0_i32_0 : i32, i32
  }
  func.func @transform_2(%arg0: i32) -> (i32, i32) {
    %c0_i32 = arith.constant 0 : i32
    %c0_i32_0 = arith.constant 0 : i32
    %c0_i32_1 = arith.constant 0 : i32
    return %c0_i32, %c0_i32_0 : i32, i32
  }
  func.func @transform_3(%arg0: i32) -> (i32, i32) {
    %c0_i32 = arith.constant 0 : i32
    %c0_i32_0 = arith.constant 0 : i32
    return %arg0, %c0_i32 : i32, i32
  }
}

module attributes {stable_mosaic.version = 11 : i64} {
  func.func @_attn_kernel(%arg0: i32, %arg1: memref<8x4x32xf32, #tpu.memory_space<vmem>>, %arg2: memref<8x4x64xf32, #tpu.memory_space<vmem>>, %arg3: memref<8x4x32xf32, #tpu.memory_space<vmem>>) attributes {dimension_semantics = [#tpu.dimension_semantics<parallel>], iteration_bounds = array<i64: 2>, scalar_prefetch = 0 : i64, scratch_operands = 0 : i64, tpu.core_type = #tpu.core_type<tc>, window_params = [{transform_indices = @transform_0, window_bounds = array<i64: 8, 4, 32>}, {transform_indices = @transform_1, window_bounds = array<i64: 8, 4, 64>}, {transform_indices = @transform_2, window_bounds = array<i64: 8, 4, 32>}]} {
    %c0 = arith.constant 0 : index
    %c0_0 = arith.constant 0 : index
    %c0_1 = arith.constant 0 : index
    %0 = vector.load %arg1[%c0, %c0_0, %c0_1] : memref<8x4x32xf32, #tpu.memory_space<vmem>>, vector<8x4x32xf32>
    %c0_2 = arith.constant 0 : index
    %c0_3 = arith.constant 0 : index
    %c0_4 = arith.constant 0 : index
    %1 = vector.load %arg2[%c0_2, %c0_3, %c0_4] : memref<8x4x64xf32, #tpu.memory_space<vmem>>, vector<8x4x64xf32>
    %2 = vector.extract_strided_slice %0 {offsets = [0, 0, 0], sizes = [8, 4, 8], strides = [1, 1, 1]} : vector<8x4x32xf32> to vector<8x4x8xf32>
    %3 = vector.extract_strided_slice %1 {offsets = [0, 0, 0], sizes = [8, 4, 8], strides = [1, 1, 1]} : vector<8x4x64xf32> to vector<8x4x8xf32>
    %4 = vector.extract_strided_slice %1 {offsets = [0, 0, 32], sizes = [8, 4, 8], strides = [1, 1, 1]} : vector<8x4x64xf32> to vector<8x4x8xf32>
    %cst = arith.constant dense<0.000000e+00> : vector<8x4x4xf32>
    %5 = tpu.matmul %2, %3, %cst {dimension_numbers = #tpu.dot_dimension_numbers<[2], [2], [1], [1], [0, 0, 0, 1, 1, 1], [0], [0]>} : vector<8x4x8xf32>, vector<8x4x8xf32>, vector<8x4x4xf32> -> vector<8x4x4xf32>
    %cst_5 = arith.constant dense<0xFF800000> : vector<8x4xf32>
    %6 = vector.multi_reduction <maximumf>, %5, %cst_5 [2] : vector<8x4x4xf32> to vector<8x4xf32>
    %7 = vector.shape_cast %6 : vector<8x4xf32> to vector<8x4x1xf32>
    %8 = vector.broadcast %7 : vector<8x4x1xf32> to vector<8x4x4xf32>
    %9 = arith.subf %5, %8 : vector<8x4x4xf32>
    %10 = math.exp %9 : vector<8x4x4xf32>
    %cst_6 = arith.constant dense<0.000000e+00> : vector<8x4xf32>
    %11 = vector.multi_reduction <add>, %10, %cst_6 [2] : vector<8x4x4xf32> to vector<8x4xf32>
    %12 = vector.shape_cast %11 : vector<8x4xf32> to vector<8x4x1xf32>
    %13 = tpu.reciprocal %12 {approx = true} : vector<8x4x1xf32> -> vector<8x4x1xf32>
    %14 = vector.broadcast %13 : vector<8x4x1xf32> to vector<8x4x4xf32>
    %15 = arith.mulf %10, %14 : vector<8x4x4xf32>
    %cst_7 = arith.constant dense<0.000000e+00> : vector<8x4x8xf32>
    %16 = tpu.matmul %15, %4, %cst_7 {dimension_numbers = #tpu.dot_dimension_numbers<[2], [1], [1], [2], [0, 0, 0, 1, 1, 2], [0], [0]>} : vector<8x4x4xf32>, vector<8x4x8xf32>, vector<8x4x8xf32> -> vector<8x4x8xf32>
    %17 = vector.extract_strided_slice %0 {offsets = [0, 0, 8], sizes = [8, 4, 8], strides = [1, 1, 1]} : vector<8x4x32xf32> to vector<8x4x8xf32>
    %18 = vector.extract_strided_slice %1 {offsets = [0, 0, 8], sizes = [8, 4, 8], strides = [1, 1, 1]} : vector<8x4x64xf32> to vector<8x4x8xf32>
    %19 = vector.extract_strided_slice %1 {offsets = [0, 0, 40], sizes = [8, 4, 8], strides = [1, 1, 1]} : vector<8x4x64xf32> to vector<8x4x8xf32>
    %cst_8 = arith.constant dense<0.000000e+00> : vector<8x4x4xf32>
    %20 = tpu.matmul %17, %18, %cst_8 {dimension_numbers = #tpu.dot_dimension_numbers<[2], [2], [1], [1], [0, 0, 0, 1, 1, 1], [0], [0]>} : vector<8x4x8xf32>, vector<8x4x8xf32>, vector<8x4x4xf32> -> vector<8x4x4xf32>
    %cst_9 = arith.constant dense<0xFF800000> : vector<8x4xf32>
    %21 = vector.multi_reduction <maximumf>, %20, %cst_9 [2] : vector<8x4x4xf32> to vector<8x4xf32>
    %22 = vector.shape_cast %21 : vector<8x4xf32> to vector<8x4x1xf32>
    %23 = vector.broadcast %22 : vector<8x4x1xf32> to vector<8x4x4xf32>
    %24 = arith.subf %20, %23 : vector<8x4x4xf32>
    %25 = math.exp %24 : vector<8x4x4xf32>
    %cst_10 = arith.constant dense<0.000000e+00> : vector<8x4xf32>
    %26 = vector.multi_reduction <add>, %25, %cst_10 [2] : vector<8x4x4xf32> to vector<8x4xf32>
    %27 = vector.shape_cast %26 : vector<8x4xf32> to vector<8x4x1xf32>
    %28 = tpu.reciprocal %27 {approx = true} : vector<8x4x1xf32> -> vector<8x4x1xf32>
    %29 = vector.broadcast %28 : vector<8x4x1xf32> to vector<8x4x4xf32>
    %30 = arith.mulf %25, %29 : vector<8x4x4xf32>
    %cst_11 = arith.constant dense<0.000000e+00> : vector<8x4x8xf32>
    %31 = tpu.matmul %30, %19, %cst_11 {dimension_numbers = #tpu.dot_dimension_numbers<[2], [1], [1], [2], [0, 0, 0, 1, 1, 2], [0], [0]>} : vector<8x4x4xf32>, vector<8x4x8xf32>, vector<8x4x8xf32> -> vector<8x4x8xf32>
    %32 = vector.extract_strided_slice %0 {offsets = [0, 0, 16], sizes = [8, 4, 8], strides = [1, 1, 1]} : vector<8x4x32xf32> to vector<8x4x8xf32>
    %33 = vector.extract_strided_slice %1 {offsets = [0, 0, 16], sizes = [8, 4, 8], strides = [1, 1, 1]} : vector<8x4x64xf32> to vector<8x4x8xf32>
    %34 = vector.extract_strided_slice %1 {offsets = [0, 0, 48], sizes = [8, 4, 8], strides = [1, 1, 1]} : vector<8x4x64xf32> to vector<8x4x8xf32>
    %cst_12 = arith.constant dense<0.000000e+00> : vector<8x4x4xf32>
    %35 = tpu.matmul %32, %33, %cst_12 {dimension_numbers = #tpu.dot_dimension_numbers<[2], [2], [1], [1], [0, 0, 0, 1, 1, 1], [0], [0]>} : vector<8x4x8xf32>, vector<8x4x8xf32>, vector<8x4x4xf32> -> vector<8x4x4xf32>
    %cst_13 = arith.constant dense<0xFF800000> : vector<8x4xf32>
    %36 = vector.multi_reduction <maximumf>, %35, %cst_13 [2] : vector<8x4x4xf32> to vector<8x4xf32>
    %37 = vector.shape_cast %36 : vector<8x4xf32> to vector<8x4x1xf32>
    %38 = vector.broadcast %37 : vector<8x4x1xf32> to vector<8x4x4xf32>
    %39 = arith.subf %35, %38 : vector<8x4x4xf32>
    %40 = math.exp %39 : vector<8x4x4xf32>
    %cst_14 = arith.constant dense<0.000000e+00> : vector<8x4xf32>
    %41 = vector.multi_reduction <add>, %40, %cst_14 [2] : vector<8x4x4xf32> to vector<8x4xf32>
    %42 = vector.shape_cast %41 : vector<8x4xf32> to vector<8x4x1xf32>
    %43 = tpu.reciprocal %42 {approx = true} : vector<8x4x1xf32> -> vector<8x4x1xf32>
    %44 = vector.broadcast %43 : vector<8x4x1xf32> to vector<8x4x4xf32>
    %45 = arith.mulf %40, %44 : vector<8x4x4xf32>
    %cst_15 = arith.constant dense<0.000000e+00> : vector<8x4x8xf32>
    %46 = tpu.matmul %45, %34, %cst_15 {dimension_numbers = #tpu.dot_dimension_numbers<[2], [1], [1], [2], [0, 0, 0, 1, 1, 2], [0], [0]>} : vector<8x4x4xf32>, vector<8x4x8xf32>, vector<8x4x8xf32> -> vector<8x4x8xf32>
    %47 = vector.extract_strided_slice %0 {offsets = [0, 0, 24], sizes = [8, 4, 8], strides = [1, 1, 1]} : vector<8x4x32xf32> to vector<8x4x8xf32>
    %48 = vector.extract_strided_slice %1 {offsets = [0, 0, 24], sizes = [8, 4, 8], strides = [1, 1, 1]} : vector<8x4x64xf32> to vector<8x4x8xf32>
    %49 = vector.extract_strided_slice %1 {offsets = [0, 0, 56], sizes = [8, 4, 8], strides = [1, 1, 1]} : vector<8x4x64xf32> to vector<8x4x8xf32>
    %cst_16 = arith.constant dense<0.000000e+00> : vector<8x4x4xf32>
    %50 = tpu.matmul %47, %48, %cst_16 {dimension_numbers = #tpu.dot_dimension_numbers<[2], [2], [1], [1], [0, 0, 0, 1, 1, 1], [0], [0]>} : vector<8x4x8xf32>, vector<8x4x8xf32>, vector<8x4x4xf32> -> vector<8x4x4xf32>
    %cst_17 = arith.constant dense<0xFF800000> : vector<8x4xf32>
    %51 = vector.multi_reduction <maximumf>, %50, %cst_17 [2] : vector<8x4x4xf32> to vector<8x4xf32>
    %52 = vector.shape_cast %51 : vector<8x4xf32> to vector<8x4x1xf32>
    %53 = vector.broadcast %52 : vector<8x4x1xf32> to vector<8x4x4xf32>
    %54 = arith.subf %50, %53 : vector<8x4x4xf32>
    %55 = math.exp %54 : vector<8x4x4xf32>
    %cst_18 = arith.constant dense<0.000000e+00> : vector<8x4xf32>
    %56 = vector.multi_reduction <add>, %55, %cst_18 [2] : vector<8x4x4xf32> to vector<8x4xf32>
    %57 = vector.shape_cast %56 : vector<8x4xf32> to vector<8x4x1xf32>
    %58 = tpu.reciprocal %57 {approx = true} : vector<8x4x1xf32> -> vector<8x4x1xf32>
    %59 = vector.broadcast %58 : vector<8x4x1xf32> to vector<8x4x4xf32>
    %60 = arith.mulf %55, %59 : vector<8x4x4xf32>
    %cst_19 = arith.constant dense<0.000000e+00> : vector<8x4x8xf32>
    %61 = tpu.matmul %60, %49, %cst_19 {dimension_numbers = #tpu.dot_dimension_numbers<[2], [1], [1], [2], [0, 0, 0, 1, 1, 2], [0], [0]>} : vector<8x4x4xf32>, vector<8x4x8xf32>, vector<8x4x8xf32> -> vector<8x4x8xf32>
    %62 = tpu.concatenate %16, %31, %46, %61 in 2 : vector<8x4x8xf32>, vector<8x4x8xf32>, vector<8x4x8xf32>, vector<8x4x8xf32> -> vector<8x4x32xf32>
    %c0_20 = arith.constant 0 : index
    %c0_21 = arith.constant 0 : index
    %c0_22 = arith.constant 0 : index
    %63 = vector.load %arg3[%c0_20, %c0_21, %c0_22] : memref<8x4x32xf32, #tpu.memory_space<vmem>>, vector<8x4x32xf32>
    tpu.vector_store %arg3[%c0_20, %c0_21, %c0_22], %62 {strides = array<i32>} : memref<8x4x32xf32, #tpu.memory_space<vmem>>, vector<8x4x32xf32>,
    return
  }
  func.func @transform_0(%arg0: i32) -> (i32, i32, i32) {
    %c0_i32 = arith.constant 0 : i32
    %c0_i32_0 = arith.constant 0 : i32
    %c0_i32_1 = arith.constant 0 : i32
    return %arg0, %c0_i32, %c0_i32_0 : i32, i32, i32
  }
  func.func @transform_1(%arg0: i32) -> (i32, i32, i32) {
    %c0_i32 = arith.constant 0 : i32
    %c0_i32_0 = arith.constant 0 : i32
    %c0_i32_1 = arith.constant 0 : i32
    return %arg0, %c0_i32, %c0_i32_0 : i32, i32, i32
  }
  func.func @transform_2(%arg0: i32) -> (i32, i32, i32) {
    %c0_i32 = arith.constant 0 : i32
    %c0_i32_0 = arith.constant 0 : i32
    %c0_i32_1 = arith.constant 0 : i32
    return %arg0, %c0_i32, %c0_i32_0 : i32, i32, i32
  }
}

module attributes {stable_mosaic.version = 11 : i64} {
  func.func @_proj_res_ln_kernel(%arg0: i32, %arg1: memref<64x32xf32, #tpu.memory_space<vmem>>, %arg2: memref<32x32xf32, #tpu.memory_space<vmem>>, %arg3: memref<1x32xf32, #tpu.memory_space<vmem>>, %arg4: memref<64x32xf32, #tpu.memory_space<vmem>>, %arg5: memref<1x32xf32, #tpu.memory_space<vmem>>, %arg6: memref<1x32xf32, #tpu.memory_space<vmem>>, %arg7: memref<64x32xf32, #tpu.memory_space<vmem>>) attributes {dimension_semantics = [#tpu.dimension_semantics<parallel>], iteration_bounds = array<i64: 1>, scalar_prefetch = 0 : i64, scratch_operands = 0 : i64, tpu.core_type = #tpu.core_type<tc>, window_params = [{transform_indices = @transform_0, window_bounds = array<i64: 64, 32>}, {pipeline_mode = #tpu.pipeline_mode<synchronous>, transform_indices = @transform_1, window_bounds = array<i64: 32, 32>}, {pipeline_mode = #tpu.pipeline_mode<synchronous>, transform_indices = @transform_2, window_bounds = array<i64: 1, 32>}, {transform_indices = @transform_3, window_bounds = array<i64: 64, 32>}, {pipeline_mode = #tpu.pipeline_mode<synchronous>, transform_indices = @transform_4, window_bounds = array<i64: 1, 32>}, {pipeline_mode = #tpu.pipeline_mode<synchronous>, transform_indices = @transform_5, window_bounds = array<i64: 1, 32>}, {transform_indices = @transform_6, window_bounds = array<i64: 64, 32>}]} {
    %c0 = arith.constant 0 : index
    %c0_0 = arith.constant 0 : index
    %0 = vector.load %arg1[%c0, %c0_0] : memref<64x32xf32, #tpu.memory_space<vmem>>, vector<64x32xf32>
    %c0_1 = arith.constant 0 : index
    %c0_2 = arith.constant 0 : index
    %1 = vector.load %arg2[%c0_1, %c0_2] : memref<32x32xf32, #tpu.memory_space<vmem>>, vector<32x32xf32>
    %cst = arith.constant dense<0.000000e+00> : vector<64x32xf32>
    %2 = tpu.matmul %0, %1, %cst {dimension_numbers = #tpu.dot_dimension_numbers<[1], [0], [0], [1], [0, 0, 1, 1], [], []>} : vector<64x32xf32>, vector<32x32xf32>, vector<64x32xf32> -> vector<64x32xf32>
    %c0_3 = arith.constant 0 : index
    %c0_4 = arith.constant 0 : index
    %3 = vector.load %arg3[%c0_3, %c0_4] : memref<1x32xf32, #tpu.memory_space<vmem>>, vector<1x32xf32>
    %4 = vector.broadcast %3 : vector<1x32xf32> to vector<64x32xf32>
    %5 = arith.addf %2, %4 : vector<64x32xf32>
    %c0_5 = arith.constant 0 : index
    %c0_6 = arith.constant 0 : index
    %6 = vector.load %arg4[%c0_5, %c0_6] : memref<64x32xf32, #tpu.memory_space<vmem>>, vector<64x32xf32>
    %7 = arith.addf %5, %6 : vector<64x32xf32>
    %c0_7 = arith.constant 0 : index
    %c0_8 = arith.constant 0 : index
    %8 = vector.load %arg5[%c0_7, %c0_8] : memref<1x32xf32, #tpu.memory_space<vmem>>, vector<1x32xf32>
    %c0_9 = arith.constant 0 : index
    %c0_10 = arith.constant 0 : index
    %9 = vector.load %arg6[%c0_9, %c0_10] : memref<1x32xf32, #tpu.memory_space<vmem>>, vector<1x32xf32>
    %cst_11 = arith.constant dense<0.000000e+00> : vector<64xf32>
    %10 = vector.multi_reduction <add>, %7, %cst_11 [1] : vector<64x32xf32> to vector<64xf32>
    %11 = vector.shape_cast %10 : vector<64xf32> to vector<64x1xf32>
    %cst_12 = arith.constant 3.200000e+01 : f32
    %12 = vector.broadcast %cst_12 : f32 to vector<64x1xf32>
    %13 = arith.divf %11, %12 : vector<64x1xf32>
    %14 = vector.broadcast %13 : vector<64x1xf32> to vector<64x32xf32>
    %15 = arith.subf %7, %14 : vector<64x32xf32>
    %16 = arith.mulf %15, %15 : vector<64x32xf32>
    %cst_13 = arith.constant dense<0.000000e+00> : vector<64xf32>
    %17 = vector.multi_reduction <add>, %16, %cst_13 [1] : vector<64x32xf32> to vector<64xf32>
    %18 = vector.shape_cast %17 : vector<64xf32> to vector<64x1xf32>
    %cst_14 = arith.constant 3.200000e+01 : f32
    %19 = vector.broadcast %cst_14 : f32 to vector<64x1xf32>
    %20 = arith.divf %18, %19 : vector<64x1xf32>
    %21 = vector.broadcast %13 : vector<64x1xf32> to vector<64x32xf32>
    %22 = arith.subf %7, %21 : vector<64x32xf32>
    %cst_15 = arith.constant 9.99999974E-6 : f32
    %23 = vector.broadcast %cst_15 : f32 to vector<64x1xf32>
    %24 = arith.addf %20, %23 : vector<64x1xf32>
    %25 = math.rsqrt %24 : vector<64x1xf32>
    %26 = vector.broadcast %25 : vector<64x1xf32> to vector<64x32xf32>
    %27 = arith.mulf %22, %26 : vector<64x32xf32>
    %28 = vector.broadcast %8 : vector<1x32xf32> to vector<64x32xf32>
    %29 = arith.mulf %27, %28 : vector<64x32xf32>
    %30 = vector.broadcast %9 : vector<1x32xf32> to vector<64x32xf32>
    %31 = arith.addf %29, %30 : vector<64x32xf32>
    %c0_16 = arith.constant 0 : index
    %c0_17 = arith.constant 0 : index
    %32 = vector.load %arg7[%c0_16, %c0_17] : memref<64x32xf32, #tpu.memory_space<vmem>>, vector<64x32xf32>
    tpu.vector_store %arg7[%c0_16, %c0_17], %31 {strides = array<i32>} : memref<64x32xf32, #tpu.memory_space<vmem>>, vector<64x32xf32>,
    return
  }
  func.func @transform_0(%arg0: i32) -> (i32, i32) {
    %c0_i32 = arith.constant 0 : i32
    %c0_i32_0 = arith.constant 0 : i32
    return %arg0, %c0_i32 : i32, i32
  }
  func.func @transform_1(%arg0: i32) -> (i32, i32) {
    %c0_i32 = arith.constant 0 : i32
    %c0_i32_0 = arith.constant 0 : i32
    %c0_i32_1 = arith.constant 0 : i32
    return %c0_i32, %c0_i32_0 : i32, i32
  }
  func.func @transform_2(%arg0: i32) -> (i32, i32) {
    %c0_i32 = arith.constant 0 : i32
    %c0_i32_0 = arith.constant 0 : i32
    %c0_i32_1 = arith.constant 0 : i32
    return %c0_i32, %c0_i32_0 : i32, i32
  }
  func.func @transform_3(%arg0: i32) -> (i32, i32) {
    %c0_i32 = arith.constant 0 : i32
    %c0_i32_0 = arith.constant 0 : i32
    return %arg0, %c0_i32 : i32, i32
  }
  func.func @transform_4(%arg0: i32) -> (i32, i32) {
    %c0_i32 = arith.constant 0 : i32
    %c0_i32_0 = arith.constant 0 : i32
    %c0_i32_1 = arith.constant 0 : i32
    return %c0_i32, %c0_i32_0 : i32, i32
  }
  func.func @transform_5(%arg0: i32) -> (i32, i32) {
    %c0_i32 = arith.constant 0 : i32
    %c0_i32_0 = arith.constant 0 : i32
    %c0_i32_1 = arith.constant 0 : i32
    return %c0_i32, %c0_i32_0 : i32, i32
  }
  func.func @transform_6(%arg0: i32) -> (i32, i32) {
    %c0_i32 = arith.constant 0 : i32
    %c0_i32_0 = arith.constant 0 : i32
    return %arg0, %c0_i32 : i32, i32
  }
}

module attributes {stable_mosaic.version = 11 : i64} {
  func.func @_ffn_res_ln_kernel(%arg0: i32, %arg1: memref<64x32xf32, #tpu.memory_space<vmem>>, %arg2: memref<32x128xf32, #tpu.memory_space<vmem>>, %arg3: memref<1x128xf32, #tpu.memory_space<vmem>>, %arg4: memref<128x32xf32, #tpu.memory_space<vmem>>, %arg5: memref<1x32xf32, #tpu.memory_space<vmem>>, %arg6: memref<1x32xf32, #tpu.memory_space<vmem>>, %arg7: memref<1x32xf32, #tpu.memory_space<vmem>>, %arg8: memref<64x32xf32, #tpu.memory_space<vmem>>) attributes {dimension_semantics = [#tpu.dimension_semantics<parallel>], iteration_bounds = array<i64: 1>, scalar_prefetch = 0 : i64, scratch_operands = 0 : i64, tpu.core_type = #tpu.core_type<tc>, window_params = [{transform_indices = @transform_0, window_bounds = array<i64: 64, 32>}, {pipeline_mode = #tpu.pipeline_mode<synchronous>, transform_indices = @transform_1, window_bounds = array<i64: 32, 128>}, {pipeline_mode = #tpu.pipeline_mode<synchronous>, transform_indices = @transform_2, window_bounds = array<i64: 1, 128>}, {pipeline_mode = #tpu.pipeline_mode<synchronous>, transform_indices = @transform_3, window_bounds = array<i64: 128, 32>}, {pipeline_mode = #tpu.pipeline_mode<synchronous>, transform_indices = @transform_4, window_bounds = array<i64: 1, 32>}, {pipeline_mode = #tpu.pipeline_mode<synchronous>, transform_indices = @transform_5, window_bounds = array<i64: 1, 32>}, {pipeline_mode = #tpu.pipeline_mode<synchronous>, transform_indices = @transform_6, window_bounds = array<i64: 1, 32>}, {transform_indices = @transform_7, window_bounds = array<i64: 64, 32>}]} {
    %c0 = arith.constant 0 : index
    %c0_0 = arith.constant 0 : index
    %0 = vector.load %arg1[%c0, %c0_0] : memref<64x32xf32, #tpu.memory_space<vmem>>, vector<64x32xf32>
    %c0_1 = arith.constant 0 : index
    %c0_2 = arith.constant 0 : index
    %1 = vector.load %arg2[%c0_1, %c0_2] : memref<32x128xf32, #tpu.memory_space<vmem>>, vector<32x128xf32>
    %cst = arith.constant dense<0.000000e+00> : vector<64x128xf32>
    %2 = tpu.matmul %0, %1, %cst {dimension_numbers = #tpu.dot_dimension_numbers<[1], [0], [0], [1], [0, 0, 1, 1], [], []>} : vector<64x32xf32>, vector<32x128xf32>, vector<64x128xf32> -> vector<64x128xf32>
    %c0_3 = arith.constant 0 : index
    %c0_4 = arith.constant 0 : index
    %3 = vector.load %arg3[%c0_3, %c0_4] : memref<1x128xf32, #tpu.memory_space<vmem>>, vector<1x128xf32>
    %4 = vector.broadcast %3 : vector<1x128xf32> to vector<64x128xf32>
    %5 = arith.addf %2, %4 : vector<64x128xf32>
    %cst_5 = arith.constant 0.000000e+00 : f32
    %6 = vector.broadcast %cst_5 : f32 to vector<64x128xf32>
    %7 = arith.maximumf %5, %6 : vector<64x128xf32>
    %c0_6 = arith.constant 0 : index
    %c0_7 = arith.constant 0 : index
    %8 = vector.load %arg4[%c0_6, %c0_7] : memref<128x32xf32, #tpu.memory_space<vmem>>, vector<128x32xf32>
    %cst_8 = arith.constant dense<0.000000e+00> : vector<64x32xf32>
    %9 = tpu.matmul %7, %8, %cst_8 {dimension_numbers = #tpu.dot_dimension_numbers<[1], [0], [0], [1], [0, 0, 1, 1], [], []>} : vector<64x128xf32>, vector<128x32xf32>, vector<64x32xf32> -> vector<64x32xf32>
    %10 = arith.addf %0, %9 : vector<64x32xf32>
    %c0_9 = arith.constant 0 : index
    %c0_10 = arith.constant 0 : index
    %11 = vector.load %arg5[%c0_9, %c0_10] : memref<1x32xf32, #tpu.memory_space<vmem>>, vector<1x32xf32>
    %12 = vector.broadcast %11 : vector<1x32xf32> to vector<64x32xf32>
    %13 = arith.addf %10, %12 : vector<64x32xf32>
    %c0_11 = arith.constant 0 : index
    %c0_12 = arith.constant 0 : index
    %14 = vector.load %arg6[%c0_11, %c0_12] : memref<1x32xf32, #tpu.memory_space<vmem>>, vector<1x32xf32>
    %c0_13 = arith.constant 0 : index
    %c0_14 = arith.constant 0 : index
    %15 = vector.load %arg7[%c0_13, %c0_14] : memref<1x32xf32, #tpu.memory_space<vmem>>, vector<1x32xf32>
    %cst_15 = arith.constant dense<0.000000e+00> : vector<64xf32>
    %16 = vector.multi_reduction <add>, %13, %cst_15 [1] : vector<64x32xf32> to vector<64xf32>
    %17 = vector.shape_cast %16 : vector<64xf32> to vector<64x1xf32>
    %cst_16 = arith.constant 3.200000e+01 : f32
    %18 = vector.broadcast %cst_16 : f32 to vector<64x1xf32>
    %19 = arith.divf %17, %18 : vector<64x1xf32>
    %20 = vector.broadcast %19 : vector<64x1xf32> to vector<64x32xf32>
    %21 = arith.subf %13, %20 : vector<64x32xf32>
    %22 = arith.mulf %21, %21 : vector<64x32xf32>
    %cst_17 = arith.constant dense<0.000000e+00> : vector<64xf32>
    %23 = vector.multi_reduction <add>, %22, %cst_17 [1] : vector<64x32xf32> to vector<64xf32>
    %24 = vector.shape_cast %23 : vector<64xf32> to vector<64x1xf32>
    %cst_18 = arith.constant 3.200000e+01 : f32
    %25 = vector.broadcast %cst_18 : f32 to vector<64x1xf32>
    %26 = arith.divf %24, %25 : vector<64x1xf32>
    %27 = vector.broadcast %19 : vector<64x1xf32> to vector<64x32xf32>
    %28 = arith.subf %13, %27 : vector<64x32xf32>
    %cst_19 = arith.constant 9.99999974E-6 : f32
    %29 = vector.broadcast %cst_19 : f32 to vector<64x1xf32>
    %30 = arith.addf %26, %29 : vector<64x1xf32>
    %31 = math.rsqrt %30 : vector<64x1xf32>
    %32 = vector.broadcast %31 : vector<64x1xf32> to vector<64x32xf32>
    %33 = arith.mulf %28, %32 : vector<64x32xf32>
    %34 = vector.broadcast %14 : vector<1x32xf32> to vector<64x32xf32>
    %35 = arith.mulf %33, %34 : vector<64x32xf32>
    %36 = vector.broadcast %15 : vector<1x32xf32> to vector<64x32xf32>
    %37 = arith.addf %35, %36 : vector<64x32xf32>
    %c0_20 = arith.constant 0 : index
    %c0_21 = arith.constant 0 : index
    %38 = vector.load %arg8[%c0_20, %c0_21] : memref<64x32xf32, #tpu.memory_space<vmem>>, vector<64x32xf32>
    tpu.vector_store %arg8[%c0_20, %c0_21], %37 {strides = array<i32>} : memref<64x32xf32, #tpu.memory_space<vmem>>, vector<64x32xf32>,
    return
  }
  func.func @transform_0(%arg0: i32) -> (i32, i32) {
    %c0_i32 = arith.constant 0 : i32
    %c0_i32_0 = arith.constant 0 : i32
    return %arg0, %c0_i32 : i32, i32
  }
  func.func @transform_1(%arg0: i32) -> (i32, i32) {
    %c0_i32 = arith.constant 0 : i32
    %c0_i32_0 = arith.constant 0 : i32
    %c0_i32_1 = arith.constant 0 : i32
    return %c0_i32, %c0_i32_0 : i32, i32
  }
  func.func @transform_2(%arg0: i32) -> (i32, i32) {
    %c0_i32 = arith.constant 0 : i32
    %c0_i32_0 = arith.constant 0 : i32
    %c0_i32_1 = arith.constant 0 : i32
    return %c0_i32, %c0_i32_0 : i32, i32
  }
  func.func @transform_3(%arg0: i32) -> (i32, i32) {
    %c0_i32 = arith.constant 0 : i32
    %c0_i32_0 = arith.constant 0 : i32
    %c0_i32_1 = arith.constant 0 : i32
    return %c0_i32, %c0_i32_0 : i32, i32
  }
  func.func @transform_4(%arg0: i32) -> (i32, i32) {
    %c0_i32 = arith.constant 0 : i32
    %c0_i32_0 = arith.constant 0 : i32
    %c0_i32_1 = arith.constant 0 : i32
    return %c0_i32, %c0_i32_0 : i32, i32
  }
  func.func @transform_5(%arg0: i32) -> (i32, i32) {
    %c0_i32 = arith.constant 0 : i32
    %c0_i32_0 = arith.constant 0 : i32
    %c0_i32_1 = arith.constant 0 : i32
    return %c0_i32, %c0_i32_0 : i32, i32
  }
  func.func @transform_6(%arg0: i32) -> (i32, i32) {
    %c0_i32 = arith.constant 0 : i32
    %c0_i32_0 = arith.constant 0 : i32
    %c0_i32_1 = arith.constant 0 : i32
    return %c0_i32, %c0_i32_0 : i32, i32
  }
  func.func @transform_7(%arg0: i32) -> (i32, i32) {
    %c0_i32 = arith.constant 0 : i32
    %c0_i32_0 = arith.constant 0 : i32
    return %arg0, %c0_i32 : i32, i32
  }
}

module attributes {stable_mosaic.version = 11 : i64} {
  func.func @_linear_kernel(%arg0: i32, %arg1: memref<64x32xf32, #tpu.memory_space<vmem>>, %arg2: memref<32x32xf32, #tpu.memory_space<vmem>>, %arg3: memref<1x32xf32, #tpu.memory_space<vmem>>, %arg4: memref<64x32xf32, #tpu.memory_space<vmem>>) attributes {dimension_semantics = [#tpu.dimension_semantics<parallel>], iteration_bounds = array<i64: 1>, scalar_prefetch = 0 : i64, scratch_operands = 0 : i64, tpu.core_type = #tpu.core_type<tc>, window_params = [{transform_indices = @transform_0, window_bounds = array<i64: 64, 32>}, {pipeline_mode = #tpu.pipeline_mode<synchronous>, transform_indices = @transform_1, window_bounds = array<i64: 32, 32>}, {pipeline_mode = #tpu.pipeline_mode<synchronous>, transform_indices = @transform_2, window_bounds = array<i64: 1, 32>}, {transform_indices = @transform_3, window_bounds = array<i64: 64, 32>}]} {
    %c0 = arith.constant 0 : index
    %c0_0 = arith.constant 0 : index
    %0 = vector.load %arg1[%c0, %c0_0] : memref<64x32xf32, #tpu.memory_space<vmem>>, vector<64x32xf32>
    %c0_1 = arith.constant 0 : index
    %c0_2 = arith.constant 0 : index
    %1 = vector.load %arg2[%c0_1, %c0_2] : memref<32x32xf32, #tpu.memory_space<vmem>>, vector<32x32xf32>
    %cst = arith.constant dense<0.000000e+00> : vector<64x32xf32>
    %2 = tpu.matmul %0, %1, %cst {dimension_numbers = #tpu.dot_dimension_numbers<[1], [0], [0], [1], [0, 0, 1, 1], [], []>} : vector<64x32xf32>, vector<32x32xf32>, vector<64x32xf32> -> vector<64x32xf32>
    %c0_3 = arith.constant 0 : index
    %c0_4 = arith.constant 0 : index
    %3 = vector.load %arg3[%c0_3, %c0_4] : memref<1x32xf32, #tpu.memory_space<vmem>>, vector<1x32xf32>
    %4 = vector.broadcast %3 : vector<1x32xf32> to vector<64x32xf32>
    %5 = arith.addf %2, %4 : vector<64x32xf32>
    %c0_5 = arith.constant 0 : index
    %c0_6 = arith.constant 0 : index
    %6 = vector.load %arg4[%c0_5, %c0_6] : memref<64x32xf32, #tpu.memory_space<vmem>>, vector<64x32xf32>
    tpu.vector_store %arg4[%c0_5, %c0_6], %5 {strides = array<i32>} : memref<64x32xf32, #tpu.memory_space<vmem>>, vector<64x32xf32>,
    return
  }
  func.func @transform_0(%arg0: i32) -> (i32, i32) {
    %c0_i32 = arith.constant 0 : i32
    %c0_i32_0 = arith.constant 0 : i32
    return %arg0, %c0_i32 : i32, i32
  }
  func.func @transform_1(%arg0: i32) -> (i32, i32) {
    %c0_i32 = arith.constant 0 : i32
    %c0_i32_0 = arith.constant 0 : i32
    %c0_i32_1 = arith.constant 0 : i32
    return %c0_i32, %c0_i32_0 : i32, i32
  }
  func.func @transform_2(%arg0: i32) -> (i32, i32) {
    %c0_i32 = arith.constant 0 : i32
    %c0_i32_0 = arith.constant 0 : i32
    %c0_i32_1 = arith.constant 0 : i32
    return %c0_i32, %c0_i32_0 : i32, i32
  }
  func.func @transform_3(%arg0: i32) -> (i32, i32) {
    %c0_i32 = arith.constant 0 : i32
    %c0_i32_0 = arith.constant 0 : i32
    return %arg0, %c0_i32 : i32, i32
  }
}

module attributes {stable_mosaic.version = 11 : i64} {
  func.func @_attn_kernel(%arg0: i32, %arg1: memref<8x8x32xf32, #tpu.memory_space<vmem>>, %arg2: memref<8x8x64xf32, #tpu.memory_space<vmem>>, %arg3: memref<8x8x32xf32, #tpu.memory_space<vmem>>) attributes {dimension_semantics = [#tpu.dimension_semantics<parallel>], iteration_bounds = array<i64: 1>, scalar_prefetch = 0 : i64, scratch_operands = 0 : i64, tpu.core_type = #tpu.core_type<tc>, window_params = [{transform_indices = @transform_0, window_bounds = array<i64: 8, 8, 32>}, {transform_indices = @transform_1, window_bounds = array<i64: 8, 8, 64>}, {transform_indices = @transform_2, window_bounds = array<i64: 8, 8, 32>}]} {
    %c0 = arith.constant 0 : index
    %c0_0 = arith.constant 0 : index
    %c0_1 = arith.constant 0 : index
    %0 = vector.load %arg1[%c0, %c0_0, %c0_1] : memref<8x8x32xf32, #tpu.memory_space<vmem>>, vector<8x8x32xf32>
    %c0_2 = arith.constant 0 : index
    %c0_3 = arith.constant 0 : index
    %c0_4 = arith.constant 0 : index
    %1 = vector.load %arg2[%c0_2, %c0_3, %c0_4] : memref<8x8x64xf32, #tpu.memory_space<vmem>>, vector<8x8x64xf32>
    %2 = vector.extract_strided_slice %0 {offsets = [0, 0, 0], sizes = [8, 8, 8], strides = [1, 1, 1]} : vector<8x8x32xf32> to vector<8x8x8xf32>
    %3 = vector.extract_strided_slice %1 {offsets = [0, 0, 0], sizes = [8, 8, 8], strides = [1, 1, 1]} : vector<8x8x64xf32> to vector<8x8x8xf32>
    %4 = vector.extract_strided_slice %1 {offsets = [0, 0, 32], sizes = [8, 8, 8], strides = [1, 1, 1]} : vector<8x8x64xf32> to vector<8x8x8xf32>
    %cst = arith.constant dense<0.000000e+00> : vector<8x8x8xf32>
    %5 = tpu.matmul %2, %3, %cst {dimension_numbers = #tpu.dot_dimension_numbers<[2], [2], [1], [1], [0, 0, 0, 1, 1, 1], [0], [0]>} : vector<8x8x8xf32>, vector<8x8x8xf32>, vector<8x8x8xf32> -> vector<8x8x8xf32>
    %cst_5 = arith.constant dense<0xFF800000> : vector<8x8xf32>
    %6 = vector.multi_reduction <maximumf>, %5, %cst_5 [2] : vector<8x8x8xf32> to vector<8x8xf32>
    %7 = vector.shape_cast %6 : vector<8x8xf32> to vector<8x8x1xf32>
    %8 = vector.broadcast %7 : vector<8x8x1xf32> to vector<8x8x8xf32>
    %9 = arith.subf %5, %8 : vector<8x8x8xf32>
    %10 = math.exp %9 : vector<8x8x8xf32>
    %cst_6 = arith.constant dense<0.000000e+00> : vector<8x8xf32>
    %11 = vector.multi_reduction <add>, %10, %cst_6 [2] : vector<8x8x8xf32> to vector<8x8xf32>
    %12 = vector.shape_cast %11 : vector<8x8xf32> to vector<8x8x1xf32>
    %13 = tpu.reciprocal %12 {approx = true} : vector<8x8x1xf32> -> vector<8x8x1xf32>
    %14 = vector.broadcast %13 : vector<8x8x1xf32> to vector<8x8x8xf32>
    %15 = arith.mulf %10, %14 : vector<8x8x8xf32>
    %cst_7 = arith.constant dense<0.000000e+00> : vector<8x8x8xf32>
    %16 = tpu.matmul %15, %4, %cst_7 {dimension_numbers = #tpu.dot_dimension_numbers<[2], [1], [1], [2], [0, 0, 0, 1, 1, 2], [0], [0]>} : vector<8x8x8xf32>, vector<8x8x8xf32>, vector<8x8x8xf32> -> vector<8x8x8xf32>
    %17 = vector.extract_strided_slice %0 {offsets = [0, 0, 8], sizes = [8, 8, 8], strides = [1, 1, 1]} : vector<8x8x32xf32> to vector<8x8x8xf32>
    %18 = vector.extract_strided_slice %1 {offsets = [0, 0, 8], sizes = [8, 8, 8], strides = [1, 1, 1]} : vector<8x8x64xf32> to vector<8x8x8xf32>
    %19 = vector.extract_strided_slice %1 {offsets = [0, 0, 40], sizes = [8, 8, 8], strides = [1, 1, 1]} : vector<8x8x64xf32> to vector<8x8x8xf32>
    %cst_8 = arith.constant dense<0.000000e+00> : vector<8x8x8xf32>
    %20 = tpu.matmul %17, %18, %cst_8 {dimension_numbers = #tpu.dot_dimension_numbers<[2], [2], [1], [1], [0, 0, 0, 1, 1, 1], [0], [0]>} : vector<8x8x8xf32>, vector<8x8x8xf32>, vector<8x8x8xf32> -> vector<8x8x8xf32>
    %cst_9 = arith.constant dense<0xFF800000> : vector<8x8xf32>
    %21 = vector.multi_reduction <maximumf>, %20, %cst_9 [2] : vector<8x8x8xf32> to vector<8x8xf32>
    %22 = vector.shape_cast %21 : vector<8x8xf32> to vector<8x8x1xf32>
    %23 = vector.broadcast %22 : vector<8x8x1xf32> to vector<8x8x8xf32>
    %24 = arith.subf %20, %23 : vector<8x8x8xf32>
    %25 = math.exp %24 : vector<8x8x8xf32>
    %cst_10 = arith.constant dense<0.000000e+00> : vector<8x8xf32>
    %26 = vector.multi_reduction <add>, %25, %cst_10 [2] : vector<8x8x8xf32> to vector<8x8xf32>
    %27 = vector.shape_cast %26 : vector<8x8xf32> to vector<8x8x1xf32>
    %28 = tpu.reciprocal %27 {approx = true} : vector<8x8x1xf32> -> vector<8x8x1xf32>
    %29 = vector.broadcast %28 : vector<8x8x1xf32> to vector<8x8x8xf32>
    %30 = arith.mulf %25, %29 : vector<8x8x8xf32>
    %cst_11 = arith.constant dense<0.000000e+00> : vector<8x8x8xf32>
    %31 = tpu.matmul %30, %19, %cst_11 {dimension_numbers = #tpu.dot_dimension_numbers<[2], [1], [1], [2], [0, 0, 0, 1, 1, 2], [0], [0]>} : vector<8x8x8xf32>, vector<8x8x8xf32>, vector<8x8x8xf32> -> vector<8x8x8xf32>
    %32 = vector.extract_strided_slice %0 {offsets = [0, 0, 16], sizes = [8, 8, 8], strides = [1, 1, 1]} : vector<8x8x32xf32> to vector<8x8x8xf32>
    %33 = vector.extract_strided_slice %1 {offsets = [0, 0, 16], sizes = [8, 8, 8], strides = [1, 1, 1]} : vector<8x8x64xf32> to vector<8x8x8xf32>
    %34 = vector.extract_strided_slice %1 {offsets = [0, 0, 48], sizes = [8, 8, 8], strides = [1, 1, 1]} : vector<8x8x64xf32> to vector<8x8x8xf32>
    %cst_12 = arith.constant dense<0.000000e+00> : vector<8x8x8xf32>
    %35 = tpu.matmul %32, %33, %cst_12 {dimension_numbers = #tpu.dot_dimension_numbers<[2], [2], [1], [1], [0, 0, 0, 1, 1, 1], [0], [0]>} : vector<8x8x8xf32>, vector<8x8x8xf32>, vector<8x8x8xf32> -> vector<8x8x8xf32>
    %cst_13 = arith.constant dense<0xFF800000> : vector<8x8xf32>
    %36 = vector.multi_reduction <maximumf>, %35, %cst_13 [2] : vector<8x8x8xf32> to vector<8x8xf32>
    %37 = vector.shape_cast %36 : vector<8x8xf32> to vector<8x8x1xf32>
    %38 = vector.broadcast %37 : vector<8x8x1xf32> to vector<8x8x8xf32>
    %39 = arith.subf %35, %38 : vector<8x8x8xf32>
    %40 = math.exp %39 : vector<8x8x8xf32>
    %cst_14 = arith.constant dense<0.000000e+00> : vector<8x8xf32>
    %41 = vector.multi_reduction <add>, %40, %cst_14 [2] : vector<8x8x8xf32> to vector<8x8xf32>
    %42 = vector.shape_cast %41 : vector<8x8xf32> to vector<8x8x1xf32>
    %43 = tpu.reciprocal %42 {approx = true} : vector<8x8x1xf32> -> vector<8x8x1xf32>
    %44 = vector.broadcast %43 : vector<8x8x1xf32> to vector<8x8x8xf32>
    %45 = arith.mulf %40, %44 : vector<8x8x8xf32>
    %cst_15 = arith.constant dense<0.000000e+00> : vector<8x8x8xf32>
    %46 = tpu.matmul %45, %34, %cst_15 {dimension_numbers = #tpu.dot_dimension_numbers<[2], [1], [1], [2], [0, 0, 0, 1, 1, 2], [0], [0]>} : vector<8x8x8xf32>, vector<8x8x8xf32>, vector<8x8x8xf32> -> vector<8x8x8xf32>
    %47 = vector.extract_strided_slice %0 {offsets = [0, 0, 24], sizes = [8, 8, 8], strides = [1, 1, 1]} : vector<8x8x32xf32> to vector<8x8x8xf32>
    %48 = vector.extract_strided_slice %1 {offsets = [0, 0, 24], sizes = [8, 8, 8], strides = [1, 1, 1]} : vector<8x8x64xf32> to vector<8x8x8xf32>
    %49 = vector.extract_strided_slice %1 {offsets = [0, 0, 56], sizes = [8, 8, 8], strides = [1, 1, 1]} : vector<8x8x64xf32> to vector<8x8x8xf32>
    %cst_16 = arith.constant dense<0.000000e+00> : vector<8x8x8xf32>
    %50 = tpu.matmul %47, %48, %cst_16 {dimension_numbers = #tpu.dot_dimension_numbers<[2], [2], [1], [1], [0, 0, 0, 1, 1, 1], [0], [0]>} : vector<8x8x8xf32>, vector<8x8x8xf32>, vector<8x8x8xf32> -> vector<8x8x8xf32>
    %cst_17 = arith.constant dense<0xFF800000> : vector<8x8xf32>
    %51 = vector.multi_reduction <maximumf>, %50, %cst_17 [2] : vector<8x8x8xf32> to vector<8x8xf32>
    %52 = vector.shape_cast %51 : vector<8x8xf32> to vector<8x8x1xf32>
    %53 = vector.broadcast %52 : vector<8x8x1xf32> to vector<8x8x8xf32>
    %54 = arith.subf %50, %53 : vector<8x8x8xf32>
    %55 = math.exp %54 : vector<8x8x8xf32>
    %cst_18 = arith.constant dense<0.000000e+00> : vector<8x8xf32>
    %56 = vector.multi_reduction <add>, %55, %cst_18 [2] : vector<8x8x8xf32> to vector<8x8xf32>
    %57 = vector.shape_cast %56 : vector<8x8xf32> to vector<8x8x1xf32>
    %58 = tpu.reciprocal %57 {approx = true} : vector<8x8x1xf32> -> vector<8x8x1xf32>
    %59 = vector.broadcast %58 : vector<8x8x1xf32> to vector<8x8x8xf32>
    %60 = arith.mulf %55, %59 : vector<8x8x8xf32>
    %cst_19 = arith.constant dense<0.000000e+00> : vector<8x8x8xf32>
    %61 = tpu.matmul %60, %49, %cst_19 {dimension_numbers = #tpu.dot_dimension_numbers<[2], [1], [1], [2], [0, 0, 0, 1, 1, 2], [0], [0]>} : vector<8x8x8xf32>, vector<8x8x8xf32>, vector<8x8x8xf32> -> vector<8x8x8xf32>
    %62 = tpu.concatenate %16, %31, %46, %61 in 2 : vector<8x8x8xf32>, vector<8x8x8xf32>, vector<8x8x8xf32>, vector<8x8x8xf32> -> vector<8x8x32xf32>
    %c0_20 = arith.constant 0 : index
    %c0_21 = arith.constant 0 : index
    %c0_22 = arith.constant 0 : index
    %63 = vector.load %arg3[%c0_20, %c0_21, %c0_22] : memref<8x8x32xf32, #tpu.memory_space<vmem>>, vector<8x8x32xf32>
    tpu.vector_store %arg3[%c0_20, %c0_21, %c0_22], %62 {strides = array<i32>} : memref<8x8x32xf32, #tpu.memory_space<vmem>>, vector<8x8x32xf32>,
    return
  }
  func.func @transform_0(%arg0: i32) -> (i32, i32, i32) {
    %c0_i32 = arith.constant 0 : i32
    %c0_i32_0 = arith.constant 0 : i32
    %c0_i32_1 = arith.constant 0 : i32
    return %arg0, %c0_i32, %c0_i32_0 : i32, i32, i32
  }
  func.func @transform_1(%arg0: i32) -> (i32, i32, i32) {
    %c0_i32 = arith.constant 0 : i32
    %c0_i32_0 = arith.constant 0 : i32
    %c0_i32_1 = arith.constant 0 : i32
    return %arg0, %c0_i32, %c0_i32_0 : i32, i32, i32
  }
  func.func @transform_2(%arg0: i32) -> (i32, i32, i32) {
    %c0_i32 = arith.constant 0 : i32
    %c0_i32_0 = arith.constant 0 : i32
    %c0_i32_1 = arith.constant 0 : i32
    return %arg0, %c0_i32, %c0_i32_0 : i32, i32, i32
  }
}

module attributes {stable_mosaic.version = 11 : i64} {
  func.func @_linear_kernel(%arg0: i32, %arg1: memref<64x32xf32, #tpu.memory_space<vmem>>, %arg2: memref<32x64xf32, #tpu.memory_space<vmem>>, %arg3: memref<1x64xf32, #tpu.memory_space<vmem>>, %arg4: memref<64x64xf32, #tpu.memory_space<vmem>>) attributes {dimension_semantics = [#tpu.dimension_semantics<parallel>], iteration_bounds = array<i64: 1>, scalar_prefetch = 0 : i64, scratch_operands = 0 : i64, tpu.core_type = #tpu.core_type<tc>, window_params = [{transform_indices = @transform_0, window_bounds = array<i64: 64, 32>}, {pipeline_mode = #tpu.pipeline_mode<synchronous>, transform_indices = @transform_1, window_bounds = array<i64: 32, 64>}, {pipeline_mode = #tpu.pipeline_mode<synchronous>, transform_indices = @transform_2, window_bounds = array<i64: 1, 64>}, {transform_indices = @transform_3, window_bounds = array<i64: 64, 64>}]} {
    %c0 = arith.constant 0 : index
    %c0_0 = arith.constant 0 : index
    %0 = vector.load %arg1[%c0, %c0_0] : memref<64x32xf32, #tpu.memory_space<vmem>>, vector<64x32xf32>
    %c0_1 = arith.constant 0 : index
    %c0_2 = arith.constant 0 : index
    %1 = vector.load %arg2[%c0_1, %c0_2] : memref<32x64xf32, #tpu.memory_space<vmem>>, vector<32x64xf32>
    %cst = arith.constant dense<0.000000e+00> : vector<64x64xf32>
    %2 = tpu.matmul %0, %1, %cst {dimension_numbers = #tpu.dot_dimension_numbers<[1], [0], [0], [1], [0, 0, 1, 1], [], []>} : vector<64x32xf32>, vector<32x64xf32>, vector<64x64xf32> -> vector<64x64xf32>
    %c0_3 = arith.constant 0 : index
    %c0_4 = arith.constant 0 : index
    %3 = vector.load %arg3[%c0_3, %c0_4] : memref<1x64xf32, #tpu.memory_space<vmem>>, vector<1x64xf32>
    %4 = vector.broadcast %3 : vector<1x64xf32> to vector<64x64xf32>
    %5 = arith.addf %2, %4 : vector<64x64xf32>
    %c0_5 = arith.constant 0 : index
    %c0_6 = arith.constant 0 : index
    %6 = vector.load %arg4[%c0_5, %c0_6] : memref<64x64xf32, #tpu.memory_space<vmem>>, vector<64x64xf32>
    tpu.vector_store %arg4[%c0_5, %c0_6], %5 {strides = array<i32>} : memref<64x64xf32, #tpu.memory_space<vmem>>, vector<64x64xf32>,
    return
  }
  func.func @transform_0(%arg0: i32) -> (i32, i32) {
    %c0_i32 = arith.constant 0 : i32
    %c0_i32_0 = arith.constant 0 : i32
    return %arg0, %c0_i32 : i32, i32
  }
  func.func @transform_1(%arg0: i32) -> (i32, i32) {
    %c0_i32 = arith.constant 0 : i32
    %c0_i32_0 = arith.constant 0 : i32
    %c0_i32_1 = arith.constant 0 : i32
    return %c0_i32, %c0_i32_0 : i32, i32
  }
  func.func @transform_2(%arg0: i32) -> (i32, i32) {
    %c0_i32 = arith.constant 0 : i32
    %c0_i32_0 = arith.constant 0 : i32
    %c0_i32_1 = arith.constant 0 : i32
    return %c0_i32, %c0_i32_0 : i32, i32
  }
  func.func @transform_3(%arg0: i32) -> (i32, i32) {
    %c0_i32 = arith.constant 0 : i32
    %c0_i32_0 = arith.constant 0 : i32
    return %arg0, %c0_i32 : i32, i32
  }
}

</mosaic_0001>

<bundles_post_ra>
// kernel: stt_layer.22
= control target key start
LH: loop header
LB: loop body
LE: loop exit
PB: predicated region body
PF: predicated region fallthrough
CT: control target
= control target key end

     0   :  { %vm33_vm0 = vcmask 261120   ;;  %vm163_vm1 = vcmask 785408   ;;  %s324_s1 = inlined_call_operand.vmem [shape: f32[32,96], index: 1, kind: input, shape index: {}]   ;;  %s325_s0 = inlined_call_operand.vmem [shape: f32[64,32], index: 0, kind: input, shape index: {}]   ;;  %s326_s2 = inlined_call_operand.vmem [shape: f32[1,96], index: 2, kind: input, shape index: {}]   ;;  %s327_s3 = inlined_call_operand.vmem [shape: f32[64,96], index: 3, kind: output, shape index: {}]  }
   0x1   :  { %v25_v0 = vld [vmem:[%s324_s1 + $0x18] sm:$0xff]  ;;  %v24_v1 = vld [vmem:[%s324_s1 + $0x10] sm:$0xff]  ;;  %v23_v2 = vld [vmem:[%s324_s1 + $0x8] sm:$0xff] }
   0x2   :  { %197 = vmatprep.subr.mxu0 %v25_v0  ;;  %217 = vmatprep.subr.mxu1 %v25_v0  ;;  %v22_v3 = vld [vmem:[%s324_s1] sm:$0xff]  ;;  %v15_v6 = vld [vmem:[%s325_s0 + $0x8] sm:$0xff]  ;;  %v16_v8 = vld [vmem:[%s325_s0 + $0x10] sm:$0xff] }
   0x3   :  { %198 = vmatpush3.msra.mxu0 %v25_v0  ;;  %221 = vmatpush3.msra.mxu1 %v25_v0  ;;  %v14_v4 = vld [vmem:[%s325_s0] sm:$0xff]  ;;  %v19_v7 = vld [vmem:[%s325_s0 + $0x28] sm:$0xff]  ;;  %v20_v9 = vld [vmem:[%s325_s0 + $0x30] sm:$0xff] }
   0x4   :  { %199 = vmatprep.subr.mxu0 %v24_v1  ;;  %218 = vmatprep.subr.mxu1 %v24_v1  ;;  %v18_v5 = vld [vmem:[%s325_s0 + $0x20] sm:$0xff]  ;;  %v17_v10 = vld [vmem:[%s325_s0 + $0x18] sm:$0xff] }
   0x5   :  { %200 = vmatpush3.msra.mxu0 %v24_v1  ;;  %222 = vmatpush3.msra.mxu1 %v24_v1  ;;  %v21_v11 = vld [vmem:[%s325_s0 + $0x38] sm:$0xff]  ;;  %v176_v12 = vld [vmem:[%s326_s2] ss:$0 sm:$0xff] }
   0x6   :  { %201 = vmatprep.subr.mxu0 %v23_v2  ;;  %219 = vmatprep.subr.mxu1 %v23_v2 }
   0x7   :  { %202 = vmatpush3.msra.mxu0 %v23_v2  ;;  %223 = vmatpush3.msra.mxu1 %v23_v2 }
   0x8   :  { %203 = vmatprep.subr.mxu0 %v22_v3  ;;  %220 = vmatprep.subr.mxu1 %v22_v3 }
   0x9   :  { %204 = vmatpush3.msra.mxu0 %v22_v3  ;;  %224 = vmatpush3.msra.mxu1 %v22_v3 }
   0xa   :  { %205 = vmatprep.mubr.msk.f32.mxu0 %vm33_vm0, %v14_v4  ;;  %211 = vmatprep.mubr.msk.f32.mxu1 %vm33_vm0, %v18_v5 }
   0xb   :  { %206 = vmatmul.mubr.msk.f32.vlgmr.msra.gmra.mxu0 %vm33_vm0, %v15_v6  ;;  %212 = vmatmul.mubr.msk.f32.vlgmr.msra.gmra.mxu1 %vm33_vm0, %v19_v7 }
   0xc   :  { %208 = vmatprep.mubr.msk.f32.mxu0 %vm33_vm0, %v16_v8  ;;  %214 = vmatprep.mubr.msk.f32.mxu1 %vm33_vm0, %v20_v9 }
   0xf   :  { %209 = vmatmul.mubr.msk.f32.gmra.mxu0 %vm33_vm0, %v17_v10  ;;  %215 = vmatmul.mubr.msk.f32.gmra.mxu1 %vm33_vm0, %v21_v11 }
  0xcb   :  { %v207_v13 = vpop.f32.mrf.mxu0  ;;  %v213_v14 = vpop.f32.mrf.mxu1 }
  0xcc   :  { %v130_v15 = vadd.f32 %v207_v13, %v176_v12  ;;  %v150_v16 = vadd.f32 %v213_v14, %v176_v12 }
  0xcd   :  { %v124_v17 = vpop.f32.mrf.mxu0  ;;  %v144_v18 = vpop.f32.mrf.mxu1 }
  0xce   :  { %165 = vst.msk [vmem:[%s327_s3 + $0x8] sm:$0xff] %vm163_vm1, %v130_v15  ;;  %169 = vst.msk [vmem:[%s327_s3 + $0x28] sm:$0xff] %vm163_vm1, %v150_v16  ;;  %v125_v19 = vadd.f32 %v176_v12, %v124_v17  ;;  %v145_v20 = vadd.f32 %v176_v12, %v144_v18 }
  0xcf   :  { %v210_v21 = vpop.f32.mrf.mxu0  ;;  %v216_v22 = vpop.f32.mrf.mxu1 }
  0xd0   :  { %164 = vst.msk [vmem:[%s327_s3] sm:$0xff] %vm163_vm1, %v125_v19  ;;  %168 = vst.msk [vmem:[%s327_s3 + $0x20] sm:$0xff] %vm163_vm1, %v145_v20  ;;  %v140_v23 = vadd.f32 %v210_v21, %v176_v12  ;;  %v160_v24 = vadd.f32 %v216_v22, %v176_v12 }
  0xd1   :  { %v134_v25 = vpop.f32.mrf.mxu0  ;;  %v154_v26 = vpop.f32.mrf.mxu1 }
  0xd2   :  { %167 = vst.msk [vmem:[%s327_s3 + $0x18] sm:$0xff] %vm163_vm1, %v140_v23  ;;  %171 = vst.msk [vmem:[%s327_s3 + $0x38] sm:$0xff] %vm163_vm1, %v160_v24  ;;  %v135_v27 = vadd.f32 %v176_v12, %v134_v25  ;;  %v155_v28 = vadd.f32 %v176_v12, %v154_v26 }
  0xd4   :  { %166 = vst.msk [vmem:[%s327_s3 + $0x10] sm:$0xff] %vm163_vm1, %v135_v27  ;;  %170 = vst.msk [vmem:[%s327_s3 + $0x30] sm:$0xff] %vm163_vm1, %v155_v28 }

// kernel: stt_layer.24
= control target key start
LH: loop header
LB: loop body
LE: loop exit
PB: predicated region body
PF: predicated region fallthrough
CT: control target
= control target key end

     0   :  { %vm42_vm0 = vcmask 261120   ;;  %s602_s1 = inlined_call_operand.vmem [shape: f32[32,32], index: 1, kind: input, shape index: {}]   ;;  %s603_s0 = inlined_call_operand.vmem [shape: f32[64,32], index: 0, kind: input, shape index: {}]   ;;  %s604_s2 = inlined_call_operand.vmem [shape: f32[1,32], index: 2, kind: input, shape index: {}]   ;;  %s605_s3 = inlined_call_operand.vmem [shape: f32[64,32], index: 3, kind: input, shape index: {}]   ;;  %s606_s4 = inlined_call_operand.vmem [shape: f32[1,32], index: 4, kind: input, shape index: {}]   ;;  %s607_s5 = inlined_call_operand.vmem [shape: f32[1,32], index: 5, kind: input, shape index: {}]   ;;  %s608_s6 = inlined_call_operand.vmem [shape: f32[64,32], index: 6, kind: output, shape index: {}]  }
   0x1   :  { %v34_v0 = vld [vmem:[%s602_s1 + $0x18] sm:$0xff]  ;;  %v33_v1 = vld [vmem:[%s602_s1 + $0x10] sm:$0xff]  ;;  %v32_v2 = vld [vmem:[%s602_s1 + $0x8] sm:$0xff] }
   0x2   :  { %358 = vmatprep.subr.mxu0 %v34_v0  ;;  %378 = vmatprep.subr.mxu1 %v34_v0  ;;  %v31_v3 = vld [vmem:[%s602_s1] sm:$0xff]  ;;  %v24_v6 = vld [vmem:[%s603_s0 + $0x8] sm:$0xff]  ;;  %v25_v8 = vld [vmem:[%s603_s0 + $0x10] sm:$0xff] }
   0x3   :  { %359 = vmatpush3.msra.mxu0 %v34_v0  ;;  %382 = vmatpush3.msra.mxu1 %v34_v0  ;;  %v23_v4 = vld [vmem:[%s603_s0] sm:$0xff]  ;;  %v28_v7 = vld [vmem:[%s603_s0 + $0x28] sm:$0xff]  ;;  %v29_v9 = vld [vmem:[%s603_s0 + $0x30] sm:$0xff] }
   0x4   :  { %360 = vmatprep.subr.mxu0 %v33_v1  ;;  %379 = vmatprep.subr.mxu1 %v33_v1  ;;  %v27_v5 = vld [vmem:[%s603_s0 + $0x20] sm:$0xff]  ;;  %v26_v10 = vld [vmem:[%s603_s0 + $0x18] sm:$0xff]  ;;  %v177_v15 = vld [vmem:[%s605_s3 + $0x28] sm:$0xff] }
   0x5   :  { %361 = vmatpush3.msra.mxu0 %v33_v1  ;;  %383 = vmatpush3.msra.mxu1 %v33_v1  ;;  %v30_v11 = vld [vmem:[%s603_s0 + $0x38] sm:$0xff]  ;;  %v335_v12 = vld [vmem:[%s604_s2] ss:$0 sm:$0xff]  ;;  %v173_v16 = vld [vmem:[%s605_s3 + $0x8] sm:$0xff] }
   0x6   :  { %362 = vmatprep.subr.mxu0 %v32_v2  ;;  %380 = vmatprep.subr.mxu1 %v32_v2  ;;  %v172_v24 = vld [vmem:[%s605_s3] sm:$0xff]  ;;  %v175_v27 = vld [vmem:[%s605_s3 + $0x18] sm:$0xff]  ;;  %v174_v35 = vld [vmem:[%s605_s3 + $0x10] sm:$0xff] }
   0x7   :  { %363 = vmatpush3.msra.mxu0 %v32_v2  ;;  %384 = vmatpush3.msra.mxu1 %v32_v2  ;;  %v176_v36 = vld [vmem:[%s605_s3 + $0x20] sm:$0xff]  ;;  %v179_v41 = vld [vmem:[%s605_s3 + $0x38] sm:$0xff]  ;;  %v178_v42 = vld [vmem:[%s605_s3 + $0x30] sm:$0xff] }
   0x8   :  { %364 = vmatprep.subr.mxu0 %v31_v3  ;;  %381 = vmatprep.subr.mxu1 %v31_v3 }
   0x9   :  { %365 = vmatpush3.msra.mxu0 %v31_v3  ;;  %385 = vmatpush3.msra.mxu1 %v31_v3 }
   0xa   :  { %366 = vmatprep.mubr.msk.f32.mxu0 %vm42_vm0, %v23_v4  ;;  %372 = vmatprep.mubr.msk.f32.mxu1 %vm42_vm0, %v27_v5 }
   0xb   :  { %367 = vmatmul.mubr.msk.f32.vlgmr.msra.gmra.mxu0 %vm42_vm0, %v24_v6  ;;  %373 = vmatmul.mubr.msk.f32.vlgmr.msra.gmra.mxu1 %vm42_vm0, %v28_v7 }
   0xc   :  { %369 = vmatprep.mubr.msk.f32.mxu0 %vm42_vm0, %v25_v8  ;;  %375 = vmatprep.mubr.msk.f32.mxu1 %vm42_vm0, %v29_v9 }
   0xf   :  { %370 = vmatmul.mubr.msk.f32.gmra.mxu0 %vm42_vm0, %v26_v10  ;;  %376 = vmatmul.mubr.msk.f32.gmra.mxu1 %vm42_vm0, %v30_v11 }
  0xcb   :  { %v368_v13 = vpop.f32.mrf.mxu0  ;;  %v374_v14 = vpop.f32.mrf.mxu1 }
  0xcc   :  { %v139_v17 = vadd.f32 %v368_v13, %v335_v12  ;;  %v159_v18 = vadd.f32 %v374_v14, %v335_v12 }
  0xcd   :  { %v133_v19 = vpop.f32.mrf.mxu0  ;;  %v153_v20 = vpop.f32.mrf.mxu1 }
  0xce   :  { %v134_v21 = vadd.f32 %v335_v12, %v133_v19  ;;  %v185_v22 = vadd.f32 %v177_v15, %v159_v18  ;;  %v181_v23 = vadd.f32 %v173_v16, %v139_v17  ;;  %v154_v29 = vadd.f32 %v335_v12, %v153_v20 }
  0xcf   :  { %v371_v25 = vpop.f32.mrf.mxu0  ;;  %v377_v26 = vpop.f32.mrf.mxu1 }
  0xd0   :  { %v149_v28 = vadd.f32 %v371_v25, %v335_v12  ;;  %v205_v30 = vsel %vm42_vm0, %v185_v22, 0.0  ;;  %v193_v31 = vsel %vm42_vm0, %v181_v23, 0.0  ;;  %v180_v33 = vadd.f32 %v172_v24, %v134_v21 }
  0xd1   :  { %206 = vadd.xlane.f32.xlu1 %v205_v30  ;;  %194 = vadd.xlane.f32.xlu0 %v193_v31  ;;  %v143_v32 = vpop.f32.mrf.mxu0  ;;  %v163_v34 = vpop.f32.mrf.mxu1  ;;  %v169_v38 = vadd.f32 %v377_v26, %v335_v12  ;;  %v184_v46 = vadd.f32 %v176_v36, %v154_v29 }
  0xd2   :  { %v144_v37 = vadd.f32 %v335_v12, %v143_v32  ;;  %v183_v39 = vadd.f32 %v175_v27, %v149_v28  ;;  %v164_v40 = vadd.f32 %v335_v12, %v163_v34  ;;  %v190_v44 = vsel %vm42_vm0, %v180_v33, 0.0 }
  0xd3   :  { %v187_v48 = vadd.f32 %v179_v41, %v169_v38  ;;  %v202_v50 = vsel %vm42_vm0, %v184_v46, 0.0 }
  0xd4   :  { %v199_v43 = vsel %vm42_vm0, %v183_v39, 0.0  ;;  %v182_v45 = vadd.f32 %v174_v35, %v144_v37  ;;  %v186_v49 = vadd.f32 %v178_v42, %v164_v40 }
  0xd5   :  { %200 = vadd.xlane.f32.xlu1 %v199_v43  ;;  %191 = vadd.xlane.f32.xlu0 %v190_v44  ;;  %v211_v51 = vsel %vm42_vm0, %v187_v48, 0.0 }
  0xd6   :  { %v196_v47 = vsel %vm42_vm0, %v182_v45, 0.0  ;;  %v208_v52 = vsel %vm42_vm0, %v186_v49, 0.0 }
  0xd9   :  { %197 = vadd.xlane.f32.xlu1 %v196_v47  ;;  %203 = vadd.xlane.f32.xlu0 %v202_v50 }
  0xdd   :  { %212 = vadd.xlane.f32.xlu1 %v211_v51  ;;  %209 = vadd.xlane.f32.xlu0 %v208_v52 }
 0x15a   :  { %v207_v53 = vpop.xlane.xlu1 %206  ;;  %v195_v54 = vpop.xlane.xlu0 %194 }
 0x15b   :  { %v220_v55 = vmul.f32 0.03125, %v207_v53  ;;  %v216_v56 = vmul.f32 0.03125, %v195_v54  ;;  %v344_v53 = vld [vmem:[%s606_s4] ss:$0 sm:$0xff] }
 0x15d   :  { %v516_v57 = vsub.f32 %v185_v22, %v220_v55  ;;  %v518_v58 = vsub.f32 %v181_v23, %v216_v56  ;;  %v345_v56 = vld [vmem:[%s607_s5] ss:$0 sm:$0xff] }
 0x15e   :  { %v201_v59 = vpop.xlane.xlu1 %200  ;;  %v192_v60 = vpop.xlane.xlu0 %191 }
 0x15f   :  { %v218_v61 = vmul.f32 0.03125, %v201_v59  ;;  %v215_v62 = vmul.f32 0.03125, %v192_v60  ;;  %v232_v63 = vmul.f32 %v518_v58, %v518_v58  ;;  %v236_v3 = vmul.f32 %v516_v57, %v516_v57 }
 0x161   :  { %v522_v0 = vsub.f32 %v183_v39, %v218_v61  ;;  %v524_v1 = vsub.f32 %v180_v33, %v215_v62  ;;  %v242_v2 = vsel %vm42_vm0, %v232_v63, 0.0  ;;  %v254_v12 = vsel %vm42_vm0, %v236_v3, 0.0 }
 0x162   :  { %243 = vadd.xlane.f32.xlu1 %v242_v2  ;;  %v198_v4 = vpop.xlane.xlu1 %197  ;;  %v204_v5 = vpop.xlane.xlu0 %203 }
 0x163   :  { %v217_v6 = vmul.f32 0.03125, %v198_v4  ;;  %v219_v7 = vmul.f32 0.03125, %v204_v5  ;;  %v231_v8 = vmul.f32 %v524_v1, %v524_v1  ;;  %v234_v9 = vmul.f32 %v522_v0, %v522_v0 }
 0x165   :  { %v533_v10 = vsub.f32 %v182_v45, %v217_v6  ;;  %v535_v11 = vsub.f32 %v184_v46, %v219_v7  ;;  %v239_v13 = vsel %vm42_vm0, %v231_v8, 0.0  ;;  %v248_v19 = vsel %vm42_vm0, %v234_v9, 0.0 }
 0x166   :  { %255 = vadd.xlane.f32.xlu1 %v254_v12  ;;  %v213_v14 = vpop.xlane.xlu1 %212  ;;  %240 = vadd.xlane.f32.xlu0 %v239_v13  ;;  %v210_v15 = vpop.xlane.xlu0 %209 }
 0x167   :  { %v222_v16 = vmul.f32 0.03125, %v213_v14  ;;  %v221_v17 = vmul.f32 0.03125, %v210_v15  ;;  %v235_v18 = vmul.f32 %v535_v11, %v535_v11  ;;  %v233_v23 = vmul.f32 %v533_v10, %v533_v10 }
 0x169   :  { %v542_v20 = vsub.f32 %v187_v48, %v222_v16  ;;  %v544_v21 = vsub.f32 %v186_v49, %v221_v17  ;;  %v251_v22 = vsel %vm42_vm0, %v235_v18, 0.0  ;;  %v245_v26 = vsel %vm42_vm0, %v233_v23, 0.0 }
 0x16a   :  { %249 = vadd.xlane.f32.xlu1 %v248_v19  ;;  %252 = vadd.xlane.f32.xlu0 %v251_v22 }
 0x16b   :  { %v238_v24 = vmul.f32 %v542_v20, %v542_v20  ;;  %v237_v27 = vmul.f32 %v544_v21, %v544_v21 }
 0x16d   :  { %v260_v25 = vsel %vm42_vm0, %v238_v24, 0.0  ;;  %v257_v28 = vsel %vm42_vm0, %v237_v27, 0.0 }
 0x16e   :  { %261 = vadd.xlane.f32.xlu1 %v260_v25  ;;  %246 = vadd.xlane.f32.xlu0 %v245_v26 }
 0x172   :  { %258 = vadd.xlane.f32.xlu0 %v257_v28 }
 0x1eb   :  { %v244_v29 = vpop.xlane.xlu1 %243 }
 0x1ec   :  { %v264_v30 = vmul.f32 0.03125, %v244_v29 }
 0x1ee   :  { %v272_v31 = vadd.f32 1e-05, %v264_v30 }
 0x1ef   :  { %v256_v32 = vpop.xlane.xlu1 %255  ;;  %v241_v33 = vpop.xlane.xlu0 %240 }
 0x1f0   :  { %386 = vrsqrt.f32 %v272_v31  ;;  %v268_v34 = vmul.f32 0.03125, %v256_v32  ;;  %v263_v35 = vmul.f32 0.03125, %v241_v33 }
 0x1f2   :  { %v276_v36 = vadd.f32 1e-05, %v268_v34  ;;  %v271_v37 = vadd.f32 1e-05, %v263_v35 }
 0x1f3   :  { %v250_v38 = vpop.xlane.xlu1 %249  ;;  %v253_v39 = vpop.xlane.xlu0 %252 }
 0x1f4   :  { %388 = vrsqrt.f32 %v276_v36  ;;  %v266_v40 = vmul.f32 0.03125, %v250_v38  ;;  %v267_v41 = vmul.f32 0.03125, %v253_v39 }
 0x1f5   :  { %390 = vrsqrt.f32 %v271_v37 }
 0x1f6   :  { %v274_v42 = vadd.f32 1e-05, %v266_v40  ;;  %v275_v43 = vadd.f32 1e-05, %v267_v41 }
 0x1f7   :  { %v262_v44 = vpop.xlane.xlu1 %261  ;;  %v247_v45 = vpop.xlane.xlu0 %246 }
 0x1f8   :  { %392 = vrsqrt.f32 %v274_v42  ;;  %v270_v46 = vmul.f32 0.03125, %v262_v44  ;;  %v265_v47 = vmul.f32 0.03125, %v247_v45 }
 0x1f9   :  { %394 = vrsqrt.f32 %v275_v43 }
 0x1fa   :  { %v278_v48 = vadd.f32 1e-05, %v270_v46  ;;  %v273_v49 = vadd.f32 1e-05, %v265_v47 }
 0x1fb   :  { %v259_v50 = vpop.xlane.xlu0 %258 }
 0x1fc   :  { %396 = vrsqrt.f32 %v278_v48  ;;  %v269_v51 = vmul.f32 0.03125, %v259_v50 }
 0x1fd   :  { %v387_v52 = vpop.eup %386  ;;  %398 = vrsqrt.f32 %v273_v49 }
 0x1fe   :  { %v288_v54 = vmul.f32 %v387_v52, %v518_v58  ;;  %v277_v55 = vadd.f32 1e-05, %v269_v51 }
 0x200   :  { %v302_v59 = vmul.f32 %v344_v53, %v288_v54  ;;  %400 = vrsqrt.f32 %v277_v55 }
 0x201   :  { %v389_v60 = vpop.eup %388 }
 0x202   :  { %v391_v61 = vpop.eup %390  ;;  %v316_v62 = vadd.f32 %v345_v56, %v302_v59  ;;  %v292_v63 = vmul.f32 %v389_v60, %v516_v57 }
 0x203   :  { %v287_v2 = vmul.f32 %v391_v61, %v524_v1 }
 0x204   :  { %324 = vst.msk [vmem:[%s608_s6 + $0x8] sm:$0xff] %vm42_vm0, %v316_v62  ;;  %v306_v58 = vmul.f32 %v344_v53, %v292_v63 }
 0x205   :  { %v393_v3 = vpop.eup %392  ;;  %v301_v4 = vmul.f32 %v344_v53, %v287_v2 }
 0x206   :  { %v395_v5 = vpop.eup %394  ;;  %v320_v6 = vadd.f32 %v345_v56, %v306_v58  ;;  %v290_v7 = vmul.f32 %v393_v3, %v522_v0 }
 0x207   :  { %v315_v8 = vadd.f32 %v345_v56, %v301_v4  ;;  %v291_v9 = vmul.f32 %v395_v5, %v535_v11 }
 0x208   :  { %328 = vst.msk [vmem:[%s608_s6 + $0x28] sm:$0xff] %vm42_vm0, %v320_v6  ;;  %v304_v57 = vmul.f32 %v344_v53, %v290_v7 }
 0x209   :  { %v397_v1 = vpop.eup %396  ;;  %323 = vst.msk [vmem:[%s608_s6] sm:$0xff] %vm42_vm0, %v315_v8  ;;  %v305_v12 = vmul.f32 %v344_v53, %v291_v9 }
 0x20a   :  { %v399_v13 = vpop.eup %398  ;;  %v318_v14 = vadd.f32 %v345_v56, %v304_v57  ;;  %v294_v0 = vmul.f32 %v397_v1, %v542_v20 }
 0x20b   :  { %v319_v15 = vadd.f32 %v345_v56, %v305_v12  ;;  %v289_v11 = vmul.f32 %v399_v13, %v533_v10 }
 0x20c   :  { %326 = vst.msk [vmem:[%s608_s6 + $0x18] sm:$0xff] %vm42_vm0, %v318_v14  ;;  %v308_v16 = vmul.f32 %v344_v53, %v294_v0 }
 0x20d   :  { %v401_v17 = vpop.eup %400  ;;  %327 = vst.msk [vmem:[%s608_s6 + $0x20] sm:$0xff] %vm42_vm0, %v319_v15  ;;  %v303_v18 = vmul.f32 %v344_v53, %v289_v11 }
 0x20e   :  { %v322_v19 = vadd.f32 %v345_v56, %v308_v16  ;;  %v293_v22 = vmul.f32 %v401_v17, %v544_v21 }
 0x20f   :  { %v317_v20 = vadd.f32 %v345_v56, %v303_v18 }
 0x210   :  { %330 = vst.msk [vmem:[%s608_s6 + $0x38] sm:$0xff] %vm42_vm0, %v322_v19  ;;  %v307_v10 = vmul.f32 %v344_v53, %v293_v22 }
 0x211   :  { %325 = vst.msk [vmem:[%s608_s6 + $0x10] sm:$0xff] %vm42_vm0, %v317_v20 }
 0x212   :  { %v321_v23 = vadd.f32 %v345_v56, %v307_v10 }
 0x214   :  { %329 = vst.msk [vmem:[%s608_s6 + $0x30] sm:$0xff] %vm42_vm0, %v321_v23 }

// kernel: stt_layer.25
= control target key start
LH: loop header
LB: loop body
LE: loop exit
PB: predicated region body
PF: predicated region fallthrough
CT: control target
= control target key end

     0   :  { %vm45_vm0 = vcmask 261120   ;;  %s898_s1 = inlined_call_operand.vmem [shape: f32[32,128], index: 1, kind: input, shape index: {}]   ;;  %s899_s0 = inlined_call_operand.vmem [shape: f32[64,32], index: 0, kind: input, shape index: {}]   ;;  %s900_s3 = inlined_call_operand.vmem [shape: f32[128,32], index: 3, kind: input, shape index: {}]   ;;  %s901_s2 = inlined_call_operand.vmem [shape: f32[1,128], index: 2, kind: input, shape index: {}]   ;;  %s902_s4 = inlined_call_operand.vmem [shape: f32[1,32], index: 4, kind: input, shape index: {}]   ;;  %s903_s5 = inlined_call_operand.vmem [shape: f32[1,32], index: 5, kind: input, shape index: {}]   ;;  %s904_s6 = inlined_call_operand.vmem [shape: f32[1,32], index: 6, kind: input, shape index: {}]   ;;  %s905_s7 = inlined_call_operand.vmem [shape: f32[64,32], index: 7, kind: output, shape index: {}]  }
   0x1   :  { %v37_v0 = vld [vmem:[%s898_s1 + $0x18] sm:$0xff]  ;;  %v36_v1 = vld [vmem:[%s898_s1 + $0x10] sm:$0xff]  ;;  %v683_v2 = vld [vmem:[%s899_s0] sm:$0xff] }
   0x2   :  { %522 = vmatprep.subr.mxu0 %v37_v0  ;;  %v35_v3 = vld [vmem:[%s898_s1 + $0x8] sm:$0xff]  ;;  %530 = vmatprep.mubr.msk.f32.mxu0 %vm45_vm0, %v683_v2  ;;  %v34_v4 = vld [vmem:[%s898_s1] sm:$0xff]  ;;  %v198_v5 = vld [vmem:[%s900_s3 + $0x78] sm:$0xff] }
   0x3   :  { %523 = vmatpush3.msra.mxu0 %v37_v0  ;;  %586 = vmatprep.subr.mxu1 %v198_v5  ;;  %v699_v6 = vld [vmem:[%s899_s0 + $0x8] sm:$0xff]  ;;  %v197_v7 = vld [vmem:[%s900_s3 + $0x70] sm:$0xff]  ;;  %v716_v9 = vld [vmem:[%s899_s0 + $0x18] sm:$0xff] }
   0x4   :  { %524 = vmatprep.subr.mxu0 %v36_v1  ;;  %602 = vmatpush3.msra.mxu1 %v198_v5  ;;  %v707_v8 = vld [vmem:[%s899_s0 + $0x10] sm:$0xff]  ;;  %v196_v10 = vld [vmem:[%s900_s3 + $0x68] sm:$0xff]  ;;  %v724_v11 = vld [vmem:[%s899_s0 + $0x20] sm:$0xff] }
   0x5   :  { %525 = vmatpush3.msra.mxu0 %v36_v1  ;;  %587 = vmatprep.subr.mxu1 %v197_v7  ;;  %v195_v12 = vld [vmem:[%s900_s3 + $0x60] sm:$0xff]  ;;  %v736_v13 = vld [vmem:[%s899_s0 + $0x28] sm:$0xff]  ;;  %v194_v14 = vld [vmem:[%s900_s3 + $0x58] sm:$0xff] }
   0x6   :  { %526 = vmatprep.subr.mxu0 %v35_v3  ;;  %603 = vmatpush3.msra.mxu1 %v197_v7  ;;  %v744_v15 = vld [vmem:[%s899_s0 + $0x30] sm:$0xff]  ;;  %v756_v17 = vld [vmem:[%s899_s0 + $0x38] sm:$0xff]  ;;  %v192_v18 = vld [vmem:[%s900_s3 + $0x48] sm:$0xff] }
   0x7   :  { %527 = vmatpush3.msra.mxu0 %v35_v3  ;;  %588 = vmatprep.subr.mxu1 %v196_v10  ;;  %v193_v16 = vld [vmem:[%s900_s3 + $0x50] sm:$0xff]  ;;  %v191_v19 = vld [vmem:[%s900_s3 + $0x40] sm:$0xff]  ;;  %v190_v20 = vld [vmem:[%s900_s3 + $0x38] sm:$0xff] }
   0x8   :  { %528 = vmatprep.subr.mxu0 %v34_v4  ;;  %604 = vmatpush3.msra.mxu1 %v196_v10  ;;  %v189_v21 = vld [vmem:[%s900_s3 + $0x30] sm:$0xff]  ;;  %v188_v22 = vld [vmem:[%s900_s3 + $0x28] sm:$0xff]  ;;  %v187_v23 = vld [vmem:[%s900_s3 + $0x20] sm:$0xff] }
   0x9   :  { %529 = vmatpush3.msra.mxu0 %v34_v4  ;;  %589 = vmatprep.subr.mxu1 %v195_v12  ;;  %v186_v24 = vld [vmem:[%s900_s3 + $0x18] sm:$0xff]  ;;  %v185_v25 = vld [vmem:[%s900_s3 + $0x10] sm:$0xff]  ;;  %v184_v26 = vld [vmem:[%s900_s3 + $0x8] sm:$0xff] }
   0xa   :  { %531 = vmatmul.mubr.msk.f32.vlgmr.msra.gmra.mxu0 %vm45_vm0, %v699_v6  ;;  %542 = vmatprep.subr.mxu0 %v198_v5  ;;  %v183_v27 = vld [vmem:[%s900_s3] sm:$0xff] }
   0xb   :  { %533 = vmatprep.mubr.msk.f32.mxu0 %vm45_vm0, %v707_v8  ;;  %543 = vmatpush3.msra.mxu0 %v198_v5  ;;  %v474_v28 = vld [vmem:[%s901_s2] ss:$0 sm:$0xff] }
   0xc   :  { %544 = vmatprep.subr.mxu0 %v197_v7  ;;  %605 = vmatpush3.msra.mxu1 %v195_v12  ;;  %v483_v54 = vld [vmem:[%s902_s4] ss:$0 sm:$0xff] }
   0xd   :  { %545 = vmatpush3.msra.mxu0 %v197_v7  ;;  %590 = vmatprep.subr.mxu1 %v194_v14 }
   0xe   :  { %534 = vmatmul.mubr.msk.f32.gmra.mxu0 %vm45_vm0, %v716_v9  ;;  %546 = vmatprep.subr.mxu0 %v196_v10 }
   0xf   :  { %536 = vmatprep.mubr.msk.f32.mxu0 %vm45_vm0, %v724_v11  ;;  %547 = vmatpush3.msra.mxu0 %v196_v10 }
  0x10   :  { %548 = vmatprep.subr.mxu0 %v195_v12  ;;  %606 = vmatpush3.msra.mxu1 %v194_v14 }
  0x11   :  { %549 = vmatpush3.msra.mxu0 %v195_v12  ;;  %591 = vmatprep.subr.mxu1 %v193_v16 }
  0x12   :  { %537 = vmatmul.mubr.msk.f32.gmra.mxu0 %vm45_vm0, %v736_v13  ;;  %550 = vmatprep.subr.mxu0 %v194_v14 }
  0x13   :  { %539 = vmatprep.mubr.msk.f32.mxu0 %vm45_vm0, %v744_v15  ;;  %551 = vmatpush3.msra.mxu0 %v194_v14 }
  0x14   :  { %552 = vmatprep.subr.mxu0 %v193_v16  ;;  %607 = vmatpush3.msra.mxu1 %v193_v16 }
  0x15   :  { %553 = vmatpush3.msra.mxu0 %v193_v16  ;;  %592 = vmatprep.subr.mxu1 %v192_v18 }
  0x16   :  { %540 = vmatmul.mubr.msk.f32.gmra.mxu0 %vm45_vm0, %v756_v17  ;;  %554 = vmatprep.subr.mxu0 %v192_v18 }
  0x17   :  { %555 = vmatpush3.msra.mxu0 %v192_v18  ;;  %608 = vmatpush3.msra.mxu1 %v192_v18 }
  0x18   :  { %556 = vmatprep.subr.mxu0 %v191_v19  ;;  %593 = vmatprep.subr.mxu1 %v191_v19 }
  0x19   :  { %557 = vmatpush3.msra.mxu0 %v191_v19  ;;  %609 = vmatpush3.msra.mxu1 %v191_v19 }
  0x1a   :  { %558 = vmatprep.subr.mxu0 %v190_v20  ;;  %594 = vmatprep.subr.mxu1 %v190_v20 }
  0x1b   :  { %559 = vmatpush3.msra.mxu0 %v190_v20  ;;  %610 = vmatpush3.msra.mxu1 %v190_v20 }
  0x1c   :  { %560 = vmatprep.subr.mxu0 %v189_v21  ;;  %595 = vmatprep.subr.mxu1 %v189_v21 }
  0x1d   :  { %561 = vmatpush3.msra.mxu0 %v189_v21  ;;  %611 = vmatpush3.msra.mxu1 %v189_v21 }
  0x1e   :  { %562 = vmatprep.subr.mxu0 %v188_v22  ;;  %596 = vmatprep.subr.mxu1 %v188_v22 }
  0x1f   :  { %563 = vmatpush3.msra.mxu0 %v188_v22  ;;  %612 = vmatpush3.msra.mxu1 %v188_v22 }
  0x20   :  { %564 = vmatprep.subr.mxu0 %v187_v23  ;;  %597 = vmatprep.subr.mxu1 %v187_v23 }
  0x21   :  { %565 = vmatpush3.msra.mxu0 %v187_v23  ;;  %613 = vmatpush3.msra.mxu1 %v187_v23 }
  0x22   :  { %566 = vmatprep.subr.mxu0 %v186_v24  ;;  %598 = vmatprep.subr.mxu1 %v186_v24 }
  0x23   :  { %567 = vmatpush3.msra.mxu0 %v186_v24  ;;  %614 = vmatpush3.msra.mxu1 %v186_v24 }
  0x24   :  { %568 = vmatprep.subr.mxu0 %v185_v25  ;;  %599 = vmatprep.subr.mxu1 %v185_v25 }
  0x25   :  { %569 = vmatpush3.msra.mxu0 %v185_v25  ;;  %615 = vmatpush3.msra.mxu1 %v185_v25 }
  0x26   :  { %570 = vmatprep.subr.mxu0 %v184_v26  ;;  %600 = vmatprep.subr.mxu1 %v184_v26 }
  0x27   :  { %571 = vmatpush3.msra.mxu0 %v184_v26  ;;  %616 = vmatpush3.msra.mxu1 %v184_v26 }
  0x28   :  { %572 = vmatprep.subr.mxu0 %v183_v27  ;;  %601 = vmatprep.subr.mxu1 %v183_v27 }
  0x29   :  { %573 = vmatpush3.msra.mxu0 %v183_v27  ;;  %617 = vmatpush3.msra.mxu1 %v183_v27 }
  0xca   :  { %v532_v29 = vpop.f32.mrf.mxu0 }
  0xcb   :  { %v142_v30 = vadd.f32 %v532_v29, %v474_v28 }
  0xcc   :  { %v136_v31 = vpop.f32.mrf.mxu0 }
  0xcd   :  { %v137_v32 = vadd.f32 %v474_v28, %v136_v31  ;;  %v176_v35 = vmax.f32 %v142_v30, 0.0 }
  0xce   :  { %v535_v33 = vpop.f32.mrf.mxu0 }
  0xcf   :  { %v175_v34 = vmax.f32 %v137_v32, 0.0  ;;  %v152_v36 = vadd.f32 %v535_v33, %v474_v28 }
  0xd0   :  { %v146_v37 = vpop.f32.mrf.mxu0 }
  0xd1   :  { %574 = vmatprep.mubr.f32.mxu0 %v175_v34  ;;  %v147_v38 = vadd.f32 %v474_v28, %v146_v37  ;;  %v178_v42 = vmax.f32 %v152_v36, 0.0 }
  0xd2   :  { %v538_v39 = vpop.f32.mrf.mxu0  ;;  %575 = vmatmul.mubr.f32.vlgmr.msra.gmra.mxu0 %v176_v35 }
  0xd3   :  { %v162_v40 = vadd.f32 %v538_v39, %v474_v28  ;;  %v177_v41 = vmax.f32 %v147_v38, 0.0 }
  0xd4   :  { %v156_v43 = vpop.f32.mrf.mxu0 }
  0xd5   :  { %v157_v44 = vadd.f32 %v474_v28, %v156_v43  ;;  %577 = vmatprep.mubr.f32.mxu1 %v177_v41  ;;  %v180_v45 = vmax.f32 %v162_v40, 0.0 }
  0xd6   :  { %v541_v46 = vpop.f32.mrf.mxu0  ;;  %578 = vmatmul.mubr.f32.vlgmr.msra.gmra.mxu1 %v178_v42 }
  0xd7   :  { %v179_v47 = vmax.f32 %v157_v44, 0.0  ;;  %v172_v48 = vadd.f32 %v541_v46, %v474_v28 }
  0xd8   :  { %v166_v49 = vpop.f32.mrf.mxu0 }
  0xd9   :  { %v167_v50 = vadd.f32 %v474_v28, %v166_v49  ;;  %580 = vmatprep.mubr.f32.mxu1 %v179_v47  ;;  %v182_v51 = vmax.f32 %v172_v48, 0.0 }
  0xda   :  { %581 = vmatmul.mubr.f32.gmra.mxu1 %v180_v45 }
  0xdb   :  { %v181_v52 = vmax.f32 %v167_v50, 0.0 }
  0xdd   :  { %583 = vmatprep.mubr.f32.mxu1 %v181_v52 }
  0xde   :  { %584 = vmatmul.mubr.f32.gmra.mxu1 %v182_v51 }
 0x192   :  { %v576_v53 = vpop.f32.mrf.mxu0 }
 0x193   :  { %v305_v55 = vadd.f32 %v576_v53, %v699_v6 }
 0x194   :  { %v265_v56 = vpop.f32.mrf.mxu0 }
 0x195   :  { %v304_v57 = vadd.f32 %v265_v56, %v683_v2  ;;  %v320_v58 = vadd.f32 %v483_v54, %v305_v55 }
 0x196   :  { %v579_v59 = vpop.f32.mrf.mxu1 }
 0x197   :  { %v307_v60 = vadd.f32 %v579_v59, %v716_v9  ;;  %v332_v61 = vsel %vm45_vm0, %v320_v58, 0.0  ;;  %v319_v62 = vadd.f32 %v483_v54, %v304_v57 }
 0x198   :  { %v275_v63 = vpop.f32.mrf.mxu1  ;;  %333 = vadd.xlane.f32.xlu0 %v332_v61 }
 0x199   :  { %v306_v0 = vadd.f32 %v275_v63, %v707_v8  ;;  %v322_v1 = vadd.f32 %v483_v54, %v307_v60  ;;  %v329_v6 = vsel %vm45_vm0, %v319_v62, 0.0 }
 0x19a   :  { %v582_v3 = vpop.f32.mrf.mxu1 }
 0x19b   :  { %v309_v4 = vadd.f32 %v582_v3, %v736_v13  ;;  %v338_v5 = vsel %vm45_vm0, %v322_v1, 0.0  ;;  %v321_v2 = vadd.f32 %v483_v54, %v306_v0 }
 0x19c   :  { %339 = vadd.xlane.f32.xlu1 %v338_v5  ;;  %v285_v7 = vpop.f32.mrf.mxu1  ;;  %330 = vadd.xlane.f32.xlu0 %v329_v6 }
 0x19d   :  { %v308_v9 = vadd.f32 %v285_v7, %v724_v11  ;;  %v335_v14 = vsel %vm45_vm0, %v321_v2, 0.0  ;;  %v324_v16 = vadd.f32 %v483_v54, %v309_v4 }
 0x19e   :  { %v585_v10 = vpop.f32.mrf.mxu1 }
 0x19f   :  { %v311_v12 = vadd.f32 %v585_v10, %v756_v17  ;;  %v323_v8 = vadd.f32 %v483_v54, %v308_v9  ;;  %v344_v20 = vsel %vm45_vm0, %v324_v16, 0.0 }
 0x1a0   :  { %336 = vadd.xlane.f32.xlu1 %v335_v14  ;;  %v295_v18 = vpop.f32.mrf.mxu1 }
 0x1a1   :  { %v310_v13 = vadd.f32 %v295_v18, %v744_v15  ;;  %v341_v19 = vsel %vm45_vm0, %v323_v8, 0.0  ;;  %v326_v22 = vadd.f32 %v483_v54, %v311_v12 }
 0x1a2   :  { %342 = vadd.xlane.f32.xlu0 %v341_v19 }
 0x1a3   :  { %v325_v21 = vadd.f32 %v483_v54, %v310_v13  ;;  %v350_v17 = vsel %vm45_vm0, %v326_v22, 0.0 }
 0x1a4   :  { %345 = vadd.xlane.f32.xlu1 %v344_v20 }
 0x1a5   :  { %v347_v11 = vsel %vm45_vm0, %v325_v21, 0.0 }
 0x1a6   :  { %348 = vadd.xlane.f32.xlu0 %v347_v11 }
 0x1a8   :  { %351 = vadd.xlane.f32.xlu1 %v350_v17  ;;  %v484_v17 = vld [vmem:[%s903_s5] ss:$0 sm:$0xff] }
 0x221   :  { %v334_v23 = vpop.xlane.xlu0 %333 }
 0x222   :  { %v355_v24 = vmul.f32 0.03125, %v334_v23 }
 0x224   :  { %v812_v25 = vsub.f32 %v320_v58, %v355_v24 }
 0x225   :  { %v340_v26 = vpop.xlane.xlu1 %339  ;;  %v331_v15 = vpop.xlane.xlu0 %330 }
 0x226   :  { %v357_v27 = vmul.f32 0.03125, %v340_v26  ;;  %v354_v28 = vmul.f32 0.03125, %v331_v15  ;;  %v371_v29 = vmul.f32 %v812_v25, %v812_v25  ;;  %v485_v15 = vld [vmem:[%s904_s6] ss:$0 sm:$0xff] }
 0x228   :  { %v816_v30 = vsub.f32 %v322_v1, %v357_v27  ;;  %v818_v31 = vsub.f32 %v319_v62, %v354_v28  ;;  %v381_v32 = vsel %vm45_vm0, %v371_v29, 0.0 }
 0x229   :  { %v337_v33 = vpop.xlane.xlu1 %336  ;;  %382 = vadd.xlane.f32.xlu1 %v381_v32 }
 0x22a   :  { %v356_v34 = vmul.f32 0.03125, %v337_v33  ;;  %v373_v35 = vmul.f32 %v816_v30, %v816_v30  ;;  %v370_v36 = vmul.f32 %v818_v31, %v818_v31 }
 0x22b   :  { %v343_v37 = vpop.xlane.xlu0 %342 }
 0x22c   :  { %v825_v38 = vsub.f32 %v321_v2, %v356_v34  ;;  %v358_v39 = vmul.f32 0.03125, %v343_v37  ;;  %v387_v40 = vsel %vm45_vm0, %v373_v35, 0.0  ;;  %v378_v41 = vsel %vm45_vm0, %v370_v36, 0.0 }
 0x22d   :  { %v346_v42 = vpop.xlane.xlu1 %345  ;;  %388 = vadd.xlane.f32.xlu1 %v387_v40  ;;  %379 = vadd.xlane.f32.xlu0 %v378_v41 }
 0x22e   :  { %v829_v43 = vsub.f32 %v323_v8, %v358_v39  ;;  %v359_v44 = vmul.f32 0.03125, %v346_v42  ;;  %v372_v45 = vmul.f32 %v825_v38, %v825_v38 }
 0x22f   :  { %v349_v46 = vpop.xlane.xlu0 %348 }
 0x230   :  { %v833_v47 = vsub.f32 %v324_v16, %v359_v44  ;;  %v360_v48 = vmul.f32 0.03125, %v349_v46  ;;  %v384_v49 = vsel %vm45_vm0, %v372_v45, 0.0  ;;  %v374_v50 = vmul.f32 %v829_v43, %v829_v43 }
 0x231   :  { %v352_v51 = vpop.xlane.xlu1 %351  ;;  %385 = vadd.xlane.f32.xlu0 %v384_v49 }
 0x232   :  { %v838_v52 = vsub.f32 %v325_v21, %v360_v48  ;;  %v361_v53 = vmul.f32 0.03125, %v352_v51  ;;  %v375_v54 = vmul.f32 %v833_v47, %v833_v47  ;;  %v390_v57 = vsel %vm45_vm0, %v374_v50, 0.0 }
 0x234   :  { %v842_v55 = vsub.f32 %v326_v22, %v361_v53  ;;  %v393_v56 = vsel %vm45_vm0, %v375_v54, 0.0  ;;  %v376_v58 = vmul.f32 %v838_v52, %v838_v52 }
 0x235   :  { %394 = vadd.xlane.f32.xlu1 %v393_v56  ;;  %391 = vadd.xlane.f32.xlu0 %v390_v57 }
 0x236   :  { %v377_v59 = vmul.f32 %v842_v55, %v842_v55  ;;  %v396_v61 = vsel %vm45_vm0, %v376_v58, 0.0 }
 0x238   :  { %v399_v60 = vsel %vm45_vm0, %v377_v59, 0.0 }
 0x239   :  { %400 = vadd.xlane.f32.xlu1 %v399_v60  ;;  %397 = vadd.xlane.f32.xlu0 %v396_v61 }
 0x2b2   :  { %v383_v62 = vpop.xlane.xlu1 %382 }
 0x2b3   :  { %v403_v63 = vmul.f32 0.03125, %v383_v62 }
 0x2b5   :  { %v411_v0 = vadd.f32 1e-05, %v403_v63 }
 0x2b6   :  { %v389_v1 = vpop.xlane.xlu1 %388  ;;  %v380_v3 = vpop.xlane.xlu0 %379 }
 0x2b7   :  { %618 = vrsqrt.f32 %v411_v0  ;;  %v405_v4 = vmul.f32 0.03125, %v389_v1  ;;  %v402_v5 = vmul.f32 0.03125, %v380_v3 }
 0x2b9   :  { %v413_v6 = vadd.f32 1e-05, %v405_v4  ;;  %v410_v2 = vadd.f32 1e-05, %v402_v5 }
 0x2ba   :  { %v386_v7 = vpop.xlane.xlu0 %385 }
 0x2bb   :  { %620 = vrsqrt.f32 %v413_v6  ;;  %v404_v9 = vmul.f32 0.03125, %v386_v7 }
 0x2bc   :  { %622 = vrsqrt.f32 %v410_v2 }
 0x2bd   :  { %v412_v10 = vadd.f32 1e-05, %v404_v9 }
 0x2be   :  { %v395_v12 = vpop.xlane.xlu1 %394  ;;  %v392_v14 = vpop.xlane.xlu0 %391 }
 0x2bf   :  { %624 = vrsqrt.f32 %v412_v10  ;;  %v407_v8 = vmul.f32 0.03125, %v395_v12  ;;  %v406_v16 = vmul.f32 0.03125, %v392_v14 }
 0x2c1   :  { %v415_v18 = vadd.f32 1e-05, %v407_v8  ;;  %v414_v13 = vadd.f32 1e-05, %v406_v16 }
 0x2c2   :  { %v401_v19 = vpop.xlane.xlu1 %400  ;;  %v398_v20 = vpop.xlane.xlu0 %397 }
 0x2c3   :  { %626 = vrsqrt.f32 %v415_v18  ;;  %v409_v21 = vmul.f32 0.03125, %v401_v19  ;;  %v408_v22 = vmul.f32 0.03125, %v398_v20 }
 0x2c4   :  { %v619_v11 = vpop.eup %618  ;;  %628 = vrsqrt.f32 %v414_v13 }
 0x2c5   :  { %v427_v23 = vmul.f32 %v619_v11, %v812_v25  ;;  %v417_v24 = vadd.f32 1e-05, %v409_v21  ;;  %v416_v26 = vadd.f32 1e-05, %v408_v22 }
 0x2c7   :  { %v441_v27 = vmul.f32 %v484_v17, %v427_v23  ;;  %630 = vrsqrt.f32 %v417_v24 }
 0x2c8   :  { %v621_v28 = vpop.eup %620  ;;  %632 = vrsqrt.f32 %v416_v26 }
 0x2c9   :  { %v623_v29 = vpop.eup %622  ;;  %v455_v32 = vadd.f32 %v485_v15, %v441_v27  ;;  %v429_v33 = vmul.f32 %v621_v28, %v816_v30 }
 0x2ca   :  { %v426_v34 = vmul.f32 %v623_v29, %v818_v31 }
 0x2cb   :  { %463 = vst.msk [vmem:[%s905_s7 + $0x8] sm:$0xff] %vm45_vm0, %v455_v32  ;;  %v443_v25 = vmul.f32 %v484_v17, %v429_v33 }
 0x2cc   :  { %v625_v35 = vpop.eup %624  ;;  %v440_v36 = vmul.f32 %v484_v17, %v426_v34 }
 0x2cd   :  { %v457_v37 = vadd.f32 %v485_v15, %v443_v25  ;;  %v428_v39 = vmul.f32 %v625_v35, %v825_v38 }
 0x2ce   :  { %v454_v40 = vadd.f32 %v485_v15, %v440_v36 }
 0x2cf   :  { %465 = vst.msk [vmem:[%s905_s7 + $0x18] sm:$0xff] %vm45_vm0, %v457_v37  ;;  %v442_v30 = vmul.f32 %v484_v17, %v428_v39 }
 0x2d0   :  { %v627_v41 = vpop.eup %626  ;;  %462 = vst.msk [vmem:[%s905_s7] sm:$0xff] %vm45_vm0, %v454_v40 }
 0x2d1   :  { %v629_v31 = vpop.eup %628  ;;  %v456_v42 = vadd.f32 %v485_v15, %v442_v30  ;;  %v431_v44 = vmul.f32 %v627_v41, %v833_v47 }
 0x2d2   :  { %v430_v45 = vmul.f32 %v629_v31, %v829_v43 }
 0x2d3   :  { %464 = vst.msk [vmem:[%s905_s7 + $0x10] sm:$0xff] %vm45_vm0, %v456_v42  ;;  %v445_v38 = vmul.f32 %v484_v17, %v431_v44 }
 0x2d4   :  { %v631_v46 = vpop.eup %630  ;;  %v444_v48 = vmul.f32 %v484_v17, %v430_v45 }
 0x2d5   :  { %v633_v49 = vpop.eup %632  ;;  %v459_v50 = vadd.f32 %v485_v15, %v445_v38  ;;  %v433_v51 = vmul.f32 %v631_v46, %v842_v55 }
 0x2d6   :  { %v458_v53 = vadd.f32 %v485_v15, %v444_v48  ;;  %v432_v54 = vmul.f32 %v633_v49, %v838_v52 }
 0x2d7   :  { %467 = vst.msk [vmem:[%s905_s7 + $0x28] sm:$0xff] %vm45_vm0, %v459_v50  ;;  %v447_v43 = vmul.f32 %v484_v17, %v433_v51 }
 0x2d8   :  { %466 = vst.msk [vmem:[%s905_s7 + $0x20] sm:$0xff] %vm45_vm0, %v458_v53  ;;  %v446_v47 = vmul.f32 %v484_v17, %v432_v54 }
 0x2d9   :  { %v461_v56 = vadd.f32 %v485_v15, %v447_v43 }
 0x2da   :  { %v460_v57 = vadd.f32 %v485_v15, %v446_v47 }
 0x2db   :  { %469 = vst.msk [vmem:[%s905_s7 + $0x38] sm:$0xff] %vm45_vm0, %v461_v56 }
 0x2dc   :  { %468 = vst.msk [vmem:[%s905_s7 + $0x30] sm:$0xff] %vm45_vm0, %v460_v57 }

// kernel: stt_layer.31
= control target key start
LH: loop header
LB: loop body
LE: loop exit
PB: predicated region body
PF: predicated region fallthrough
CT: control target
= control target key end

     0   :  { %vm33_vm0 = vcmask 261120   ;;  %s323_s1 = inlined_call_operand.vmem [shape: f32[32,32], index: 1, kind: input, shape index: {}]   ;;  %s324_s0 = inlined_call_operand.vmem [shape: f32[64,32], index: 0, kind: input, shape index: {}]   ;;  %s325_s2 = inlined_call_operand.vmem [shape: f32[1,32], index: 2, kind: input, shape index: {}]   ;;  %s326_s3 = inlined_call_operand.vmem [shape: f32[64,32], index: 3, kind: output, shape index: {}]  }
   0x1   :  { %v25_v0 = vld [vmem:[%s323_s1 + $0x18] sm:$0xff]  ;;  %v24_v1 = vld [vmem:[%s323_s1 + $0x10] sm:$0xff]  ;;  %v23_v2 = vld [vmem:[%s323_s1 + $0x8] sm:$0xff] }
   0x2   :  { %196 = vmatprep.subr.mxu0 %v25_v0  ;;  %216 = vmatprep.subr.mxu1 %v25_v0  ;;  %v22_v3 = vld [vmem:[%s323_s1] sm:$0xff]  ;;  %v15_v6 = vld [vmem:[%s324_s0 + $0x8] sm:$0xff]  ;;  %v16_v8 = vld [vmem:[%s324_s0 + $0x10] sm:$0xff] }
   0x3   :  { %197 = vmatpush3.msra.mxu0 %v25_v0  ;;  %220 = vmatpush3.msra.mxu1 %v25_v0  ;;  %v14_v4 = vld [vmem:[%s324_s0] sm:$0xff]  ;;  %v19_v7 = vld [vmem:[%s324_s0 + $0x28] sm:$0xff]  ;;  %v20_v9 = vld [vmem:[%s324_s0 + $0x30] sm:$0xff] }
   0x4   :  { %198 = vmatprep.subr.mxu0 %v24_v1  ;;  %217 = vmatprep.subr.mxu1 %v24_v1  ;;  %v18_v5 = vld [vmem:[%s324_s0 + $0x20] sm:$0xff]  ;;  %v17_v10 = vld [vmem:[%s324_s0 + $0x18] sm:$0xff] }
   0x5   :  { %199 = vmatpush3.msra.mxu0 %v24_v1  ;;  %221 = vmatpush3.msra.mxu1 %v24_v1  ;;  %v21_v11 = vld [vmem:[%s324_s0 + $0x38] sm:$0xff]  ;;  %v175_v12 = vld [vmem:[%s325_s2] ss:$0 sm:$0xff] }
   0x6   :  { %200 = vmatprep.subr.mxu0 %v23_v2  ;;  %218 = vmatprep.subr.mxu1 %v23_v2 }
   0x7   :  { %201 = vmatpush3.msra.mxu0 %v23_v2  ;;  %222 = vmatpush3.msra.mxu1 %v23_v2 }
   0x8   :  { %202 = vmatprep.subr.mxu0 %v22_v3  ;;  %219 = vmatprep.subr.mxu1 %v22_v3 }
   0x9   :  { %203 = vmatpush3.msra.mxu0 %v22_v3  ;;  %223 = vmatpush3.msra.mxu1 %v22_v3 }
   0xa   :  { %204 = vmatprep.mubr.msk.f32.mxu0 %vm33_vm0, %v14_v4  ;;  %210 = vmatprep.mubr.msk.f32.mxu1 %vm33_vm0, %v18_v5 }
   0xb   :  { %205 = vmatmul.mubr.msk.f32.vlgmr.msra.gmra.mxu0 %vm33_vm0, %v15_v6  ;;  %211 = vmatmul.mubr.msk.f32.vlgmr.msra.gmra.mxu1 %vm33_vm0, %v19_v7 }
   0xc   :  { %207 = vmatprep.mubr.msk.f32.mxu0 %vm33_vm0, %v16_v8  ;;  %213 = vmatprep.mubr.msk.f32.mxu1 %vm33_vm0, %v20_v9 }
   0xf   :  { %208 = vmatmul.mubr.msk.f32.gmra.mxu0 %vm33_vm0, %v17_v10  ;;  %214 = vmatmul.mubr.msk.f32.gmra.mxu1 %vm33_vm0, %v21_v11 }
  0xcb   :  { %v206_v13 = vpop.f32.mrf.mxu0  ;;  %v212_v14 = vpop.f32.mrf.mxu1 }
  0xcc   :  { %v130_v15 = vadd.f32 %v206_v13, %v175_v12  ;;  %v150_v16 = vadd.f32 %v212_v14, %v175_v12 }
  0xcd   :  { %v124_v17 = vpop.f32.mrf.mxu0  ;;  %v144_v18 = vpop.f32.mrf.mxu1 }
  0xce   :  { %164 = vst.msk [vmem:[%s326_s3 + $0x8] sm:$0xff] %vm33_vm0, %v130_v15  ;;  %168 = vst.msk [vmem:[%s326_s3 + $0x28] sm:$0xff] %vm33_vm0, %v150_v16  ;;  %v125_v19 = vadd.f32 %v175_v12, %v124_v17  ;;  %v145_v20 = vadd.f32 %v175_v12, %v144_v18 }
  0xcf   :  { %v209_v21 = vpop.f32.mrf.mxu0  ;;  %v215_v22 = vpop.f32.mrf.mxu1 }
  0xd0   :  { %163 = vst.msk [vmem:[%s326_s3] sm:$0xff] %vm33_vm0, %v125_v19  ;;  %167 = vst.msk [vmem:[%s326_s3 + $0x20] sm:$0xff] %vm33_vm0, %v145_v20  ;;  %v140_v23 = vadd.f32 %v209_v21, %v175_v12  ;;  %v160_v24 = vadd.f32 %v215_v22, %v175_v12 }
  0xd1   :  { %v134_v25 = vpop.f32.mrf.mxu0  ;;  %v154_v26 = vpop.f32.mrf.mxu1 }
  0xd2   :  { %166 = vst.msk [vmem:[%s326_s3 + $0x18] sm:$0xff] %vm33_vm0, %v140_v23  ;;  %170 = vst.msk [vmem:[%s326_s3 + $0x38] sm:$0xff] %vm33_vm0, %v160_v24  ;;  %v135_v27 = vadd.f32 %v175_v12, %v134_v25  ;;  %v155_v28 = vadd.f32 %v175_v12, %v154_v26 }
  0xd4   :  { %165 = vst.msk [vmem:[%s326_s3 + $0x10] sm:$0xff] %vm33_vm0, %v135_v27  ;;  %169 = vst.msk [vmem:[%s326_s3 + $0x30] sm:$0xff] %vm33_vm0, %v155_v28 }

// kernel: stt_layer.32
= control target key start
LH: loop header
LB: loop body
LE: loop exit
PB: predicated region body
PF: predicated region fallthrough
CT: control target
= control target key end

     0   :  { %vm33_vm0 = vcmask 261120   ;;  %vm163_vm1 = vcmask 523264   ;;  %s324_s1 = inlined_call_operand.vmem [shape: f32[32,64], index: 1, kind: input, shape index: {}]   ;;  %s325_s0 = inlined_call_operand.vmem [shape: f32[64,32], index: 0, kind: input, shape index: {}]   ;;  %s326_s2 = inlined_call_operand.vmem [shape: f32[1,64], index: 2, kind: input, shape index: {}]   ;;  %s327_s3 = inlined_call_operand.vmem [shape: f32[64,64], index: 3, kind: output, shape index: {}]  }
   0x1   :  { %v25_v0 = vld [vmem:[%s324_s1 + $0x18] sm:$0xff]  ;;  %v24_v1 = vld [vmem:[%s324_s1 + $0x10] sm:$0xff]  ;;  %v23_v2 = vld [vmem:[%s324_s1 + $0x8] sm:$0xff] }
   0x2   :  { %197 = vmatprep.subr.mxu0 %v25_v0  ;;  %217 = vmatprep.subr.mxu1 %v25_v0  ;;  %v22_v3 = vld [vmem:[%s324_s1] sm:$0xff]  ;;  %v15_v6 = vld [vmem:[%s325_s0 + $0x8] sm:$0xff]  ;;  %v16_v8 = vld [vmem:[%s325_s0 + $0x10] sm:$0xff] }
   0x3   :  { %198 = vmatpush3.msra.mxu0 %v25_v0  ;;  %221 = vmatpush3.msra.mxu1 %v25_v0  ;;  %v14_v4 = vld [vmem:[%s325_s0] sm:$0xff]  ;;  %v19_v7 = vld [vmem:[%s325_s0 + $0x28] sm:$0xff]  ;;  %v20_v9 = vld [vmem:[%s325_s0 + $0x30] sm:$0xff] }
   0x4   :  { %199 = vmatprep.subr.mxu0 %v24_v1  ;;  %218 = vmatprep.subr.mxu1 %v24_v1  ;;  %v18_v5 = vld [vmem:[%s325_s0 + $0x20] sm:$0xff]  ;;  %v17_v10 = vld [vmem:[%s325_s0 + $0x18] sm:$0xff] }
   0x5   :  { %200 = vmatpush3.msra.mxu0 %v24_v1  ;;  %222 = vmatpush3.msra.mxu1 %v24_v1  ;;  %v21_v11 = vld [vmem:[%s325_s0 + $0x38] sm:$0xff]  ;;  %v176_v12 = vld [vmem:[%s326_s2] ss:$0 sm:$0xff] }
   0x6   :  { %201 = vmatprep.subr.mxu0 %v23_v2  ;;  %219 = vmatprep.subr.mxu1 %v23_v2 }
   0x7   :  { %202 = vmatpush3.msra.mxu0 %v23_v2  ;;  %223 = vmatpush3.msra.mxu1 %v23_v2 }
   0x8   :  { %203 = vmatprep.subr.mxu0 %v22_v3  ;;  %220 = vmatprep.subr.mxu1 %v22_v3 }
   0x9   :  { %204 = vmatpush3.msra.mxu0 %v22_v3  ;;  %224 = vmatpush3.msra.mxu1 %v22_v3 }
   0xa   :  { %205 = vmatprep.mubr.msk.f32.mxu0 %vm33_vm0, %v14_v4  ;;  %211 = vmatprep.mubr.msk.f32.mxu1 %vm33_vm0, %v18_v5 }
   0xb   :  { %206 = vmatmul.mubr.msk.f32.vlgmr.msra.gmra.mxu0 %vm33_vm0, %v15_v6  ;;  %212 = vmatmul.mubr.msk.f32.vlgmr.msra.gmra.mxu1 %vm33_vm0, %v19_v7 }
   0xc   :  { %208 = vmatprep.mubr.msk.f32.mxu0 %vm33_vm0, %v16_v8  ;;  %214 = vmatprep.mubr.msk.f32.mxu1 %vm33_vm0, %v20_v9 }
   0xf   :  { %209 = vmatmul.mubr.msk.f32.gmra.mxu0 %vm33_vm0, %v17_v10  ;;  %215 = vmatmul.mubr.msk.f32.gmra.mxu1 %vm33_vm0, %v21_v11 }
  0xcb   :  { %v207_v13 = vpop.f32.mrf.mxu0  ;;  %v213_v14 = vpop.f32.mrf.mxu1 }
  0xcc   :  { %v130_v15 = vadd.f32 %v207_v13, %v176_v12  ;;  %v150_v16 = vadd.f32 %v213_v14, %v176_v12 }
  0xcd   :  { %v124_v17 = vpop.f32.mrf.mxu0  ;;  %v144_v18 = vpop.f32.mrf.mxu1 }
  0xce   :  { %165 = vst.msk [vmem:[%s327_s3 + $0x8] sm:$0xff] %vm163_vm1, %v130_v15  ;;  %169 = vst.msk [vmem:[%s327_s3 + $0x28] sm:$0xff] %vm163_vm1, %v150_v16  ;;  %v125_v19 = vadd.f32 %v176_v12, %v124_v17  ;;  %v145_v20 = vadd.f32 %v176_v12, %v144_v18 }
  0xcf   :  { %v210_v21 = vpop.f32.mrf.mxu0  ;;  %v216_v22 = vpop.f32.mrf.mxu1 }
  0xd0   :  { %164 = vst.msk [vmem:[%s327_s3] sm:$0xff] %vm163_vm1, %v125_v19  ;;  %168 = vst.msk [vmem:[%s327_s3 + $0x20] sm:$0xff] %vm163_vm1, %v145_v20  ;;  %v140_v23 = vadd.f32 %v210_v21, %v176_v12  ;;  %v160_v24 = vadd.f32 %v216_v22, %v176_v12 }
  0xd1   :  { %v134_v25 = vpop.f32.mrf.mxu0  ;;  %v154_v26 = vpop.f32.mrf.mxu1 }
  0xd2   :  { %167 = vst.msk [vmem:[%s327_s3 + $0x18] sm:$0xff] %vm163_vm1, %v140_v23  ;;  %171 = vst.msk [vmem:[%s327_s3 + $0x38] sm:$0xff] %vm163_vm1, %v160_v24  ;;  %v135_v27 = vadd.f32 %v176_v12, %v134_v25  ;;  %v155_v28 = vadd.f32 %v176_v12, %v154_v26 }
  0xd4   :  { %166 = vst.msk [vmem:[%s327_s3 + $0x10] sm:$0xff] %vm163_vm1, %v135_v27  ;;  %170 = vst.msk [vmem:[%s327_s3 + $0x30] sm:$0xff] %vm163_vm1, %v155_v28 }

// kernel: stt_layer.23
= control target key start
LH: loop header
LB: loop body
LE: loop exit
PB: predicated region body
PF: predicated region fallthrough
CT: control target
= control target key end

     0   :  { %s6472_s9 = smov 0   ;;  %s7462_s0 = inlined_call_operand.vmem [shape: f32[16,4,32], index: 0, kind: input, shape index: {}]   ;;  %s7463_s1 = inlined_call_operand.vmem [shape: f32[16,4,64], index: 1, kind: input, shape index: {}]   ;;  %s7464_s2 = inlined_call_operand.vmem [shape: f32[16,4,32], index: 2, kind: output, shape index: {}]  }
   0x1 LB: > { %s5684_s10 = sadd.s32 4294967295, %s6443_s9   ;;  %p5688_p0 = scmp.ge.s32.totalorder %s6443_s9, 1  ;;  %s6443_s9 = sphi %s6472_s9, %s12_s9  }
   0x2   : > { %p124_p1 = scmp.lt.s32.totalorder %s6443_s9, 3 }
   0x4   : > { %p125_p2 = pnand %p5688_p0, %p124_p1 }
   0x5   : > { %s5689_s11 = sshll.u32 (!%p125_p2), %s5684_s10, 3  ;;  %s6447_s19 = smov (!%p125_p2), 96  }
   0x6   : > { %128 = sbr.rel (%p125_p2) target bundleno = 2632 (0xa48), region = 28  ;;  %p152_p3 = scmp.lt.s32.totalorder (!%p125_p2), %s5689_s11, 15 }
   0x7   : > { %s6448_s20 = smov (!%p125_p2), 120   ;;  %s6449_s21 = smov (!%p125_p2), 88  }
   0x8   : > { %s6450_s22 = smov (!%p125_p2), 112   ;;  %s6451_s23 = smov (!%p125_p2), 80  }
   0x9   : > { %s6452_s24 = smov (!%p125_p2), 104   ;;  %s6453_s25 = smov (!%p125_p2), 72  }
   0xa   : > { %s6454_s26 = smov (!%p125_p2), 8   ;;  %s6455_s27 = smov (!%p125_p2), 16  }
   0xb   : > { %v6445_v0 = vmov 0.0   ;;  %vm6446_vm0 = vmmov 0   ;;  %s7466_s11 = smov (!%p152_p3, %s5689_s11), 15  ;;  %vm185_vm1 = vcmask 64512   ;;  %vm794_vm2 = vcmask 27648   ;;  %s6456_s28 = smov 24  }
   0xc   : > { %5953 = vmatprep.subr.mxu0 %v6445_v0  ;;  %5955 = vmatprep.mubr.msk.f32.mxu0 %vm6446_vm0, %v6445_v0  ;;  %s6486_s12 = sshll.u32 %s7466_s11, 2  ;;  %vm889_vm3 = vcmask 1043456   ;;  %vm885_vm4 = vcmask 31744   ;;  %vm5589_vm5 = vcmask 130048   ;;  %vm5598_vm6 = vcmask 195584  }
   0xd   : > { %5958 = vmatprep.subr.mxu1 %v6445_v0  ;;  %5960 = vmatprep.mubr.msk.f32.mxu1 %vm6446_vm0, %v6445_v0  ;;  %s6492_s15 = scalar_lea.vmem %s7463_s1, %s6486_s12  ;;  %s6498_s18 = scalar_lea.vmem %s7462_s0, %s6486_s12  ;;  %vm5607_vm7 = vcmask 257024  }
   0xe   : > { %v6501_v1 = vld [vmem:[%s6492_s15] sm:$0xf]  ;;  %v6504_v2 = vld [vmem:[%s6492_s15 + $0x4] sm:$0xf]  ;;  %v6518_v5 = vld [vmem:[%s6492_s15 + $0x8] sm:$0xf]  ;;  %s7415_s3 = scalar_lea.vmem %s7464_s2, %s6486_s12 }
   0xf   : > { %5954 = vmatpush3.xpose.msk.msra.mxu0 %vm185_vm1, %v6501_v1  ;;  %v6509_v3 = vld [vmem:[%s6498_s18] sm:$0xf]  ;;  %5959 = vmatpush3.xpose.msk.msra.mxu1 %vm185_vm1, %v6504_v2  ;;  %v6514_v4 = vld [vmem:[%s6498_s18 + $0x4] sm:$0xf]  ;;  %v6522_v6 = vld [vmem:[%s6492_s15 + $0xc] sm:$0xf] }
  0x10   : > { %5963 = vmatprep.subr.mxu0 %v6445_v0  ;;  %5968 = vmatprep.subr.mxu1 %v6445_v0  ;;  %v6533_v7 = vld [vmem:[%s6498_s18 + $0x8] sm:$0xf]  ;;  %v6539_v8 = vld [vmem:[%s6492_s15 + $0x10] sm:$0xf]  ;;  %v6542_v9 = vld [vmem:[%s6498_s18 + $0xc] sm:$0xf] }
  0x11   : > { %v6548_v10 = vld [vmem:[%s6492_s15 + $0x14] sm:$0xf]  ;;  %v6557_v11 = vld [vmem:[%s6498_s18 + $0x10] sm:$0xf]  ;;  %v6564_v12 = vld [vmem:[%s6492_s15 + $0x18] sm:$0xf] }
  0x12   : > { %5956 = vmatmul.mubr.msk.f32.vlgmr.msra.gmra.mxu0 %vm185_vm1, %v6509_v3  ;;  %5961 = vmatmul.mubr.msk.f32.vlgmr.msra.gmra.mxu1 %vm185_vm1, %v6514_v4  ;;  %v6567_v13 = vld [vmem:[%s6498_s18 + $0x14] sm:$0xf]  ;;  %v6573_v14 = vld [vmem:[%s6492_s15 + $0x1c] sm:$0xf]  ;;  %v6583_v15 = vld [vmem:[%s6498_s18 + $0x18] sm:$0xf] }
  0x13   : > { %5964 = vmatpush3.xpose.msk.msra.mxu0 %vm185_vm1, %v6518_v5  ;;  %5965 = vmatprep.mubr.msk.f32.mxu0 %vm6446_vm0, %v6445_v0  ;;  %v6590_v16 = vld [vmem:[%s6498_s18 + $0x1c] sm:$0xf] }
  0x14   : > { %5969 = vmatpush3.xpose.msk.msra.mxu1 %vm185_vm1, %v6522_v6  ;;  %5973 = vmatprep.subr.mxu0 %v6445_v0 }
  0x15   : > { %5970 = vmatprep.mubr.msk.f32.mxu1 %vm6446_vm0, %v6445_v0  ;;  %5978 = vmatprep.subr.mxu1 %v6445_v0 }
  0x16   : > { %5966 = vmatmul.mubr.msk.f32.vlgmr.msra.gmra.mxu0 %vm185_vm1, %v6533_v7 }
  0x17   : > { %5974 = vmatpush3.xpose.msk.msra.mxu0 %vm185_vm1, %v6539_v8  ;;  %5971 = vmatmul.mubr.msk.f32.vlgmr.msra.gmra.mxu1 %vm185_vm1, %v6542_v9 }
  0x18   : > { %5975 = vmatprep.mubr.msk.f32.mxu0 %vm6446_vm0, %v6445_v0  ;;  %5979 = vmatpush3.xpose.msk.msra.mxu1 %vm185_vm1, %v6548_v10 }
  0x19   : > { %5983 = vmatprep.subr.mxu0 %v6445_v0  ;;  %5980 = vmatprep.mubr.msk.f32.mxu1 %vm6446_vm0, %v6445_v0 }
  0x1a   : > { %5976 = vmatmul.mubr.msk.f32.vlgmr.msra.gmra.mxu0 %vm185_vm1, %v6557_v11  ;;  %5988 = vmatprep.subr.mxu1 %v6445_v0 }
  0x1b   : > { %5984 = vmatpush3.xpose.msk.msra.mxu0 %vm185_vm1, %v6564_v12  ;;  %5981 = vmatmul.mubr.msk.f32.vlgmr.msra.gmra.mxu1 %vm185_vm1, %v6567_v13 }
  0x1c   : > { %5985 = vmatprep.mubr.msk.f32.mxu0 %vm6446_vm0, %v6445_v0  ;;  %5989 = vmatpush3.xpose.msk.msra.mxu1 %vm185_vm1, %v6573_v14 }
  0x1d   : > { %5990 = vmatprep.mubr.msk.f32.mxu1 %vm6446_vm0, %v6445_v0  ;;  %5998 = vmatprep.subr.mxu1 %v6445_v0 }
  0x1e   : > { %5986 = vmatmul.mubr.msk.f32.vlgmr.msra.gmra.mxu0 %vm185_vm1, %v6583_v15  ;;  %5993 = vmatprep.subr.mxu0 %v6445_v0 }
  0x1f   : > { %5991 = vmatmul.mubr.msk.f32.vlgmr.msra.gmra.mxu1 %vm185_vm1, %v6590_v16  ;;  %5995 = vmatprep.mubr.msk.f32.mxu0 %vm6446_vm0, %v6445_v0 }
  0x20   : > { %6000 = vmatprep.mubr.msk.f32.mxu1 %vm6446_vm0, %v6445_v0 }
  0xd2   : > { %v258_v17 = vpop.f32.mrf.mxu0  ;;  %v334_v18 = vpop.f32.mrf.mxu1 }
  0xd3   : > { %v795_v19 = vsel %vm794_vm2, %v258_v17, -inf  ;;  %v798_v22 = vsel %vm794_vm2, %v334_v18, -inf }
  0xd4   : > { %796 = vmax.xlane.f32.xlu0 %v795_v19  ;;  %v5957_v20 = vpop.f32.mrf.mxu0  ;;  %v5962_v21 = vpop.f32.mrf.mxu1 }
  0xd6   : > { %v410_v23 = vpop.f32.mrf.mxu0 }
  0xd7   : > { %v801_v24 = vsel %vm794_vm2, %v410_v23, -inf  ;;  %v486_v25 = vpop.f32.mrf.mxu1 }
  0xd8   : > { %799 = vmax.xlane.f32.xlu0 %v798_v22  ;;  %802 = vmax.xlane.f32.xlu1 %v801_v24  ;;  %v5967_v26 = vpop.f32.mrf.mxu0  ;;  %v804_v28 = vsel %vm794_vm2, %v486_v25, -inf }
  0xd9   : > { %v5972_v27 = vpop.f32.mrf.mxu1 }
  0xda   : > { %v562_v29 = vpop.f32.mrf.mxu0 }
  0xdb   : > { %v807_v30 = vsel %vm794_vm2, %v562_v29, -inf  ;;  %v638_v31 = vpop.f32.mrf.mxu1 }
  0xdc   : > { %805 = vmax.xlane.f32.xlu1 %v804_v28  ;;  %808 = vmax.xlane.f32.xlu0 %v807_v30  ;;  %v5977_v32 = vpop.f32.mrf.mxu0  ;;  %v810_v34 = vsel %vm794_vm2, %v638_v31, -inf }
  0xdd   : > { %v5982_v33 = vpop.f32.mrf.mxu1 }
  0xde   : > { %v714_v35 = vpop.f32.mrf.mxu0 }
  0xdf   : > { %v813_v36 = vsel %vm794_vm2, %v714_v35, -inf  ;;  %v6611_v37 = vpop.f32.mrf.mxu1 }
  0xe0   : > { %811 = vmax.xlane.f32.xlu1 %v810_v34  ;;  %814 = vmax.xlane.f32.xlu0 %v813_v36  ;;  %v5987_v38 = vpop.f32.mrf.mxu0  ;;  %v816_v40 = vsel %vm794_vm2, %v6611_v37, -inf }
  0xe1   : > { %v5992_v39 = vpop.f32.mrf.mxu1 }
  0xf1   : > { %962 = vrot.lane.b32.xlu1 %v6504_v2, %s6447_s19 }
  0xf5   : > { %1039 = vrot.lane.b32.xlu1 %v6518_v5, %s6447_s19 }
  0xf6   : > { %883 = vrot.lane.b32.xlu0 %v6501_v1, %s6447_s19 }
  0xf9   : > { %1116 = vrot.lane.b32.xlu1 %v6522_v6, %s6447_s19 }
  0xfa   : > { %1193 = vrot.lane.b32.xlu0 %v6539_v8, %s6447_s19 }
  0xfd   : > { %1270 = vrot.lane.b32.xlu1 %v6548_v10, %s6447_s19 }
  0xfe   : > { %1347 = vrot.lane.b32.xlu0 %v6564_v12, %s6447_s19 }
 0x101   : > { %1424 = vrot.lane.b32.xlu1 %v6573_v14, %s6447_s19 }
 0x102   : > { %1503 = vrot.lane.b32.xlu0 %v6501_v1, %s6448_s20 }
 0x105   : > { %1581 = vrot.lane.b32.xlu1 %v6504_v2, %s6448_s20 }
 0x106   : > { %1501 = vrot.lane.b32.xlu0 %v6509_v3, %s6448_s20 }
 0x109   : > { %1579 = vrot.lane.b32.xlu1 %v6514_v4, %s6448_s20 }
 0x10a   : > { %1659 = vrot.lane.b32.xlu0 %v6518_v5, %s6448_s20 }
 0x12d   : > { %817 = vmax.xlane.f32.xlu1 %v816_v40 }
 0x13e   : > { %1737 = vrot.lane.b32.xlu1 %v6522_v6, %s6448_s20 }
 0x15d   : > { %v797_v41 = vpop.xlane.xlu0 %796 }
 0x15e   : > { %v819_v42 = vsub.f32 %v258_v17, %v797_v41 }
 0x160   : > { %v827_v43 = vmul.f32 1.442695, %v819_v42 }
 0x161   : > { %v800_v44 = vpop.xlane.xlu0 %799  ;;  %v803_v45 = vpop.xlane.xlu1 %802 }
 0x162   : > { %6293 = vpow2.f32 %v827_v43  ;;  %v820_v46 = vsub.f32 %v334_v18, %v800_v44  ;;  %v821_v47 = vsub.f32 %v410_v23, %v803_v45 }
 0x164   : > { %v829_v48 = vmul.f32 1.442695, %v820_v46  ;;  %v831_v49 = vmul.f32 1.442695, %v821_v47 }
 0x165   : > { %v806_v50 = vpop.xlane.xlu1 %805  ;;  %v809_v51 = vpop.xlane.xlu0 %808 }
 0x166   : > { %6295 = vpow2.f32 %v829_v48  ;;  %v822_v52 = vsub.f32 %v486_v25, %v806_v50  ;;  %v823_v53 = vsub.f32 %v562_v29, %v809_v51 }
 0x167   : > { %6297 = vpow2.f32 %v831_v49 }
 0x168   : > { %v833_v54 = vmul.f32 1.442695, %v822_v52  ;;  %v835_v55 = vmul.f32 1.442695, %v823_v53 }
 0x169   : > { %v812_v56 = vpop.xlane.xlu1 %811  ;;  %v815_v57 = vpop.xlane.xlu0 %814 }
 0x16a   : > { %6299 = vpow2.f32 %v833_v54  ;;  %v824_v58 = vsub.f32 %v638_v31, %v812_v56  ;;  %v825_v59 = vsub.f32 %v714_v35, %v815_v57 }
 0x16b   : > { %6301 = vpow2.f32 %v835_v55 }
 0x16c   : > { %v837_v60 = vmul.f32 1.442695, %v824_v58  ;;  %v839_v61 = vmul.f32 1.442695, %v825_v59 }
 0x16d   : > { %v963_v62 = vpop.permute.xlu1 %962  ;;  %v884_v63 = vpop.permute.xlu0 %883 }
 0x16e   : > { %6303 = vpow2.f32 %v837_v60  ;;  %5999 = vmatpush3.msk.msra.mxu1 %vm889_vm3, %v963_v62  ;;  %5994 = vmatpush3.msk.msra.mxu0 %vm889_vm3, %v884_v63 }
 0x16f   : > { %v6637_v17 = vpop.eup %6293  ;;  %6305 = vpow2.f32 %v839_v61  ;;  %6003 = vmatprep.subr.mxu0 %v6445_v0  ;;  %6008 = vmatprep.subr.mxu1 %v6445_v0 }
 0x170   : > { %v843_v18 = vsel %vm794_vm2, %v6637_v17, 0.0 }
 0x171   : > { %844 = vadd.xlane.f32.xlu0 %v843_v18  ;;  %v1040_v31 = vpop.permute.xlu1 %1039  ;;  %v1194_v43 = vpop.permute.xlu0 %1193 }
 0x173   : > { %v6643_v19 = vpop.eup %6295 }
 0x174   : > { %v6645_v20 = vpop.eup %6297  ;;  %v846_v21 = vsel %vm794_vm2, %v6643_v19, 0.0 }
 0x175   : > { %847 = vadd.xlane.f32.xlu1 %v846_v21  ;;  %v849_v22 = vsel %vm794_vm2, %v6645_v20, 0.0  ;;  %v1117_v32 = vpop.permute.xlu1 %1116  ;;  %v1348_v44 = vpop.permute.xlu0 %1347 }
 0x176   : > { %850 = vadd.xlane.f32.xlu0 %v849_v22 }
 0x177   : > { %v6651_v23 = vpop.eup %6299 }
 0x178   : > { %v6653_v24 = vpop.eup %6301  ;;  %v852_v25 = vsel %vm794_vm2, %v6651_v23, 0.0 }
 0x179   : > { %853 = vadd.xlane.f32.xlu1 %v852_v25  ;;  %v855_v26 = vsel %vm794_vm2, %v6653_v24, 0.0  ;;  %v6677_v33 = vpop.permute.xlu1 %1270 }
 0x17a   : > { %856 = vadd.xlane.f32.xlu0 %v855_v26 }
 0x17b   : > { %v6659_v27 = vpop.eup %6303 }
 0x17c   : > { %v6661_v28 = vpop.eup %6305  ;;  %v858_v29 = vsel %vm794_vm2, %v6659_v27, 0.0 }
 0x17d   : > { %859 = vadd.xlane.f32.xlu1 %v858_v29  ;;  %v861_v30 = vsel %vm794_vm2, %v6661_v28, 0.0  ;;  %v6683_v34 = vpop.permute.xlu1 %1424 }
 0x17e   : > { %862 = vadd.xlane.f32.xlu0 %v861_v30 }
 0x181   : > { %v6685_v35 = vpop.permute.xlu1 %1581 }
 0x185   : > { %v6687_v36 = vpop.permute.xlu1 %1579 }
 0x18e   : > { %1735 = vrot.lane.b32.xlu1 %v6542_v9, %s6448_s20 }
 0x192   : > { %1893 = vrot.lane.b32.xlu1 %v6548_v10, %s6448_s20 }
 0x194   : > { %1657 = vrot.lane.b32.xlu0 %v6533_v7, %s6448_s20 }
 0x198   : > { %1815 = vrot.lane.b32.xlu0 %v6539_v8, %s6448_s20 }
 0x19c   : > { %1813 = vrot.lane.b32.xlu0 %v6557_v11, %s6448_s20 }
 0x1a0   : > { %1971 = vrot.lane.b32.xlu0 %v6564_v12, %s6448_s20 }
 0x1a4   : > { %1969 = vrot.lane.b32.xlu0 %v6583_v15, %s6448_s20 }
 0x1b6   : > { %v818_v38 = vpop.xlane.xlu1 %817 }
 0x1b7   : > { %v826_v39 = vsub.f32 %v6611_v37, %v818_v38  ;;  %v1504_v37 = vpop.permute.xlu0 %1503 }
 0x1b9   : > { %v841_v40 = vmul.f32 1.442695, %v826_v39 }
 0x1ba   : > { %v6704_v47 = vpop.permute.xlu1 %1737 }
 0x1bb   : > { %6307 = vpow2.f32 %v841_v40  ;;  %v6700_v45 = vpop.permute.xlu0 %1501 }
 0x1bf   : > { %v6702_v46 = vpop.permute.xlu0 %1659 }
 0x1c8   : > { %v6690_v41 = vpop.eup %6307 }
 0x1c9   : > { %v864_v42 = vsel %vm794_vm2, %v6690_v41, 0.0 }
 0x1ca   : > { %865 = vadd.xlane.f32.xlu1 %v864_v42 }
 0x1db   : > { %1891 = vrot.lane.b32.xlu1 %v6567_v13, %s6448_s20 }
 0x1df   : > { %2049 = vrot.lane.b32.xlu1 %v6573_v14, %s6448_s20 }
 0x1e3   : > { %2047 = vrot.lane.b32.xlu1 %v6590_v16, %s6448_s20 }
 0x1fa   : > { %v845_v48 = vpop.xlane.xlu0 %844 }
 0x1fb   : > { %6309 = vrcp.f32 %v845_v48 }
 0x1fe   : > { %v848_v49 = vpop.xlane.xlu1 %847 }
 0x1ff   : > { %6311 = vrcp.f32 %v848_v49  ;;  %v851_v50 = vpop.xlane.xlu0 %850 }
 0x200   : > { %6313 = vrcp.f32 %v851_v50 }
 0x202   : > { %v854_v51 = vpop.xlane.xlu1 %853 }
 0x203   : > { %6315 = vrcp.f32 %v854_v51  ;;  %v857_v52 = vpop.xlane.xlu0 %856 }
 0x204   : > { %6317 = vrcp.f32 %v857_v52 }
 0x206   : > { %v860_v53 = vpop.xlane.xlu1 %859 }
 0x207   : > { %6319 = vrcp.f32 %v860_v53  ;;  %v863_v54 = vpop.xlane.xlu0 %862 }
 0x208   : > { %v6310_v55 = vpop.eup %6309  ;;  %6321 = vrcp.f32 %v863_v54 }
 0x209   : > { %v875_v56 = vmul.f32 %v6310_v55, %v6637_v17 }
 0x20b   : > { %5996 = vmatmul.mubr.msk.f32.vlgmr.msra.gmra.mxu0 %vm885_vm4, %v875_v56  ;;  %v1658_v61 = vpop.permute.xlu0 %1657 }
 0x20c   : > { %v6312_v57 = vpop.eup %6311  ;;  %6004 = vmatpush3.msk.msra.mxu0 %vm889_vm3, %v1040_v31  ;;  %6005 = vmatprep.mubr.msk.f32.mxu0 %vm6446_vm0, %v6445_v0 }
 0x20d   : > { %v6314_v58 = vpop.eup %6313  ;;  %v876_v59 = vmul.f32 %v6312_v57, %v6643_v19  ;;  %6013 = vmatprep.subr.mxu0 %v6445_v0 }
 0x20e   : > { %v877_v60 = vmul.f32 %v6314_v58, %v6645_v20 }
 0x20f   : > { %6001 = vmatmul.mubr.msk.f32.vlgmr.msra.gmra.mxu1 %vm885_vm4, %v876_v59  ;;  %v1816_v19 = vpop.permute.xlu0 %1815 }
 0x210   : > { %v6316_v62 = vpop.eup %6315  ;;  %6006 = vmatmul.mubr.msk.f32.vlgmr.msra.gmra.mxu0 %vm885_vm4, %v877_v60  ;;  %6009 = vmatpush3.msk.msra.mxu1 %vm889_vm3, %v1117_v32 }
 0x211   : > { %v6318_v63 = vpop.eup %6317  ;;  %6010 = vmatprep.mubr.msk.f32.mxu1 %vm6446_vm0, %v6445_v0  ;;  %6014 = vmatpush3.msk.msra.mxu0 %vm889_vm3, %v1194_v43  ;;  %v878_v17 = vmul.f32 %v6316_v62, %v6651_v23 }
 0x212   : > { %6015 = vmatprep.mubr.msk.f32.mxu0 %vm6446_vm0, %v6445_v0  ;;  %6018 = vmatprep.subr.mxu1 %v6445_v0  ;;  %v879_v18 = vmul.f32 %v6318_v63, %v6653_v24 }
 0x213   : > { %6011 = vmatmul.mubr.msk.f32.vlgmr.msra.gmra.mxu1 %vm885_vm4, %v878_v17  ;;  %6023 = vmatprep.subr.mxu0 %v6445_v0  ;;  %v1814_v24 = vpop.permute.xlu0 %1813 }
 0x214   : > { %v6320_v20 = vpop.eup %6319  ;;  %6016 = vmatmul.mubr.msk.f32.vlgmr.msra.gmra.mxu0 %vm885_vm4, %v879_v18  ;;  %6019 = vmatpush3.msk.msra.mxu1 %vm889_vm3, %v6677_v33 }
 0x215   : > { %v6322_v21 = vpop.eup %6321  ;;  %6020 = vmatprep.mubr.msk.f32.mxu1 %vm6446_vm0, %v6445_v0  ;;  %6024 = vmatpush3.msk.msra.mxu0 %vm889_vm3, %v1348_v44  ;;  %v880_v22 = vmul.f32 %v6320_v20, %v6659_v27  ;;  %v1736_v27 = vpop.permute.xlu1 %1735 }
 0x216   : > { %6025 = vmatprep.mubr.msk.f32.mxu0 %vm6446_vm0, %v6445_v0  ;;  %6028 = vmatprep.subr.mxu1 %v6445_v0  ;;  %v881_v23 = vmul.f32 %v6322_v21, %v6661_v28 }
 0x217   : > { %6021 = vmatmul.mubr.msk.f32.vlgmr.msra.gmra.mxu1 %vm885_vm4, %v880_v22  ;;  %6033 = vmatprep.subr.mxu0 %v6445_v0  ;;  %v1972_v25 = vpop.permute.xlu0 %1971 }
 0x218   : > { %6026 = vmatmul.mubr.msk.f32.vlgmr.msra.gmra.mxu0 %vm885_vm4, %v881_v23  ;;  %6029 = vmatpush3.msk.msra.mxu1 %vm889_vm3, %v6683_v34 }
 0x219   : > { %6034 = vmatpush3.xpose.msk.msra.mxu0 %vm185_vm1, %v1504_v37  ;;  %6035 = vmatprep.mubr.msk.f32.mxu0 %vm6446_vm0, %v6445_v0  ;;  %v1894_v28 = vpop.permute.xlu1 %1893 }
 0x21a   : > { %6043 = vmatprep.subr.mxu0 %v6445_v0  ;;  %6030 = vmatprep.mubr.msk.f32.mxu1 %vm6446_vm0, %v6445_v0 }
 0x21b   : > { %6038 = vmatprep.subr.mxu1 %v6445_v0  ;;  %v1970_v26 = vpop.permute.xlu0 %1969 }
 0x21c   : > { %6036 = vmatmul.mubr.msk.f32.vlgmr.msra.gmra.mxu0 %vm185_vm1, %v6700_v45 }
 0x21d   : > { %6044 = vmatpush3.xpose.msk.msra.mxu0 %vm185_vm1, %v6702_v46  ;;  %6045 = vmatprep.mubr.msk.f32.mxu0 %vm6446_vm0, %v6445_v0 }
 0x21e   : > { %6053 = vmatprep.subr.mxu0 %v6445_v0 }
 0x220   : > { %6046 = vmatmul.mubr.msk.f32.vlgmr.msra.gmra.mxu0 %vm185_vm1, %v1658_v61 }
 0x221   : > { %6054 = vmatpush3.xpose.msk.msra.mxu0 %vm185_vm1, %v1816_v19  ;;  %6055 = vmatprep.mubr.msk.f32.mxu0 %vm6446_vm0, %v6445_v0 }
 0x222   : > { %6063 = vmatprep.subr.mxu0 %v6445_v0 }
 0x224   : > { %6056 = vmatmul.mubr.msk.f32.vlgmr.msra.gmra.mxu0 %vm185_vm1, %v1814_v24 }
 0x225   : > { %6064 = vmatpush3.xpose.msk.msra.mxu0 %vm185_vm1, %v1972_v25  ;;  %6065 = vmatprep.mubr.msk.f32.mxu0 %vm6446_vm0, %v6445_v0 }
 0x226   : > { %6073 = vmatprep.subr.mxu0 %v6445_v0 }
 0x228   : > { %6066 = vmatmul.mubr.msk.f32.vlgmr.msra.gmra.mxu0 %vm185_vm1, %v1970_v26 }
 0x229   : > { %6075 = vmatprep.mubr.msk.f32.mxu0 %vm6446_vm0, %v6445_v0 }
 0x253   : > { %v866_v29 = vpop.xlane.xlu1 %865 }
 0x254   : > { %6323 = vrcp.f32 %v866_v29 }
 0x257   : > { %v1892_v32 = vpop.permute.xlu1 %1891 }
 0x25b   : > { %v2050_v33 = vpop.permute.xlu1 %2049 }
 0x25f   : > { %v2048_v34 = vpop.permute.xlu1 %2047 }
 0x261   : > { %v6324_v30 = vpop.eup %6323 }
 0x262   : > { %v882_v31 = vmul.f32 %v6324_v30, %v6690_v41 }
 0x264   : > { %6031 = vmatmul.mubr.msk.f32.vlgmr.msra.gmra.mxu1 %vm885_vm4, %v882_v31 }
 0x265   : > { %6039 = vmatpush3.xpose.msk.msra.mxu1 %vm185_vm1, %v6685_v35  ;;  %6040 = vmatprep.mubr.msk.f32.mxu1 %vm6446_vm0, %v6445_v0 }
 0x266   : > { %6048 = vmatprep.subr.mxu1 %v6445_v0 }
 0x268   : > { %6041 = vmatmul.mubr.msk.f32.vlgmr.msra.gmra.mxu1 %vm185_vm1, %v6687_v36 }
 0x269   : > { %6049 = vmatpush3.xpose.msk.msra.mxu1 %vm185_vm1, %v6704_v47  ;;  %6050 = vmatprep.mubr.msk.f32.mxu1 %vm6446_vm0, %v6445_v0 }
 0x26a   : > { %6058 = vmatprep.subr.mxu1 %v6445_v0 }
 0x26c   : > { %6051 = vmatmul.mubr.msk.f32.vlgmr.msra.gmra.mxu1 %vm185_vm1, %v1736_v27 }
 0x26d   : > { %6059 = vmatpush3.xpose.msk.msra.mxu1 %vm185_vm1, %v1894_v28  ;;  %6060 = vmatprep.mubr.msk.f32.mxu1 %vm6446_vm0, %v6445_v0 }
 0x26e   : > { %6068 = vmatprep.subr.mxu1 %v6445_v0 }
 0x270   : > { %6061 = vmatmul.mubr.msk.f32.vlgmr.msra.gmra.mxu1 %vm185_vm1, %v1892_v32 }
 0x271   : > { %6069 = vmatpush3.xpose.msk.msra.mxu1 %vm185_vm1, %v2050_v33  ;;  %6070 = vmatprep.mubr.msk.f32.mxu1 %vm6446_vm0, %v6445_v0 }
 0x272   : > { %6078 = vmatprep.subr.mxu1 %v6445_v0 }
 0x274   : > { %6071 = vmatmul.mubr.msk.f32.vlgmr.msra.gmra.mxu1 %vm185_vm1, %v2048_v34 }
 0x275   : > { %6080 = vmatprep.mubr.msk.f32.mxu1 %vm6446_vm0, %v6445_v0 }
 0x2cb   : > { %v6797_v35 = vpop.f32.mrf.mxu0 }
 0x2cd   : > { %v5997_v36 = vpop.f32.mrf.mxu0 }
 0x2cf   : > { %v6799_v38 = vpop.f32.mrf.mxu1 }
 0x2d0   : > { %v6801_v39 = vpop.f32.mrf.mxu0 }
 0x2d1   : > { %v6002_v40 = vpop.f32.mrf.mxu1 }
 0x2d2   : > { %v6007_v41 = vpop.f32.mrf.mxu0 }
 0x2d3   : > { %v6803_v42 = vpop.f32.mrf.mxu1 }
 0x2d4   : > { %v6805_v43 = vpop.f32.mrf.mxu0 }
 0x2d5   : > { %v6012_v44 = vpop.f32.mrf.mxu1 }
 0x2d6   : > { %v6017_v37 = vpop.f32.mrf.mxu0 }
 0x2d7   : > { %v6807_v45 = vpop.f32.mrf.mxu1 }
 0x2d8   : > { %v6809_v46 = vpop.f32.mrf.mxu0 }
 0x2d9   : > { %v6022_v47 = vpop.f32.mrf.mxu1 }
 0x2da   : > { %v6027_v48 = vpop.f32.mrf.mxu0 }
 0x2dc   : > { %v1575_v49 = vpop.f32.mrf.mxu0 }
 0x2dd   : > { %v2125_v50 = vsel %vm794_vm2, %v1575_v49, -inf }
 0x2de   : > { %2126 = vmax.xlane.f32.xlu0 %v2125_v50  ;;  %v6037_v51 = vpop.f32.mrf.mxu0 }
 0x2e0   : > { %v1731_v52 = vpop.f32.mrf.mxu0 }
 0x2e1   : > { %v2131_v53 = vsel %vm794_vm2, %v1731_v52, -inf }
 0x2e2   : > { %2132 = vmax.xlane.f32.xlu0 %v2131_v53  ;;  %v6047_v54 = vpop.f32.mrf.mxu0 }
 0x2e4   : > { %v6813_v55 = vpop.f32.mrf.mxu0 }
 0x2e5   : > { %v2137_v20 = vsel %vm794_vm2, %v6813_v55, -inf }
 0x2e6   : > { %v6057_v56 = vpop.f32.mrf.mxu0 }
 0x2e8   : > { %v6815_v57 = vpop.f32.mrf.mxu0 }
 0x2e9   : > { %v2143_v24 = vsel %vm794_vm2, %v6815_v57, -inf }
 0x2ea   : > { %v6067_v58 = vpop.f32.mrf.mxu0 }
 0x324   : > { %v6817_v59 = vpop.f32.mrf.mxu1 }
 0x326   : > { %v6032_v60 = vpop.f32.mrf.mxu1 }
 0x328   : > { %v1653_v61 = vpop.f32.mrf.mxu1 }
 0x329   : > { %v2128_v62 = vsel %vm794_vm2, %v1653_v61, -inf }
 0x32a   : > { %2129 = vmax.xlane.f32.xlu1 %v2128_v62  ;;  %v6042_v63 = vpop.f32.mrf.mxu1 }
 0x32c   : > { %v1809_v17 = vpop.f32.mrf.mxu1 }
 0x32d   : > { %v2134_v18 = vsel %vm794_vm2, %v1809_v17, -inf }
 0x32e   : > { %v6052_v19 = vpop.f32.mrf.mxu1  ;;  %2135 = vmax.xlane.f32.xlu0 %v2134_v18 }
 0x330   : > { %v1965_v21 = vpop.f32.mrf.mxu1 }
 0x331   : > { %v2140_v22 = vsel %vm794_vm2, %v1965_v21, -inf }
 0x332   : > { %2141 = vmax.xlane.f32.xlu1 %v2140_v22  ;;  %v6062_v23 = vpop.f32.mrf.mxu1  ;;  %2138 = vmax.xlane.f32.xlu0 %v2137_v20 }
 0x334   : > { %v6826_v25 = vpop.f32.mrf.mxu1 }
 0x336   : > { %2144 = vmax.xlane.f32.xlu0 %v2143_v24  ;;  %v6072_v26 = vpop.f32.mrf.mxu1 }
 0x343   : > { %2290 = vrot.lane.b32.xlu1 %v6504_v2, %s6449_s21 }
 0x347   : > { %2367 = vrot.lane.b32.xlu1 %v6518_v5, %s6449_s21 }
 0x34b   : > { %2444 = vrot.lane.b32.xlu1 %v6522_v6, %s6449_s21 }
 0x34c   : > { %2213 = vrot.lane.b32.xlu0 %v6501_v1, %s6449_s21 }
 0x34f   : > { %2598 = vrot.lane.b32.xlu1 %v6548_v10, %s6449_s21 }
 0x350   : > { %2521 = vrot.lane.b32.xlu0 %v6539_v8, %s6449_s21 }
 0x353   : > { %2752 = vrot.lane.b32.xlu1 %v6573_v14, %s6449_s21 }
 0x354   : > { %2675 = vrot.lane.b32.xlu0 %v6564_v12, %s6449_s21 }
 0x357   : > { %2909 = vrot.lane.b32.xlu1 %v6504_v2, %s6450_s22 }
 0x358   : > { %2831 = vrot.lane.b32.xlu0 %v6501_v1, %s6450_s22  ;;  %v2146_v1 = vsel %vm794_vm2, %v6826_v25, -inf }
 0x35b   : > { %2907 = vrot.lane.b32.xlu1 %v6514_v4, %s6450_s22 }
 0x35c   : > { %2829 = vrot.lane.b32.xlu0 %v6509_v3, %s6450_s22 }
 0x360   : > { %2987 = vrot.lane.b32.xlu0 %v6518_v5, %s6450_s22 }
 0x367   : > { %v2127_v27 = vpop.xlane.xlu0 %2126 }
 0x368   : > { %v2149_v28 = vsub.f32 %v1575_v49, %v2127_v27 }
 0x36a   : > { %v2157_v29 = vmul.f32 1.442695, %v2149_v28 }
 0x36b   : > { %v2133_v30 = vpop.xlane.xlu0 %2132 }
 0x36c   : > { %v2151_v31 = vsub.f32 %v1731_v52, %v2133_v30  ;;  %6325 = vpow2.f32 %v2157_v29 }
 0x36e   : > { %v2161_v32 = vmul.f32 1.442695, %v2151_v31 }
 0x370   : > { %6327 = vpow2.f32 %v2161_v32 }
 0x379   : > { %v6846_v2 = vpop.eup %6325 }
 0x37a   : > { %v2173_v4 = vsel %vm794_vm2, %v6846_v2, 0.0 }
 0x37d   : > { %v6852_v3 = vpop.eup %6327 }
 0x37e   : > { %v2179_v5 = vsel %vm794_vm2, %v6852_v3, 0.0 }
 0x37f   : > { %2147 = vmax.xlane.f32.xlu1 %v2146_v1  ;;  %2174 = vadd.xlane.f32.xlu0 %v2173_v4 }
 0x383   : > { %2180 = vadd.xlane.f32.xlu0 %v2179_v5 }
 0x390   : > { %3065 = vrot.lane.b32.xlu1 %v6522_v6, %s6450_s22 }
 0x3b3   : > { %v2130_v33 = vpop.xlane.xlu1 %2129 }
 0x3b4   : > { %v2150_v34 = vsub.f32 %v1653_v61, %v2130_v33 }
 0x3b6   : > { %v2159_v36 = vmul.f32 1.442695, %v2150_v34 }
 0x3b7   : > { %v2136_v40 = vpop.xlane.xlu0 %2135 }
 0x3b8   : > { %6329 = vpow2.f32 %v2159_v36  ;;  %v2152_v41 = vsub.f32 %v1809_v17, %v2136_v40 }
 0x3ba   : > { %v2163_v44 = vmul.f32 1.442695, %v2152_v41 }
 0x3bb   : > { %v2142_v37 = vpop.xlane.xlu1 %2141  ;;  %v2139_v47 = vpop.xlane.xlu0 %2138 }
 0x3bc   : > { %6331 = vpow2.f32 %v2163_v44  ;;  %v2154_v48 = vsub.f32 %v1965_v21, %v2142_v37  ;;  %v2153_v49 = vsub.f32 %v6813_v55, %v2139_v47 }
 0x3be   : > { %v2167_v50 = vmul.f32 1.442695, %v2154_v48  ;;  %v2165_v51 = vmul.f32 1.442695, %v2153_v49 }
 0x3bf   : > { %v2291_v52 = vpop.permute.xlu1 %2290  ;;  %v2145_v53 = vpop.xlane.xlu0 %2144 }
 0x3c0   : > { %6333 = vpow2.f32 %v2167_v50  ;;  %v2155_v6 = vsub.f32 %v6815_v57, %v2145_v53  ;;  %6079 = vmatpush3.msk.msra.mxu1 %vm889_vm3, %v2291_v52 }
 0x3c1   : > { %6335 = vpow2.f32 %v2165_v51  ;;  %6088 = vmatprep.subr.mxu1 %v6445_v0 }
 0x3c2   : > { %v2169_v54 = vmul.f32 1.442695, %v2155_v6 }
 0x3c3   : > { %v2214_v56 = vpop.permute.xlu0 %2213  ;;  %v2368_v20 = vpop.permute.xlu1 %2367 }
 0x3c4   : > { %6337 = vpow2.f32 %v2169_v54  ;;  %6074 = vmatpush3.msk.msra.mxu0 %vm889_vm3, %v2214_v56 }
 0x3c5   : > { %v6863_v58 = vpop.eup %6329  ;;  %6083 = vmatprep.subr.mxu0 %v6445_v0 }
 0x3c6   : > { %v2176_v55 = vsel %vm794_vm2, %v6863_v58, 0.0 }
 0x3c7   : > { %2177 = vadd.xlane.f32.xlu1 %v2176_v55  ;;  %v2522_v21 = vpop.permute.xlu0 %2521  ;;  %v2445_v22 = vpop.permute.xlu1 %2444 }
 0x3c9   : > { %v6868_v60 = vpop.eup %6331 }
 0x3ca   : > { %v2182_v57 = vsel %vm794_vm2, %v6868_v60, 0.0 }
 0x3cb   : > { %2183 = vadd.xlane.f32.xlu1 %v2182_v57  ;;  %v6892_v23 = vpop.permute.xlu0 %2675  ;;  %v2599_v24 = vpop.permute.xlu1 %2598 }
 0x3cd   : > { %v6872_v61 = vpop.eup %6333 }
 0x3ce   : > { %v6874_v62 = vpop.eup %6335  ;;  %v2188_v63 = vsel %vm794_vm2, %v6872_v61, 0.0 }
 0x3cf   : > { %2189 = vadd.xlane.f32.xlu1 %v2188_v63  ;;  %v2185_v17 = vsel %vm794_vm2, %v6874_v62, 0.0  ;;  %v6896_v26 = vpop.permute.xlu0 %2831 }
 0x3d0   : > { %2186 = vadd.xlane.f32.xlu0 %v2185_v17 }
 0x3d1   : > { %v6880_v18 = vpop.eup %6337 }
 0x3d2   : > { %v2191_v19 = vsel %vm794_vm2, %v6880_v18, 0.0 }
 0x3d4   : > { %2192 = vadd.xlane.f32.xlu0 %v2191_v19 }
 0x3e0   : > { %3063 = vrot.lane.b32.xlu1 %v6542_v9, %s6450_s22  ;;  %v6900_v9 = vpop.permute.xlu1 %2752 }
 0x3e4   : > { %3221 = vrot.lane.b32.xlu1 %v6548_v10, %s6450_s22  ;;  %v6906_v10 = vpop.permute.xlu1 %2909 }
 0x3e8   : > { %v6910_v27 = vpop.permute.xlu1 %2907 }
 0x3ea   : > { %2985 = vrot.lane.b32.xlu0 %v6533_v7, %s6450_s22  ;;  %v6904_v7 = vpop.permute.xlu0 %2829 }
 0x3ee   : > { %3143 = vrot.lane.b32.xlu0 %v6539_v8, %s6450_s22  ;;  %v6908_v8 = vpop.permute.xlu0 %2987 }
 0x3f2   : > { %3141 = vrot.lane.b32.xlu0 %v6557_v11, %s6450_s22 }
 0x3f6   : > { %3299 = vrot.lane.b32.xlu0 %v6564_v12, %s6450_s22 }
 0x3fa   : > { %3297 = vrot.lane.b32.xlu0 %v6583_v15, %s6450_s22 }
 0x408   : > { %v2148_v28 = vpop.xlane.xlu1 %2147  ;;  %v2175_v11 = vpop.xlane.xlu0 %2174 }
 0x409   : > { %v2156_v29 = vsub.f32 %v6826_v25, %v2148_v28  ;;  %6339 = vrcp.f32 %v2175_v11 }
 0x40b   : > { %v2171_v30 = vmul.f32 1.442695, %v2156_v29 }
 0x40c   : > { %v2181_v12 = vpop.xlane.xlu0 %2180 }
 0x40d   : > { %6341 = vpow2.f32 %v2171_v30 }
 0x40e   : > { %6343 = vrcp.f32 %v2181_v12 }
 0x416   : > { %v6340_v31 = vpop.eup %6339 }
 0x417   : > { %v2205_v15 = vmul.f32 %v6340_v31, %v6846_v2  ;;  %v6935_v2 = vpop.permute.xlu1 %3065 }
 0x419   : > { %6076 = vmatmul.mubr.msk.f32.vlgmr.msra.gmra.mxu0 %vm885_vm4, %v2205_v15 }
 0x41a   : > { %v6915_v32 = vpop.eup %6341  ;;  %6084 = vmatpush3.msk.msra.mxu0 %vm889_vm3, %v2368_v20  ;;  %6085 = vmatprep.mubr.msk.f32.mxu0 %vm6446_vm0, %v6445_v0 }
 0x41b   : > { %v6344_v1 = vpop.eup %6343  ;;  %v2194_v25 = vsel %vm794_vm2, %v6915_v32, 0.0  ;;  %6093 = vmatprep.subr.mxu0 %v6445_v0 }
 0x41c   : > { %2195 = vadd.xlane.f32.xlu1 %v2194_v25  ;;  %v2207_v4 = vmul.f32 %v6344_v1, %v6852_v3 }
 0x41e   : > { %6086 = vmatmul.mubr.msk.f32.vlgmr.msra.gmra.mxu0 %vm885_vm4, %v2207_v4 }
 0x41f   : > { %6094 = vmatpush3.msk.msra.mxu0 %vm889_vm3, %v2522_v21  ;;  %6095 = vmatprep.mubr.msk.f32.mxu0 %vm6446_vm0, %v6445_v0 }
 0x420   : > { %6103 = vmatprep.subr.mxu0 %v6445_v0 }
 0x42d   : > { %3219 = vrot.lane.b32.xlu1 %v6567_v13, %s6450_s22 }
 0x431   : > { %3377 = vrot.lane.b32.xlu1 %v6573_v14, %s6450_s22 }
 0x435   : > { %3375 = vrot.lane.b32.xlu1 %v6590_v16, %s6450_s22 }
 0x450   : > { %v2178_v3 = vpop.xlane.xlu1 %2177 }
 0x451   : > { %6345 = vrcp.f32 %v2178_v3 }
 0x454   : > { %v2184_v5 = vpop.xlane.xlu1 %2183 }
 0x455   : > { %6347 = vrcp.f32 %v2184_v5 }
 0x458   : > { %v2190_v33 = vpop.xlane.xlu1 %2189 }
 0x459   : > { %6349 = vrcp.f32 %v2190_v33  ;;  %v2187_v34 = vpop.xlane.xlu0 %2186 }
 0x45a   : > { %6351 = vrcp.f32 %v2187_v34 }
 0x45c   : > { %v3064_v54 = vpop.permute.xlu1 %3063 }
 0x45d   : > { %v2193_v36 = vpop.xlane.xlu0 %2192 }
 0x45e   : > { %v6346_v40 = vpop.eup %6345  ;;  %6353 = vrcp.f32 %v2193_v36 }
 0x45f   : > { %v2206_v13 = vmul.f32 %v6346_v40, %v6863_v58 }
 0x460   : > { %v3222_v56 = vpop.permute.xlu1 %3221 }
 0x461   : > { %6081 = vmatmul.mubr.msk.f32.vlgmr.msra.gmra.mxu1 %vm885_vm4, %v2206_v13  ;;  %v2986_v41 = vpop.permute.xlu0 %2985 }
 0x462   : > { %v6348_v14 = vpop.eup %6347  ;;  %6089 = vmatpush3.msk.msra.mxu1 %vm889_vm3, %v2445_v22  ;;  %6090 = vmatprep.mubr.msk.f32.mxu1 %vm6446_vm0, %v6445_v0 }
 0x463   : > { %6098 = vmatprep.subr.mxu1 %v6445_v0  ;;  %v2208_v16 = vmul.f32 %v6348_v14, %v6868_v60 }
 0x465   : > { %6091 = vmatmul.mubr.msk.f32.vlgmr.msra.gmra.mxu1 %vm885_vm4, %v2208_v16  ;;  %v3144_v49 = vpop.permute.xlu0 %3143 }
 0x466   : > { %v6350_v44 = vpop.eup %6349  ;;  %6099 = vmatpush3.msk.msra.mxu1 %vm889_vm3, %v2599_v24  ;;  %6100 = vmatprep.mubr.msk.f32.mxu1 %vm6446_vm0, %v6445_v0 }
 0x467   : > { %v6352_v37 = vpop.eup %6351  ;;  %6108 = vmatprep.subr.mxu1 %v6445_v0  ;;  %v2210_v47 = vmul.f32 %v6350_v44, %v6872_v61 }
 0x468   : > { %v2209_v48 = vmul.f32 %v6352_v37, %v6874_v62 }
 0x469   : > { %6101 = vmatmul.mubr.msk.f32.vlgmr.msra.gmra.mxu1 %vm885_vm4, %v2210_v47  ;;  %v3142_v52 = vpop.permute.xlu0 %3141  ;;  %v7052_v47 = vld [vmem:[%s6492_s15 + $0x4] sm:$0xf] }
 0x46a   : > { %6096 = vmatmul.mubr.msk.f32.vlgmr.msra.gmra.mxu0 %vm885_vm4, %v2209_v48  ;;  %6109 = vmatpush3.msk.msra.mxu1 %vm889_vm3, %v6900_v9  ;;  %v7056_v48 = vld [vmem:[%s6492_s15 + $0x8] sm:$0xf] }
 0x46b   : > { %v6354_v50 = vpop.eup %6353  ;;  %6104 = vmatpush3.msk.msra.mxu0 %vm889_vm3, %v6892_v23  ;;  %6105 = vmatprep.mubr.msk.f32.mxu0 %vm6446_vm0, %v6445_v0 }
 0x46c   : > { %6113 = vmatprep.subr.mxu0 %v6445_v0  ;;  %v2211_v51 = vmul.f32 %v6354_v50, %v6880_v18  ;;  %6110 = vmatprep.mubr.msk.f32.mxu1 %vm6446_vm0, %v6445_v0  ;;  %v7064_v50 = vld [vmem:[%s6492_s15] sm:$0xf] }
 0x46d   : > { %6118 = vmatprep.subr.mxu1 %v6445_v0  ;;  %v3300_v53 = vpop.permute.xlu0 %3299 }
 0x46e   : > { %6106 = vmatmul.mubr.msk.f32.vlgmr.msra.gmra.mxu0 %vm885_vm4, %v2211_v51  ;;  %v7068_v51 = vld [vmem:[%s6492_s15 + $0x14] sm:$0xf] }
 0x46f   : > { %6114 = vmatpush3.xpose.msk.msra.mxu0 %vm185_vm1, %v6896_v26  ;;  %6115 = vmatprep.mubr.msk.f32.mxu0 %vm6446_vm0, %v6445_v0 }
 0x470   : > { %6123 = vmatprep.subr.mxu0 %v6445_v0 }
 0x471   : > { %v3298_v6 = vpop.permute.xlu0 %3297 }
 0x472   : > { %6116 = vmatmul.mubr.msk.f32.vlgmr.msra.gmra.mxu0 %vm185_vm1, %v6904_v7 }
 0x473   : > { %6124 = vmatpush3.xpose.msk.msra.mxu0 %vm185_vm1, %v6908_v8  ;;  %6125 = vmatprep.mubr.msk.f32.mxu0 %vm6446_vm0, %v6445_v0 }
 0x474   : > { %6133 = vmatprep.subr.mxu0 %v6445_v0 }
 0x476   : > { %6126 = vmatmul.mubr.msk.f32.vlgmr.msra.gmra.mxu0 %vm185_vm1, %v2986_v41 }
 0x477   : > { %6134 = vmatpush3.xpose.msk.msra.mxu0 %vm185_vm1, %v3144_v49  ;;  %6135 = vmatprep.mubr.msk.f32.mxu0 %vm6446_vm0, %v6445_v0  ;;  %v7060_v49 = vld [vmem:[%s6492_s15 + $0xc] sm:$0xf] }
 0x478   : > { %6143 = vmatprep.subr.mxu0 %v6445_v0 }
 0x47a   : > { %6136 = vmatmul.mubr.msk.f32.vlgmr.msra.gmra.mxu0 %vm185_vm1, %v3142_v52  ;;  %v7072_v52 = vld [vmem:[%s6492_s15 + $0x10] sm:$0xf] }
 0x47b   : > { %6144 = vmatpush3.xpose.msk.msra.mxu0 %vm185_vm1, %v3300_v53  ;;  %6145 = vmatprep.mubr.msk.f32.mxu0 %vm6446_vm0, %v6445_v0  ;;  %v7076_v53 = vld [vmem:[%s6492_s15 + $0x1c] sm:$0xf] }
 0x47c   : > { %6153 = vmatprep.subr.mxu0 %v6445_v0 }
 0x47e   : > { %6146 = vmatmul.mubr.msk.f32.vlgmr.msra.gmra.mxu0 %vm185_vm1, %v3298_v6  ;;  %v7080_v6 = vld [vmem:[%s6492_s15 + $0x18] sm:$0xf] }
 0x47f   : > { %6155 = vmatprep.mubr.msk.f32.mxu0 %vm6446_vm0, %v6445_v0 }
 0x4a5   : > { %v2196_v58 = vpop.xlane.xlu1 %2195 }
 0x4a6   : > { %6355 = vrcp.f32 %v2196_v58 }
 0x4a9   : > { %v3220_v57 = vpop.permute.xlu1 %3219 }
 0x4ad   : > { %v3378_v61 = vpop.permute.xlu1 %3377 }
 0x4b1   : > { %v3376_v62 = vpop.permute.xlu1 %3375 }
 0x4b3   : > { %v6356_v55 = vpop.eup %6355 }
 0x4b4   : > { %v2212_v60 = vmul.f32 %v6356_v55, %v6915_v32 }
 0x4b6   : > { %6111 = vmatmul.mubr.msk.f32.vlgmr.msra.gmra.mxu1 %vm885_vm4, %v2212_v60 }
 0x4b7   : > { %6119 = vmatpush3.xpose.msk.msra.mxu1 %vm185_vm1, %v6906_v10  ;;  %6120 = vmatprep.mubr.msk.f32.mxu1 %vm6446_vm0, %v6445_v0 }
 0x4b8   : > { %6128 = vmatprep.subr.mxu1 %v6445_v0 }
 0x4ba   : > { %6121 = vmatmul.mubr.msk.f32.vlgmr.msra.gmra.mxu1 %vm185_vm1, %v6910_v27 }
 0x4bb   : > { %6129 = vmatpush3.xpose.msk.msra.mxu1 %vm185_vm1, %v6935_v2  ;;  %6130 = vmatprep.mubr.msk.f32.mxu1 %vm6446_vm0, %v6445_v0 }
 0x4bc   : > { %6138 = vmatprep.subr.mxu1 %v6445_v0 }
 0x4be   : > { %6131 = vmatmul.mubr.msk.f32.vlgmr.msra.gmra.mxu1 %vm185_vm1, %v3064_v54  ;;  %v6429_v54 = vld [vmem:[%s6498_s18 + $0x4] sm:$0xf] }
 0x4bf   : > { %6139 = vmatpush3.xpose.msk.msra.mxu1 %vm185_vm1, %v3222_v56  ;;  %6140 = vmatprep.mubr.msk.f32.mxu1 %vm6446_vm0, %v6445_v0  ;;  %v6430_v56 = vld [vmem:[%s6498_s18] sm:$0xf] }
 0x4c0   : > { %6148 = vmatprep.subr.mxu1 %v6445_v0 }
 0x4c2   : > { %6141 = vmatmul.mubr.msk.f32.vlgmr.msra.gmra.mxu1 %vm185_vm1, %v3220_v57 }
 0x4c3   : > { %6149 = vmatpush3.xpose.msk.msra.mxu1 %vm185_vm1, %v3378_v61  ;;  %6150 = vmatprep.mubr.msk.f32.mxu1 %vm6446_vm0, %v6445_v0 }
 0x4c4   : > { %6158 = vmatprep.subr.mxu1 %v6445_v0 }
 0x4c6   : > { %6151 = vmatmul.mubr.msk.f32.vlgmr.msra.gmra.mxu1 %vm185_vm1, %v3376_v62 }
 0x4c7   : > { %6160 = vmatprep.mubr.msk.f32.mxu1 %vm6446_vm0, %v6445_v0 }
 0x4d9   : > { %v7017_v63 = vpop.f32.mrf.mxu0 }
 0x4db   : > { %v6077_v17 = vpop.f32.mrf.mxu0 }
 0x4de   : > { %v7019_v18 = vpop.f32.mrf.mxu0 }
 0x4e0   : > { %v6087_v19 = vpop.f32.mrf.mxu0 }
 0x521   : > { %v7021_v20 = vpop.f32.mrf.mxu1 }
 0x523   : > { %v6082_v21 = vpop.f32.mrf.mxu1 }
 0x525   : > { %v7023_v22 = vpop.f32.mrf.mxu1 }
 0x527   : > { %v6092_v23 = vpop.f32.mrf.mxu1 }
 0x529   : > { %v7025_v24 = vpop.f32.mrf.mxu1 }
 0x52a   : > { %v7027_v26 = vpop.f32.mrf.mxu0 }
 0x52b   : > { %v6102_v9 = vpop.f32.mrf.mxu1 }
 0x52c   : > { %v6097_v7 = vpop.f32.mrf.mxu0 }
 0x52e   : > { %v7029_v10 = vpop.f32.mrf.mxu0 }
 0x530   : > { %v6107_v8 = vpop.f32.mrf.mxu0 }
 0x532   : > { %v2903_v27 = vpop.f32.mrf.mxu0 }
 0x533   : > { %v3453_v28 = vsel %vm794_vm2, %v2903_v27, -inf }
 0x534   : > { %3454 = vmax.xlane.f32.xlu0 %v3453_v28  ;;  %v6117_v11 = vpop.f32.mrf.mxu0 }
 0x536   : > { %v3059_v29 = vpop.f32.mrf.mxu0 }
 0x537   : > { %v3459_v30 = vsel %vm794_vm2, %v3059_v29, -inf }
 0x538   : > { %3460 = vmax.xlane.f32.xlu0 %v3459_v30  ;;  %v6127_v12 = vpop.f32.mrf.mxu0 }
 0x53a   : > { %v7033_v31 = vpop.f32.mrf.mxu0 }
 0x53b   : > { %v3465_v40 = vsel %vm794_vm2, %v7033_v31, -inf }
 0x53c   : > { %v6137_v15 = vpop.f32.mrf.mxu0 }
 0x53e   : > { %v7035_v32 = vpop.f32.mrf.mxu0 }
 0x53f   : > { %v3471_v41 = vsel %vm794_vm2, %v7035_v32, -inf }
 0x540   : > { %v6147_v1 = vpop.f32.mrf.mxu0 }
 0x576   : > { %v7037_v25 = vpop.f32.mrf.mxu1 }
 0x578   : > { %v6112_v4 = vpop.f32.mrf.mxu1 }
 0x57a   : > { %v2981_v2 = vpop.f32.mrf.mxu1 }
 0x57b   : > { %v3456_v3 = vsel %vm794_vm2, %v2981_v2, -inf }
 0x57c   : > { %3457 = vmax.xlane.f32.xlu1 %v3456_v3  ;;  %v6122_v5 = vpop.f32.mrf.mxu1 }
 0x57e   : > { %v3137_v33 = vpop.f32.mrf.mxu1 }
 0x57f   : > { %v3462_v34 = vsel %vm794_vm2, %v3137_v33, -inf }
 0x580   : > { %v6132_v36 = vpop.f32.mrf.mxu1  ;;  %3463 = vmax.xlane.f32.xlu0 %v3462_v34 }
 0x582   : > { %v7043_v13 = vpop.f32.mrf.mxu1 }
 0x583   : > { %v3468_v14 = vsel %vm794_vm2, %v7043_v13, -inf }
 0x584   : > { %3469 = vmax.xlane.f32.xlu1 %v3468_v14  ;;  %v6142_v16 = vpop.f32.mrf.mxu1  ;;  %3466 = vmax.xlane.f32.xlu0 %v3465_v40 }
 0x586   : > { %v7049_v44 = vpop.f32.mrf.mxu1 }
 0x587   : > { %v3474_v17 = vsel %vm794_vm2, %v7049_v44, -inf }
 0x588   : > { %3472 = vmax.xlane.f32.xlu0 %v3471_v41  ;;  %v6152_v37 = vpop.f32.mrf.mxu1 }
 0x595   : > { %3618 = vrot.lane.b32.xlu1 %v7052_v47, %s6451_s23 }
 0x599   : > { %3695 = vrot.lane.b32.xlu1 %v7056_v48, %s6451_s23 }
 0x59d   : > { %3772 = vrot.lane.b32.xlu1 %v7060_v49, %s6451_s23 }
 0x59e   : > { %3541 = vrot.lane.b32.xlu0 %v7064_v50, %s6451_s23 }
 0x5a1   : > { %3926 = vrot.lane.b32.xlu1 %v7068_v51, %s6451_s23 }
 0x5a2   : > { %3849 = vrot.lane.b32.xlu0 %v7072_v52, %s6451_s23 }
 0x5a5   : > { %4080 = vrot.lane.b32.xlu1 %v7076_v53, %s6451_s23 }
 0x5a6   : > { %4003 = vrot.lane.b32.xlu0 %v7080_v6, %s6451_s23 }
 0x5a9   : > { %4237 = vrot.lane.b32.xlu1 %v7052_v47, %s6452_s24 }
 0x5aa   : > { %4159 = vrot.lane.b32.xlu0 %v7064_v50, %s6452_s24 }
 0x5ad   : > { %4235 = vrot.lane.b32.xlu1 %v6429_v54, %s6452_s24 }
 0x5ae   : > { %4157 = vrot.lane.b32.xlu0 %v6430_v56, %s6452_s24 }
 0x5b2   : > { %4315 = vrot.lane.b32.xlu0 %v7056_v48, %s6452_s24 }
 0x5bd   : > { %v3455_v58 = vpop.xlane.xlu0 %3454 }
 0x5be   : > { %v3477_v55 = vsub.f32 %v2903_v27, %v3455_v58  ;;  %v6431_v58 = vld [vmem:[%s6498_s18 + $0xc] sm:$0xf] }
 0x5c0   : > { %v3485_v60 = vmul.f32 1.442695, %v3477_v55 }
 0x5c1   : > { %v3461_v57 = vpop.xlane.xlu0 %3460 }
 0x5c2   : > { %6357 = vpow2.f32 %v3485_v60  ;;  %v3479_v61 = vsub.f32 %v3059_v29, %v3461_v57  ;;  %v6432_v57 = vld [vmem:[%s6498_s18 + $0x8] sm:$0xf] }
 0x5c4   : > { %v3489_v62 = vmul.f32 1.442695, %v3479_v61 }
 0x5c6   : > { %6359 = vpow2.f32 %v3489_v62 }
 0x5cf   : > { %v7095_v19 = vpop.eup %6357 }
 0x5d0   : > { %v3501_v21 = vsel %vm794_vm2, %v7095_v19, 0.0 }
 0x5d1   : > { %3475 = vmax.xlane.f32.xlu1 %v3474_v17  ;;  %3502 = vadd.xlane.f32.xlu0 %v3501_v21  ;;  %v6433_v21 = vld [vmem:[%s6498_s18 + $0x10] sm:$0xf] }
 0x5d3   : > { %v7099_v23 = vpop.eup %6359 }
 0x5d4   : > { %v3507_v9 = vsel %vm794_vm2, %v7099_v23, 0.0 }
 0x5d5   : > { %3508 = vadd.xlane.f32.xlu0 %v3507_v9 }
 0x5e2   : > { %4393 = vrot.lane.b32.xlu1 %v7060_v49, %s6452_s24 }
 0x605   : > { %v3458_v7 = vpop.xlane.xlu1 %3457 }
 0x606   : > { %v3478_v8 = vsub.f32 %v2981_v2, %v3458_v7 }
 0x608   : > { %v3487_v27 = vmul.f32 1.442695, %v3478_v8  ;;  %v6434_v8 = vld [vmem:[%s6498_s18 + $0x18] sm:$0xf] }
 0x609   : > { %v3464_v28 = vpop.xlane.xlu0 %3463 }
 0x60a   : > { %6361 = vpow2.f32 %v3487_v27  ;;  %v3480_v11 = vsub.f32 %v3137_v33, %v3464_v28 }
 0x60c   : > { %v3491_v29 = vmul.f32 1.442695, %v3480_v11 }
 0x60d   : > { %v3470_v30 = vpop.xlane.xlu1 %3469  ;;  %v3467_v12 = vpop.xlane.xlu0 %3466 }
 0x60e   : > { %6363 = vpow2.f32 %v3491_v29  ;;  %v3482_v15 = vsub.f32 %v7043_v13, %v3470_v30  ;;  %v3481_v1 = vsub.f32 %v7033_v31, %v3467_v12 }
 0x610   : > { %v3495_v4 = vmul.f32 1.442695, %v3482_v15  ;;  %v3493_v3 = vmul.f32 1.442695, %v3481_v1 }
 0x611   : > { %v3619_v5 = vpop.permute.xlu1 %3618  ;;  %v3473_v34 = vpop.xlane.xlu0 %3472 }
 0x612   : > { %6365 = vpow2.f32 %v3495_v4  ;;  %v3483_v36 = vsub.f32 %v7035_v32, %v3473_v34  ;;  %6159 = vmatpush3.msk.msra.mxu1 %vm889_vm3, %v3619_v5 }
 0x613   : > { %6367 = vpow2.f32 %v3493_v3  ;;  %6168 = vmatprep.subr.mxu1 %v6445_v0 }
 0x614   : > { %v3497_v2 = vmul.f32 1.442695, %v3483_v36 }
 0x615   : > { %v3542_v33 = vpop.permute.xlu0 %3541  ;;  %v3696_v55 = vpop.permute.xlu1 %3695 }
 0x616   : > { %6369 = vpow2.f32 %v3497_v2  ;;  %6154 = vmatpush3.msk.msra.mxu0 %vm889_vm3, %v3542_v33  ;;  %v6436_v33 = vld [vmem:[%s6498_s18 + $0x1c] sm:$0xf] }
 0x617   : > { %v7111_v40 = vpop.eup %6361  ;;  %6163 = vmatprep.subr.mxu0 %v6445_v0 }
 0x618   : > { %v3504_v31 = vsel %vm794_vm2, %v7111_v40, 0.0 }
 0x619   : > { %3505 = vadd.xlane.f32.xlu1 %v3504_v31  ;;  %v3850_v60 = vpop.permute.xlu0 %3849  ;;  %v3773_v61 = vpop.permute.xlu1 %3772 }
 0x61b   : > { %v7116_v32 = vpop.eup %6363 }
 0x61c   : > { %v3510_v13 = vsel %vm794_vm2, %v7116_v32, 0.0 }
 0x61d   : > { %3511 = vadd.xlane.f32.xlu1 %v3510_v13  ;;  %v7140_v62 = vpop.permute.xlu0 %4003  ;;  %v3927_v17 = vpop.permute.xlu1 %3926 }
 0x61f   : > { %v7120_v14 = vpop.eup %6365 }
 0x620   : > { %v7122_v16 = vpop.eup %6367  ;;  %v3516_v41 = vsel %vm794_vm2, %v7120_v14, 0.0 }
 0x621   : > { %3517 = vadd.xlane.f32.xlu1 %v3516_v41  ;;  %v3513_v37 = vsel %vm794_vm2, %v7122_v16, 0.0  ;;  %v7144_v9 = vpop.permute.xlu0 %4159  ;;  %v7148_v7 = vpop.permute.xlu1 %4080 }
 0x622   : > { %3514 = vadd.xlane.f32.xlu0 %v3513_v37 }
 0x623   : > { %v7128_v54 = vpop.eup %6369 }
 0x624   : > { %v3519_v56 = vsel %vm794_vm2, %v7128_v54, 0.0 }
 0x625   : > { %v7152_v27 = vpop.permute.xlu0 %4157  ;;  %v7154_v28 = vpop.permute.xlu1 %4237 }
 0x626   : > { %3520 = vadd.xlane.f32.xlu0 %v3519_v56 }
 0x629   : > { %v7156_v11 = vpop.permute.xlu0 %4315  ;;  %v7158_v29 = vpop.permute.xlu1 %4235 }
 0x632   : > { %4391 = vrot.lane.b32.xlu1 %v6431_v58, %s6452_s24 }
 0x636   : > { %4549 = vrot.lane.b32.xlu1 %v7068_v51, %s6452_s24 }
 0x63c   : > { %4313 = vrot.lane.b32.xlu0 %v6432_v57, %s6452_s24 }
 0x640   : > { %4471 = vrot.lane.b32.xlu0 %v7072_v52, %s6452_s24 }
 0x644   : > { %4469 = vrot.lane.b32.xlu0 %v6433_v21, %s6452_s24 }
 0x648   : > { %4627 = vrot.lane.b32.xlu0 %v7080_v6, %s6452_s24 }
 0x64c   : > { %4625 = vrot.lane.b32.xlu0 %v6434_v8, %s6452_s24 }
 0x65a   : > { %v3476_v30 = vpop.xlane.xlu1 %3475  ;;  %v3503_v12 = vpop.xlane.xlu0 %3502 }
 0x65b   : > { %v3484_v15 = vsub.f32 %v7049_v44, %v3476_v30  ;;  %6371 = vrcp.f32 %v3503_v12 }
 0x65d   : > { %v3499_v1 = vmul.f32 1.442695, %v3484_v15 }
 0x65e   : > { %v3509_v4 = vpop.xlane.xlu0 %3508  ;;  %v7183_v31 = vpop.permute.xlu1 %4393 }
 0x65f   : > { %6373 = vpow2.f32 %v3499_v1 }
 0x660   : > { %6375 = vrcp.f32 %v3509_v4 }
 0x668   : > { %v6372_v3 = vpop.eup %6371 }
 0x669   : > { %v3533_v5 = vmul.f32 %v6372_v3, %v7095_v19  ;;  %v6435_v19 = vld [vmem:[%s6498_s18 + $0x14] sm:$0xf] }
 0x66b   : > { %6156 = vmatmul.mubr.msk.f32.vlgmr.msra.gmra.mxu0 %vm885_vm4, %v3533_v5 }
 0x66c   : > { %v7163_v34 = vpop.eup %6373  ;;  %6164 = vmatpush3.msk.msra.mxu0 %vm889_vm3, %v3696_v55  ;;  %6165 = vmatprep.mubr.msk.f32.mxu0 %vm6446_vm0, %v6445_v0 }
 0x66d   : > { %v6376_v44 = vpop.eup %6375  ;;  %v3522_v36 = vsel %vm794_vm2, %v7163_v34, 0.0  ;;  %6173 = vmatprep.subr.mxu0 %v6445_v0 }
 0x66e   : > { %3523 = vadd.xlane.f32.xlu1 %v3522_v36  ;;  %v3535_v2 = vmul.f32 %v6376_v44, %v7099_v23 }
 0x670   : > { %6166 = vmatmul.mubr.msk.f32.vlgmr.msra.gmra.mxu0 %vm885_vm4, %v3535_v2 }
 0x671   : > { %6174 = vmatpush3.msk.msra.mxu0 %vm889_vm3, %v3850_v60  ;;  %6175 = vmatprep.mubr.msk.f32.mxu0 %vm6446_vm0, %v6445_v0 }
 0x672   : > { %6183 = vmatprep.subr.mxu0 %v6445_v0 }
 0x67f   : > { %4547 = vrot.lane.b32.xlu1 %v6435_v19, %s6452_s24 }
 0x683   : > { %4705 = vrot.lane.b32.xlu1 %v7076_v53, %s6452_s24 }
 0x687   : > { %4703 = vrot.lane.b32.xlu1 %v6436_v33, %s6452_s24 }
 0x6a2   : > { %v3506_v23 = vpop.xlane.xlu1 %3505 }
 0x6a3   : > { %6377 = vrcp.f32 %v3506_v23 }
 0x6a6   : > { %v3512_v13 = vpop.xlane.xlu1 %3511 }
 0x6a7   : > { %6379 = vrcp.f32 %v3512_v13 }
 0x6aa   : > { %v3518_v41 = vpop.xlane.xlu1 %3517 }
 0x6ab   : > { %6381 = vrcp.f32 %v3518_v41  ;;  %v3515_v37 = vpop.xlane.xlu0 %3514 }
 0x6ac   : > { %6383 = vrcp.f32 %v3515_v37 }
 0x6af   : > { %v3521_v56 = vpop.xlane.xlu0 %3520 }
 0x6b0   : > { %v6378_v58 = vpop.eup %6377  ;;  %6385 = vrcp.f32 %v3521_v56 }
 0x6b1   : > { %v3534_v55 = vmul.f32 %v6378_v58, %v7111_v40 }
 0x6b3   : > { %6161 = vmatmul.mubr.msk.f32.vlgmr.msra.gmra.mxu1 %vm885_vm4, %v3534_v55  ;;  %v4314_v21 = vpop.permute.xlu0 %4313 }
 0x6b4   : > { %v6380_v60 = vpop.eup %6379  ;;  %6169 = vmatpush3.msk.msra.mxu1 %vm889_vm3, %v3773_v61  ;;  %6170 = vmatprep.mubr.msk.f32.mxu1 %vm6446_vm0, %v6445_v0 }
 0x6b5   : > { %6178 = vmatprep.subr.mxu1 %v6445_v0  ;;  %v3536_v57 = vmul.f32 %v6380_v60, %v7116_v32 }
 0x6b7   : > { %6171 = vmatmul.mubr.msk.f32.vlgmr.msra.gmra.mxu1 %vm885_vm4, %v3536_v57  ;;  %v4472_v12 = vpop.permute.xlu0 %4471 }
 0x6b8   : > { %v6382_v8 = vpop.eup %6381  ;;  %6179 = vmatpush3.msk.msra.mxu1 %vm889_vm3, %v3927_v17  ;;  %6180 = vmatprep.mubr.msk.f32.mxu1 %vm6446_vm0, %v6445_v0  ;;  %v4392_v17 = vpop.permute.xlu1 %4391 }
 0x6b9   : > { %v6384_v40 = vpop.eup %6383  ;;  %6188 = vmatprep.subr.mxu1 %v6445_v0  ;;  %v3538_v61 = vmul.f32 %v6382_v8, %v7120_v14 }
 0x6ba   : > { %v3537_v30 = vmul.f32 %v6384_v40, %v7122_v16 }
 0x6bb   : > { %6181 = vmatmul.mubr.msk.f32.vlgmr.msra.gmra.mxu1 %vm885_vm4, %v3538_v61  ;;  %v4470_v16 = vpop.permute.xlu0 %4469 }
 0x6bc   : > { %6176 = vmatmul.mubr.msk.f32.vlgmr.msra.gmra.mxu0 %vm885_vm4, %v3537_v30  ;;  %6189 = vmatpush3.msk.msra.mxu1 %vm889_vm3, %v7148_v7 }
 0x6bd   : > { %v6386_v32 = vpop.eup %6385  ;;  %6184 = vmatpush3.msk.msra.mxu0 %vm889_vm3, %v7140_v62  ;;  %6185 = vmatprep.mubr.msk.f32.mxu0 %vm6446_vm0, %v6445_v0 }
 0x6be   : > { %6193 = vmatprep.subr.mxu0 %v6445_v0  ;;  %v3539_v14 = vmul.f32 %v6386_v32, %v7128_v54  ;;  %6190 = vmatprep.mubr.msk.f32.mxu1 %vm6446_vm0, %v6445_v0 }
 0x6bf   : > { %6198 = vmatprep.subr.mxu1 %v6445_v0  ;;  %v4628_v54 = vpop.permute.xlu0 %4627 }
 0x6c0   : > { %6186 = vmatmul.mubr.msk.f32.vlgmr.msra.gmra.mxu0 %vm885_vm4, %v3539_v14 }
 0x6c1   : > { %6194 = vmatpush3.xpose.msk.msra.mxu0 %vm185_vm1, %v7144_v9  ;;  %6195 = vmatprep.mubr.msk.f32.mxu0 %vm6446_vm0, %v6445_v0  ;;  %v4550_v9 = vpop.permute.xlu1 %4549 }
 0x6c2   : > { %6203 = vmatprep.subr.mxu0 %v6445_v0 }
 0x6c3   : > { %v4626_v62 = vpop.permute.xlu0 %4625 }
 0x6c4   : > { %6196 = vmatmul.mubr.msk.f32.vlgmr.msra.gmra.mxu0 %vm185_vm1, %v7152_v27 }
 0x6c5   : > { %6204 = vmatpush3.xpose.msk.msra.mxu0 %vm185_vm1, %v7156_v11  ;;  %6205 = vmatprep.mubr.msk.f32.mxu0 %vm6446_vm0, %v6445_v0 }
 0x6c6   : > { %6213 = vmatprep.subr.mxu0 %v6445_v0 }
 0x6c8   : > { %6206 = vmatmul.mubr.msk.f32.vlgmr.msra.gmra.mxu0 %vm185_vm1, %v4314_v21 }
 0x6c9   : > { %6214 = vmatpush3.xpose.msk.msra.mxu0 %vm185_vm1, %v4472_v12  ;;  %6215 = vmatprep.mubr.msk.f32.mxu0 %vm6446_vm0, %v6445_v0 }
 0x6ca   : > { %6223 = vmatprep.subr.mxu0 %v6445_v0 }
 0x6cc   : > { %6216 = vmatmul.mubr.msk.f32.vlgmr.msra.gmra.mxu0 %vm185_vm1, %v4470_v16 }
 0x6cd   : > { %6224 = vmatpush3.xpose.msk.msra.mxu0 %vm185_vm1, %v4628_v54  ;;  %6225 = vmatprep.mubr.msk.f32.mxu0 %vm6446_vm0, %v6445_v0 }
 0x6ce   : > { %6233 = vmatprep.subr.mxu0 %v6445_v0 }
 0x6d0   : > { %6226 = vmatmul.mubr.msk.f32.vlgmr.msra.gmra.mxu0 %vm185_vm1, %v4626_v62 }
 0x6d1   : > { %6235 = vmatprep.mubr.msk.f32.mxu0 %vm6446_vm0, %v6445_v0 }
 0x6f7   : > { %v3524_v7 = vpop.xlane.xlu1 %3523 }
 0x6f8   : > { %6387 = vrcp.f32 %v3524_v7 }
 0x6fb   : > { %v4548_v15 = vpop.permute.xlu1 %4547 }
 0x6ff   : > { %v4706_v1 = vpop.permute.xlu1 %4705 }
 0x705   : > { %v6388_v27 = vpop.eup %6387 }
 0x706   : > { %v3540_v11 = vmul.f32 %v6388_v27, %v7163_v34 }
 0x708   : > { %6191 = vmatmul.mubr.msk.f32.vlgmr.msra.gmra.mxu1 %vm885_vm4, %v3540_v11 }
 0x709   : > { %6199 = vmatpush3.xpose.msk.msra.mxu1 %vm185_vm1, %v7154_v28  ;;  %6200 = vmatprep.mubr.msk.f32.mxu1 %vm6446_vm0, %v6445_v0  ;;  %v4704_v28 = vpop.permute.xlu1 %4703 }
 0x70a   : > { %6208 = vmatprep.subr.mxu1 %v6445_v0 }
 0x70c   : > { %6201 = vmatmul.mubr.msk.f32.vlgmr.msra.gmra.mxu1 %vm185_vm1, %v7158_v29 }
 0x70d   : > { %6209 = vmatpush3.xpose.msk.msra.mxu1 %vm185_vm1, %v7183_v31  ;;  %6210 = vmatprep.mubr.msk.f32.mxu1 %vm6446_vm0, %v6445_v0 }
 0x70e   : > { %6218 = vmatprep.subr.mxu1 %v6445_v0 }
 0x710   : > { %6211 = vmatmul.mubr.msk.f32.vlgmr.msra.gmra.mxu1 %vm185_vm1, %v4392_v17 }
 0x711   : > { %6219 = vmatpush3.xpose.msk.msra.mxu1 %vm185_vm1, %v4550_v9  ;;  %6220 = vmatprep.mubr.msk.f32.mxu1 %vm6446_vm0, %v6445_v0 }
 0x712   : > { %6228 = vmatprep.subr.mxu1 %v6445_v0 }
 0x714   : > { %6221 = vmatmul.mubr.msk.f32.vlgmr.msra.gmra.mxu1 %vm185_vm1, %v4548_v15 }
 0x715   : > { %6229 = vmatpush3.xpose.msk.msra.mxu1 %vm185_vm1, %v4706_v1  ;;  %6230 = vmatprep.mubr.msk.f32.mxu1 %vm6446_vm0, %v6445_v0 }
 0x716   : > { %6238 = vmatprep.subr.mxu1 %v6445_v0 }
 0x718   : > { %6231 = vmatmul.mubr.msk.f32.vlgmr.msra.gmra.mxu1 %vm185_vm1, %v4704_v28 }
 0x719   : > { %6240 = vmatprep.mubr.msk.f32.mxu1 %vm6446_vm0, %v6445_v0 }
 0x72b   : > { %v7265_v29 = vpop.f32.mrf.mxu0 }
 0x72d   : > { %v6157_v4 = vpop.f32.mrf.mxu0 }
 0x730   : > { %v7267_v3 = vpop.f32.mrf.mxu0 }
 0x732   : > { %v6167_v5 = vpop.f32.mrf.mxu0 }
 0x773   : > { %v7269_v34 = vpop.f32.mrf.mxu1 }
 0x775   : > { %v6162_v44 = vpop.f32.mrf.mxu1 }
 0x777   : > { %v7271_v36 = vpop.f32.mrf.mxu1 }
 0x779   : > { %v6172_v2 = vpop.f32.mrf.mxu1 }
 0x77b   : > { %v7273_v19 = vpop.f32.mrf.mxu1 }
 0x77c   : > { %v7275_v33 = vpop.f32.mrf.mxu0 }
 0x77d   : > { %v6182_v31 = vpop.f32.mrf.mxu1 }
 0x77e   : > { %v6177_v23 = vpop.f32.mrf.mxu0 }
 0x780   : > { %v7277_v13 = vpop.f32.mrf.mxu0 }
 0x782   : > { %v6187_v41 = vpop.f32.mrf.mxu0 }
 0x784   : > { %v4231_v37 = vpop.f32.mrf.mxu0 }
 0x785   : > { %v4781_v56 = vsel %vm794_vm2, %v4231_v37, -inf }
 0x786   : > { %4782 = vmax.xlane.f32.xlu0 %v4781_v56  ;;  %v6197_v58 = vpop.f32.mrf.mxu0 }
 0x788   : > { %v4387_v55 = vpop.f32.mrf.mxu0 }
 0x789   : > { %v4787_v60 = vsel %vm794_vm2, %v4387_v55, -inf }
 0x78a   : > { %4788 = vmax.xlane.f32.xlu0 %v4787_v60  ;;  %v6207_v57 = vpop.f32.mrf.mxu0 }
 0x78c   : > { %v4543_v21 = vpop.f32.mrf.mxu0 }
 0x78d   : > { %v4793_v27 = vsel %vm794_vm2, %v4543_v21, -inf }
 0x78e   : > { %v6217_v8 = vpop.f32.mrf.mxu0 }
 0x790   : > { %v7281_v40 = vpop.f32.mrf.mxu0 }
 0x791   : > { %v4799_v15 = vsel %vm794_vm2, %v7281_v40, -inf }
 0x792   : > { %v6227_v61 = vpop.f32.mrf.mxu0 }
 0x7c8   : > { %v7283_v30 = vpop.f32.mrf.mxu1 }
 0x7ca   : > { %v6192_v12 = vpop.f32.mrf.mxu1 }
 0x7cc   : > { %v4309_v32 = vpop.f32.mrf.mxu1 }
 0x7cd   : > { %v4784_v14 = vsel %vm794_vm2, %v4309_v32, -inf }
 0x7ce   : > { %4785 = vmax.xlane.f32.xlu1 %v4784_v14  ;;  %v6202_v16 = vpop.f32.mrf.mxu1 }
 0x7d0   : > { %v4465_v54 = vpop.f32.mrf.mxu1 }
 0x7d1   : > { %v4790_v62 = vsel %vm794_vm2, %v4465_v54, -inf }
 0x7d2   : > { %v6212_v17 = vpop.f32.mrf.mxu1  ;;  %4791 = vmax.xlane.f32.xlu0 %v4790_v62 }
 0x7d4   : > { %v4621_v9 = vpop.f32.mrf.mxu1 }
 0x7d5   : > { %v4796_v7 = vsel %vm794_vm2, %v4621_v9, -inf }
 0x7d6   : > { %4797 = vmax.xlane.f32.xlu1 %v4796_v7  ;;  %v6222_v11 = vpop.f32.mrf.mxu1  ;;  %4794 = vmax.xlane.f32.xlu0 %v4793_v27 }
 0x7d8   : > { %v4777_v1 = vpop.f32.mrf.mxu1 }
 0x7d9   : > { %v4802_v28 = vsel %vm794_vm2, %v4777_v1, -inf }
 0x7da   : > { %4803 = vmax.xlane.f32.xlu1 %v4802_v28  ;;  %v6232_v4 = vpop.f32.mrf.mxu1  ;;  %4800 = vmax.xlane.f32.xlu0 %v4799_v15 }
 0x7eb   : > { %4946 = vrot.lane.b32.xlu1 %v7052_v47, %s6453_s25 }
 0x7ef   : > { %5023 = vrot.lane.b32.xlu1 %v7056_v48, %s6453_s25 }
 0x7f0   : > { %4869 = vrot.lane.b32.xlu0 %v7064_v50, %s6453_s25 }
 0x7f3   : > { %5100 = vrot.lane.b32.xlu1 %v7060_v49, %s6453_s25 }
 0x7f4   : > { %5177 = vrot.lane.b32.xlu0 %v7072_v52, %s6453_s25 }
 0x7f7   : > { %5254 = vrot.lane.b32.xlu1 %v7068_v51, %s6453_s25 }
 0x80f   : > { %v4783_v5 = vpop.xlane.xlu0 %4782 }
 0x810   : > { %v4805_v44 = vsub.f32 %v4231_v37, %v4783_v5 }
 0x812   : > { %v4813_v2 = vmul.f32 1.442695, %v4805_v44 }
 0x813   : > { %v4789_v31 = vpop.xlane.xlu0 %4788 }
 0x814   : > { %6389 = vpow2.f32 %v4813_v2  ;;  %v4807_v47 = vsub.f32 %v4387_v55, %v4789_v31 }
 0x816   : > { %v4817_v23 = vmul.f32 1.442695, %v4807_v47 }
 0x818   : > { %6391 = vpow2.f32 %v4817_v23 }
 0x821   : > { %v7304_v48 = vpop.eup %6389 }
 0x822   : > { %v4829_v50 = vsel %vm794_vm2, %v7304_v48, 0.0 }
 0x823   : > { %4830 = vadd.xlane.f32.xlu0 %v4829_v50 }
 0x825   : > { %v7308_v49 = vpop.eup %6391 }
 0x826   : > { %v4835_v52 = vsel %vm794_vm2, %v7308_v49, 0.0 }
 0x827   : > { %4836 = vadd.xlane.f32.xlu0 %v4835_v52 }
 0x857   : > { %v4786_v51 = vpop.xlane.xlu1 %4785 }
 0x858   : > { %v4806_v41 = vsub.f32 %v4309_v32, %v4786_v51 }
 0x85a   : > { %v4815_v37 = vmul.f32 1.442695, %v4806_v41 }
 0x85b   : > { %v4792_v56 = vpop.xlane.xlu0 %4791 }
 0x85c   : > { %6393 = vpow2.f32 %v4815_v37  ;;  %v4808_v58 = vsub.f32 %v4465_v54, %v4792_v56 }
 0x85e   : > { %v4819_v55 = vmul.f32 1.442695, %v4808_v58 }
 0x85f   : > { %v4798_v60 = vpop.xlane.xlu1 %4797  ;;  %v4795_v57 = vpop.xlane.xlu0 %4794 }
 0x860   : > { %6395 = vpow2.f32 %v4819_v55  ;;  %v4810_v8 = vsub.f32 %v4621_v9, %v4798_v60  ;;  %v4809_v61 = vsub.f32 %v4543_v21, %v4795_v57 }
 0x862   : > { %v4823_v12 = vmul.f32 1.442695, %v4810_v8  ;;  %v4821_v14 = vmul.f32 1.442695, %v4809_v61 }
 0x863   : > { %v4804_v16 = vpop.xlane.xlu1 %4803  ;;  %v4801_v62 = vpop.xlane.xlu0 %4800 }
 0x864   : > { %6397 = vpow2.f32 %v4823_v12  ;;  %v4812_v17 = vsub.f32 %v4777_v1, %v4804_v16  ;;  %v4811_v7 = vsub.f32 %v7281_v40, %v4801_v62 }
 0x865   : > { %6399 = vpow2.f32 %v4821_v14 }
 0x866   : > { %v4827_v32 = vmul.f32 1.442695, %v4812_v17  ;;  %v4825_v27 = vmul.f32 1.442695, %v4811_v7 }
 0x867   : > { %v4870_v11 = vpop.permute.xlu0 %4869  ;;  %v4947_v15 = vpop.permute.xlu1 %4946 }
 0x868   : > { %6401 = vpow2.f32 %v4827_v32  ;;  %6239 = vmatpush3.msk.msra.mxu1 %vm889_vm3, %v4947_v15  ;;  %6234 = vmatpush3.msk.msra.mxu0 %vm889_vm3, %v4870_v11 }
 0x869   : > { %v7315_v54 = vpop.eup %6393  ;;  %6403 = vpow2.f32 %v4825_v27  ;;  %6243 = vmatprep.subr.mxu0 %v6445_v0  ;;  %6248 = vmatprep.subr.mxu1 %v6445_v0 }
 0x86a   : > { %v4832_v21 = vsel %vm794_vm2, %v7315_v54, 0.0 }
 0x86b   : > { %4833 = vadd.xlane.f32.xlu1 %v4832_v21 }
 0x86d   : > { %v7321_v40 = vpop.eup %6395 }
 0x86e   : > { %v4838_v9 = vsel %vm794_vm2, %v7321_v40, 0.0 }
 0x86f   : > { %4839 = vadd.xlane.f32.xlu1 %v4838_v9 }
 0x871   : > { %v7325_v1 = vpop.eup %6397 }
 0x872   : > { %v7327_v28 = vpop.eup %6399  ;;  %v4844_v4 = vsel %vm794_vm2, %v7325_v1, 0.0 }
 0x873   : > { %4845 = vadd.xlane.f32.xlu1 %v4844_v4  ;;  %v4841_v5 = vsel %vm794_vm2, %v7327_v28, 0.0 }
 0x874   : > { %4842 = vadd.xlane.f32.xlu0 %v4841_v5 }
 0x875   : > { %v7333_v44 = vpop.eup %6401 }
 0x876   : > { %v7335_v2 = vpop.eup %6403  ;;  %v4850_v31 = vsel %vm794_vm2, %v7333_v44, 0.0 }
 0x877   : > { %4851 = vadd.xlane.f32.xlu1 %v4850_v31  ;;  %v4847_v47 = vsel %vm794_vm2, %v7335_v2, 0.0 }
 0x878   : > { %4848 = vadd.xlane.f32.xlu0 %v4847_v47 }
 0x888   : > { %5408 = vrot.lane.b32.xlu1 %v7076_v53, %s6453_s25 }
 0x88c   : > { %5495 = vrot.lane.b32.xlu1 %v7021_v20, %s6454_s26 }
 0x88e   : > { %5331 = vrot.lane.b32.xlu0 %v7080_v6, %s6453_s25 }
 0x890   : > { %5499 = vrot.lane.b32.xlu1 %v7023_v22, %s6454_s26 }
 0x892   : > { %5493 = vrot.lane.b32.xlu0 %v7017_v63, %s6454_s26  ;;  %v5178_v63 = vpop.permute.xlu0 %5177 }
 0x894   : > { %5503 = vrot.lane.b32.xlu1 %v7025_v24, %s6454_s26 }
 0x896   : > { %5497 = vrot.lane.b32.xlu0 %v7019_v18, %s6454_s26 }
 0x898   : > { %5507 = vrot.lane.b32.xlu1 %v7037_v25, %s6454_s26 }
 0x89a   : > { %5501 = vrot.lane.b32.xlu0 %v7027_v26, %s6454_s26  ;;  %v5024_v26 = vpop.permute.xlu1 %5023 }
 0x89c   : > { %5527 = vrot.lane.b32.xlu1 %v7269_v34, %s6455_s27 }
 0x89e   : > { %5505 = vrot.lane.b32.xlu0 %v7029_v10, %s6454_s26  ;;  %v5101_v53 = vpop.permute.xlu1 %5100 }
 0x8a0   : > { %5531 = vrot.lane.b32.xlu1 %v7271_v36, %s6455_s27 }
 0x8a2   : > { %5525 = vrot.lane.b32.xlu0 %v7265_v29, %s6455_s27  ;;  %v5255_v6 = vpop.permute.xlu1 %5254 }
 0x8a4   : > { %5535 = vrot.lane.b32.xlu1 %v7273_v19, %s6455_s27 }
 0x8a6   : > { %5529 = vrot.lane.b32.xlu0 %v7267_v3, %s6455_s27 }
 0x8a8   : > { %5539 = vrot.lane.b32.xlu1 %v7283_v30, %s6455_s27 }
 0x8aa   : > { %5533 = vrot.lane.b32.xlu0 %v7275_v33, %s6455_s27 }
 0x8ac   : > { %v4831_v18 = vpop.xlane.xlu0 %4830 }
 0x8ad   : > { %6405 = vrcp.f32 %v4831_v18 }
 0x8ae   : > { %5537 = vrot.lane.b32.xlu0 %v7277_v13, %s6455_s27 }
 0x8b0   : > { %v4837_v20 = vpop.xlane.xlu0 %4836 }
 0x8b1   : > { %6407 = vrcp.f32 %v4837_v20 }
 0x8ba   : > { %v6406_v22 = vpop.eup %6405 }
 0x8bb   : > { %v4861_v24 = vmul.f32 %v6406_v22, %v7304_v48 }
 0x8bd   : > { %6236 = vmatmul.mubr.msk.f32.vlgmr.msra.gmra.mxu0 %vm885_vm4, %v4861_v24 }
 0x8be   : > { %v6408_v10 = vpop.eup %6407  ;;  %6244 = vmatpush3.msk.msra.mxu0 %vm889_vm3, %v5024_v26  ;;  %6245 = vmatprep.mubr.msk.f32.mxu0 %vm6446_vm0, %v6445_v0 }
 0x8bf   : > { %6253 = vmatprep.subr.mxu0 %v6445_v0  ;;  %v4863_v25 = vmul.f32 %v6408_v10, %v7308_v49 }
 0x8c1   : > { %6246 = vmatmul.mubr.msk.f32.vlgmr.msra.gmra.mxu0 %vm885_vm4, %v4863_v25 }
 0x8c2   : > { %6254 = vmatpush3.msk.msra.mxu0 %vm889_vm3, %v5178_v63  ;;  %6255 = vmatprep.mubr.msk.f32.mxu0 %vm6446_vm0, %v6445_v0 }
 0x8c3   : > { %6263 = vmatprep.subr.mxu0 %v6445_v0 }
 0x8f4   : > { %v4834_v29 = vpop.xlane.xlu1 %4833 }
 0x8f5   : > { %6409 = vrcp.f32 %v4834_v29 }
 0x8f8   : > { %v4840_v3 = vpop.xlane.xlu1 %4839 }
 0x8f9   : > { %6411 = vrcp.f32 %v4840_v3 }
 0x8fc   : > { %v4846_v34 = vpop.xlane.xlu1 %4845 }
 0x8fd   : > { %6413 = vrcp.f32 %v4846_v34  ;;  %v4843_v36 = vpop.xlane.xlu0 %4842 }
 0x8fe   : > { %6415 = vrcp.f32 %v4843_v36 }
 0x900   : > { %v4852_v19 = vpop.xlane.xlu1 %4851 }
 0x901   : > { %6417 = vrcp.f32 %v4852_v19  ;;  %v4849_v33 = vpop.xlane.xlu0 %4848 }
 0x902   : > { %v6410_v13 = vpop.eup %6409  ;;  %6419 = vrcp.f32 %v4849_v33 }
 0x903   : > { %v4862_v30 = vmul.f32 %v6410_v13, %v7315_v54 }
 0x904   : > { %v5409_v56 = vpop.permute.xlu1 %5408 }
 0x905   : > { %v5332_v23 = vpop.permute.xlu0 %5331  ;;  %6241 = vmatmul.mubr.msk.f32.vlgmr.msra.gmra.mxu1 %vm885_vm4, %v4862_v30 }
 0x906   : > { %v6412_v48 = vpop.eup %6411  ;;  %6249 = vmatpush3.msk.msra.mxu1 %vm889_vm3, %v5101_v53  ;;  %6250 = vmatprep.mubr.msk.f32.mxu1 %vm6446_vm0, %v6445_v0 }
 0x907   : > { %6258 = vmatprep.subr.mxu1 %v6445_v0  ;;  %v4864_v50 = vmul.f32 %v6412_v48, %v7321_v40 }
 0x908   : > { %v5496_v25 = vpop.permute.xlu1 %5495 }
 0x909   : > { %v5494_v49 = vpop.permute.xlu0 %5493  ;;  %6251 = vmatmul.mubr.msk.f32.vlgmr.msra.gmra.mxu1 %vm885_vm4, %v4864_v50 }
 0x90a   : > { %v6414_v52 = vpop.eup %6413  ;;  %6259 = vmatpush3.msk.msra.mxu1 %vm889_vm3, %v5255_v6  ;;  %6260 = vmatprep.mubr.msk.f32.mxu1 %vm6446_vm0, %v6445_v0  ;;  %v5581_v63 = vsel %vm185_vm1, %v6797_v35, %v5494_v49 }
 0x90b   : > { %v6416_v51 = vpop.eup %6415  ;;  %v4866_v41 = vmul.f32 %v6414_v52, %v7325_v1  ;;  %6268 = vmatprep.subr.mxu1 %v6445_v0 }
 0x90c   : > { %v4865_v37 = vmul.f32 %v6416_v51, %v7327_v28  ;;  %v5500_v53 = vpop.permute.xlu1 %5499 }
 0x90d   : > { %v5498_v58 = vpop.permute.xlu0 %5497  ;;  %6261 = vmatmul.mubr.msk.f32.vlgmr.msra.gmra.mxu1 %vm885_vm4, %v4866_v41 }
 0x90e   : > { %v6418_v55 = vpop.eup %6417  ;;  %6256 = vmatmul.mubr.msk.f32.vlgmr.msra.gmra.mxu0 %vm885_vm4, %v4865_v37  ;;  %6269 = vmatpush3.msk.msra.mxu1 %vm889_vm3, %v5409_v56  ;;  %v5583_v24 = vsel %vm185_vm1, %v6801_v39, %v5498_v58  ;;  %v5582_v39 = vsel %vm185_vm1, %v6799_v38, %v5496_v25 }
 0x90f   : > { %v6420_v60 = vpop.eup %6419  ;;  %6264 = vmatpush3.msk.msra.mxu0 %vm889_vm3, %v5332_v23  ;;  %6270 = vmatprep.mubr.msk.f32.mxu1 %vm6446_vm0, %v6445_v0  ;;  %v4868_v57 = vmul.f32 %v6418_v55, %v7333_v44  ;;  %v5584_v23 = vsel %vm185_vm1, %v6803_v42, %v5500_v53 }
 0x910   : > { %6265 = vmatprep.mubr.msk.f32.mxu0 %vm6446_vm0, %v6445_v0  ;;  %v4867_v8 = vmul.f32 %v6420_v60, %v7335_v2  ;;  %v5504_v6 = vpop.permute.xlu1 %5503 }
 0x911   : > { %v5502_v61 = vpop.permute.xlu0 %5501  ;;  %6271 = vmatmul.mubr.msk.f32.vlgmr.msra.gmra.mxu1 %vm885_vm4, %v4868_v57  ;;  %v5586_v38 = vsel %vm185_vm1, %v6807_v45, %v5504_v6 }
 0x912   : > { %6266 = vmatmul.mubr.msk.f32.vlgmr.msra.gmra.mxu0 %vm885_vm4, %v4867_v8  ;;  %v5585_v62 = vsel %vm185_vm1, %v6805_v43, %v5502_v61 }
 0x914   : > { %v5508_v29 = vpop.permute.xlu1 %5507 }
 0x915   : > { %v5506_v12 = vpop.permute.xlu0 %5505  ;;  %v5588_v56 = vsel %vm185_vm1, %v6817_v59, %v5508_v29 }
 0x916   : > { %v5587_v0 = vsel %vm185_vm1, %v6809_v46, %v5506_v12 }
 0x918   : > { %v5528_v3 = vpop.permute.xlu1 %5527 }
 0x919   : > { %v5526_v14 = vpop.permute.xlu0 %5525  ;;  %v5591_v33 = vsel %vm5589_vm5, %v5582_v39, %v5528_v3 }
 0x91a   : > { %v5590_v18 = vsel %vm5589_vm5, %v5581_v63, %v5526_v14 }
 0x91c   : > { %v5532_v34 = vpop.permute.xlu1 %5531 }
 0x91d   : > { %v5530_v16 = vpop.permute.xlu0 %5529  ;;  %v5593_v48 = vsel %vm5589_vm5, %v5584_v23, %v5532_v34 }
 0x91e   : > { %v5592_v35 = vsel %vm5589_vm5, %v5583_v24, %v5530_v16 }
 0x920   : > { %v5536_v36 = vpop.permute.xlu1 %5535 }
 0x921   : > { %v5534_v17 = vpop.permute.xlu0 %5533  ;;  %v5595_v52 = vsel %vm5589_vm5, %v5586_v38, %v5536_v36 }
 0x922   : > { %v7402_v7 = vsel %vm5589_vm5, %v5585_v62, %v5534_v17 }
 0x924   : > { %v5540_v19 = vpop.permute.xlu1 %5539 }
 0x925   : > { %v5538_v32 = vpop.permute.xlu0 %5537  ;;  %v5597_v58 = vsel %vm5589_vm5, %v5588_v56, %v5540_v19 }
 0x926   : > { %v7407_v27 = vsel %vm5589_vm5, %v5587_v0, %v5538_v32 }
 0x97d   : > { %v4942_v11 = vpop.f32.mrf.mxu0 }
 0x97e   : > { %5557 = vrot.lane.b32.xlu0 %v4942_v11, %s6456_s28 }
 0x97f   : > { %v6237_v15 = vpop.f32.mrf.mxu0 }
 0x981   : > { %v5096_v54 = vpop.f32.mrf.mxu0 }
 0x982   : > { %5561 = vrot.lane.b32.xlu0 %v5096_v54, %s6456_s28 }
 0x983   : > { %v6247_v21 = vpop.f32.mrf.mxu0 }
 0x9c5   : > { %v5019_v43 = vpop.f32.mrf.mxu1 }
 0x9c6   : > { %5559 = vrot.lane.b32.xlu1 %v5019_v43, %s6456_s28 }
 0x9c7   : > { %v6242_v40 = vpop.f32.mrf.mxu1 }
 0x9c9   : > { %v5173_v9 = vpop.f32.mrf.mxu1 }
 0x9ca   : > { %5563 = vrot.lane.b32.xlu1 %v5173_v9, %s6456_s28 }
 0x9cb   : > { %v6252_v1 = vpop.f32.mrf.mxu1 }
 0x9cd   : > { %v5327_v28 = vpop.f32.mrf.mxu1 }
 0x9ce   : > { %v5250_v46 = vpop.f32.mrf.mxu0  ;;  %5567 = vrot.lane.b32.xlu1 %v5327_v28, %s6456_s28 }
 0x9cf   : > { %5565 = vrot.lane.b32.xlu0 %v5250_v46, %s6456_s28  ;;  %v6262_v4 = vpop.f32.mrf.mxu1 }
 0x9d0   : > { %v6257_v5 = vpop.f32.mrf.mxu0 }
 0x9d1   : > { %v5481_v44 = vpop.f32.mrf.mxu1 }
 0x9d2   : > { %v5404_v2 = vpop.f32.mrf.mxu0  ;;  %5571 = vrot.lane.b32.xlu1 %v5481_v44, %s6456_s28 }
 0x9d3   : > { %5569 = vrot.lane.b32.xlu0 %v5404_v2, %s6456_s28  ;;  %v6272_v31 = vpop.f32.mrf.mxu1 }
 0x9d4   : > { %v6267_v47 = vpop.f32.mrf.mxu0 }
 0x9f0   : > { %v5558_v20 = vpop.permute.xlu0 %5557 }
 0x9f1   : > { %v5599_v22 = vsel %vm5598_vm6, %v5590_v18, %v5558_v20 }
 0x9f2   : > { %5608 = vst.msk [vmem:[%s7415_s3] sm:$0xf] %vm5607_vm7, %v5599_v22 }
 0x9f4   : > { %v5562_v26 = vpop.permute.xlu0 %5561 }
 0x9f5   : > { %v5601_v10 = vsel %vm5598_vm6, %v5592_v35, %v5562_v26 }
 0x9f6   : > { %5610 = vst.msk [vmem:[%s7415_s3 + $0x8] sm:$0xf] %vm5607_vm7, %v5601_v10 }
 0xa38   : > { %v5560_v13 = vpop.permute.xlu1 %5559 }
 0xa39   : > { %v5600_v30 = vsel %vm5598_vm6, %v5591_v33, %v5560_v13 }
 0xa3a   : > { %5609 = vst.msk [vmem:[%s7415_s3 + $0x4] sm:$0xf] %vm5607_vm7, %v5600_v30 }
 0xa3c   : > { %v5564_v50 = vpop.permute.xlu1 %5563 }
 0xa3d   : > { %v5602_v49 = vsel %vm5598_vm6, %v5593_v48, %v5564_v50 }
 0xa3e   : > { %5611 = vst.msk [vmem:[%s7415_s3 + $0xc] sm:$0xf] %vm5607_vm7, %v5602_v49 }
 0xa40   : > { %v5568_v51 = vpop.permute.xlu1 %5567 }
 0xa41   : > { %v5604_v41 = vsel %vm5598_vm6, %v5595_v52, %v5568_v51  ;;  %v5566_v37 = vpop.permute.xlu0 %5565 }
 0xa42   : > { %5613 = vst.msk [vmem:[%s7415_s3 + $0x14] sm:$0xf] %vm5607_vm7, %v5604_v41  ;;  %v5603_v42 = vsel %vm5598_vm6, %v7402_v7, %v5566_v37 }
 0xa43   : > { %5612 = vst.msk [vmem:[%s7415_s3 + $0x10] sm:$0xf] %vm5607_vm7, %v5603_v42 }
 0xa44   : > { %v5572_v55 = vpop.permute.xlu1 %5571 }
 0xa45   : > { %v5606_v45 = vsel %vm5598_vm6, %v5597_v58, %v5572_v55  ;;  %v5570_v60 = vpop.permute.xlu0 %5569 }
 0xa46   : > { %5615 = vst.msk [vmem:[%s7415_s3 + $0x1c] sm:$0xf] %vm5607_vm7, %v5606_v45  ;;  %v5605_v57 = vsel %vm5598_vm6, %v7407_v27, %v5570_v60 }
 0xa47   : > { %5614 = vst.msk [vmem:[%s7415_s3 + $0x18] sm:$0xf] %vm5607_vm7, %v5605_v57 }
 0xa48 PF: > { %s12_s9 = sadd.s32 1, %s6443_s9  }
 0xa49   : > { %p9_p4 = scmp.ge.s32.totalorder %s12_s9, 4  }
 0xa4b   :  { %11 = sbr.rel (!%p9_p4) target bundleno = 1 (0x1), region = 61 }

// kernel: stt_layer.19
= control target key start
LH: loop header
LB: loop body
LE: loop exit
PB: predicated region body
PF: predicated region fallthrough
CT: control target
= control target key end

     0   :  { %vm27_vm0 = vcmask 64512   ;;  %v6127_v0 = vmov 0.0   ;;  %vm6128_vm1 = vmmov 0   ;;  %s6129_s13 = smov 96   ;;  %s6130_s14 = smov 120   ;;  %vm5396_vm2 = vcmask 130048   ;;  %s7155_s1 = inlined_call_operand.vmem [shape: f32[8,8,64], index: 1, kind: input, shape index: {}]   ;;  %s7156_s0 = inlined_call_operand.vmem [shape: f32[8,8,32], index: 0, kind: input, shape index: {}]   ;;  %s7157_s2 = inlined_call_operand.vmem [shape: f32[8,8,32], index: 2, kind: output, shape index: {}]  }
   0x1   :  { %5651 = vmatprep.subr.mxu0 %v6127_v0  ;;  %v6158_v1 = vld [vmem:[%s7155_s1] sm:$0xff]  ;;  %5653 = vmatprep.mubr.msk.f32.mxu0 %vm6128_vm1, %v6127_v0  ;;  %v6165_v2 = vld [vmem:[%s7155_s1 + $0x8] sm:$0xff]  ;;  %v6181_v4 = vld [vmem:[%s7155_s1 + $0x10] sm:$0xff]  ;;  %s6131_s15 = smov 88   ;;  %s6132_s16 = smov 112   ;;  %vm5405_vm3 = vcmask 195584  }
   0x2   :  { %5652 = vmatpush3.xpose.msk.msra.mxu0 %vm27_vm0, %v6158_v1  ;;  %5656 = vmatprep.subr.mxu1 %v6127_v0  ;;  %v6173_v3 = vld [vmem:[%s7156_s0] sm:$0xff]  ;;  %v6186_v5 = vld [vmem:[%s7156_s0 + $0x8] sm:$0xff]  ;;  %v6194_v6 = vld [vmem:[%s7155_s1 + $0x18] sm:$0xff]  ;;  %s6133_s19 = smov 80   ;;  %s6134_s6 = smov 104   ;;  %vm5414_vm4 = vcmask 261120  }
   0x3   :  { %5657 = vmatpush3.xpose.msk.msra.mxu1 %vm27_vm0, %v6165_v2  ;;  %5661 = vmatprep.subr.mxu0 %v6127_v0  ;;  %v6205_v7 = vld [vmem:[%s7156_s0 + $0x10] sm:$0xff]  ;;  %v6214_v8 = vld [vmem:[%s7155_s1 + $0x20] sm:$0xff]  ;;  %v6219_v9 = vld [vmem:[%s7156_s0 + $0x18] sm:$0xff]  ;;  %s6136_s22 = smov 8   ;;  %s6137_s23 = smov 16  }
   0x4   :  { %5658 = vmatprep.mubr.msk.f32.mxu1 %vm6128_vm1, %v6127_v0  ;;  %5666 = vmatprep.subr.mxu1 %v6127_v0  ;;  %v6227_v10 = vld [vmem:[%s7155_s1 + $0x28] sm:$0xff]  ;;  %v6239_v11 = vld [vmem:[%s7156_s0 + $0x20] sm:$0xff]  ;;  %v6248_v12 = vld [vmem:[%s7155_s1 + $0x30] sm:$0xff]  ;;  %s6138_s24 = smov 24  }
   0x5   :  { %5654 = vmatmul.mubr.msk.f32.vlgmr.msra.gmra.mxu0 %vm27_vm0, %v6173_v3  ;;  %v6253_v13 = vld [vmem:[%s7156_s0 + $0x28] sm:$0xff]  ;;  %v6261_v14 = vld [vmem:[%s7155_s1 + $0x38] sm:$0xff]  ;;  %v6273_v15 = vld [vmem:[%s7156_s0 + $0x30] sm:$0xff] }
   0x6   :  { %5662 = vmatpush3.xpose.msk.msra.mxu0 %vm27_vm0, %v6181_v4  ;;  %5659 = vmatmul.mubr.msk.f32.vlgmr.msra.gmra.mxu1 %vm27_vm0, %v6186_v5  ;;  %v6282_v16 = vld [vmem:[%s7156_s0 + $0x38] sm:$0xff] }
   0x7   :  { %5663 = vmatprep.mubr.msk.f32.mxu0 %vm6128_vm1, %v6127_v0  ;;  %5667 = vmatpush3.xpose.msk.msra.mxu1 %vm27_vm0, %v6194_v6 }
   0x8   :  { %5671 = vmatprep.subr.mxu0 %v6127_v0  ;;  %5668 = vmatprep.mubr.msk.f32.mxu1 %vm6128_vm1, %v6127_v0 }
   0x9   :  { %5664 = vmatmul.mubr.msk.f32.vlgmr.msra.gmra.mxu0 %vm27_vm0, %v6205_v7  ;;  %5676 = vmatprep.subr.mxu1 %v6127_v0 }
   0xa   :  { %5672 = vmatpush3.xpose.msk.msra.mxu0 %vm27_vm0, %v6214_v8  ;;  %5669 = vmatmul.mubr.msk.f32.vlgmr.msra.gmra.mxu1 %vm27_vm0, %v6219_v9 }
   0xb   :  { %5673 = vmatprep.mubr.msk.f32.mxu0 %vm6128_vm1, %v6127_v0  ;;  %5677 = vmatpush3.xpose.msk.msra.mxu1 %vm27_vm0, %v6227_v10 }
   0xc   :  { %5681 = vmatprep.subr.mxu0 %v6127_v0  ;;  %5678 = vmatprep.mubr.msk.f32.mxu1 %vm6128_vm1, %v6127_v0 }
   0xd   :  { %5674 = vmatmul.mubr.msk.f32.vlgmr.msra.gmra.mxu0 %vm27_vm0, %v6239_v11  ;;  %5686 = vmatprep.subr.mxu1 %v6127_v0 }
   0xe   :  { %5682 = vmatpush3.xpose.msk.msra.mxu0 %vm27_vm0, %v6248_v12  ;;  %5679 = vmatmul.mubr.msk.f32.vlgmr.msra.gmra.mxu1 %vm27_vm0, %v6253_v13 }
   0xf   :  { %5683 = vmatprep.mubr.msk.f32.mxu0 %vm6128_vm1, %v6127_v0  ;;  %5687 = vmatpush3.xpose.msk.msra.mxu1 %vm27_vm0, %v6261_v14 }
  0x10   :  { %5688 = vmatprep.mubr.msk.f32.mxu1 %vm6128_vm1, %v6127_v0  ;;  %5696 = vmatprep.subr.mxu1 %v6127_v0 }
  0x11   :  { %5684 = vmatmul.mubr.msk.f32.vlgmr.msra.gmra.mxu0 %vm27_vm0, %v6273_v15  ;;  %5691 = vmatprep.subr.mxu0 %v6127_v0 }
  0x12   :  { %5689 = vmatmul.mubr.msk.f32.vlgmr.msra.gmra.mxu1 %vm27_vm0, %v6282_v16  ;;  %5693 = vmatprep.mubr.msk.f32.mxu0 %vm6128_vm1, %v6127_v0 }
  0x13   :  { %5698 = vmatprep.mubr.msk.f32.mxu1 %vm6128_vm1, %v6127_v0 }
  0xc5   :  { %v100_v17 = vpop.f32.mrf.mxu0 }
  0xc6   :  { %v636_v18 = vsel %vm27_vm0, %v100_v17, -inf  ;;  %v176_v19 = vpop.f32.mrf.mxu1 }
  0xc7   :  { %637 = vmax.xlane.f32.xlu0 %v636_v18  ;;  %v5655_v20 = vpop.f32.mrf.mxu0  ;;  %v639_v22 = vsel %vm27_vm0, %v176_v19, -inf }
  0xc8   :  { %v5660_v21 = vpop.f32.mrf.mxu1 }
  0xc9   :  { %v252_v23 = vpop.f32.mrf.mxu0 }
  0xca   :  { %v642_v24 = vsel %vm27_vm0, %v252_v23, -inf  ;;  %v328_v25 = vpop.f32.mrf.mxu1 }
  0xcb   :  { %640 = vmax.xlane.f32.xlu0 %v639_v22  ;;  %643 = vmax.xlane.f32.xlu1 %v642_v24  ;;  %v5665_v26 = vpop.f32.mrf.mxu0  ;;  %v645_v28 = vsel %vm27_vm0, %v328_v25, -inf }
  0xcc   :  { %v5670_v27 = vpop.f32.mrf.mxu1 }
  0xcd   :  { %v404_v29 = vpop.f32.mrf.mxu0 }
  0xce   :  { %v648_v30 = vsel %vm27_vm0, %v404_v29, -inf  ;;  %v480_v31 = vpop.f32.mrf.mxu1 }
  0xcf   :  { %646 = vmax.xlane.f32.xlu1 %v645_v28  ;;  %649 = vmax.xlane.f32.xlu0 %v648_v30  ;;  %v5675_v32 = vpop.f32.mrf.mxu0  ;;  %v651_v34 = vsel %vm27_vm0, %v480_v31, -inf }
  0xd0   :  { %v5680_v33 = vpop.f32.mrf.mxu1 }
  0xd1   :  { %v556_v35 = vpop.f32.mrf.mxu0 }
  0xd2   :  { %v654_v36 = vsel %vm27_vm0, %v556_v35, -inf  ;;  %v6303_v37 = vpop.f32.mrf.mxu1 }
  0xd3   :  { %652 = vmax.xlane.f32.xlu1 %v651_v34  ;;  %655 = vmax.xlane.f32.xlu0 %v654_v36  ;;  %v5685_v38 = vpop.f32.mrf.mxu0  ;;  %v657_v40 = vsel %vm27_vm0, %v6303_v37, -inf }
  0xd4   :  { %v5690_v39 = vpop.f32.mrf.mxu1 }
  0xe4   :  { %800 = vrot.lane.b32.xlu1 %v6165_v2, %s6129_s13 }
  0xe8   :  { %876 = vrot.lane.b32.xlu1 %v6181_v4, %s6129_s13 }
  0xe9   :  { %724 = vrot.lane.b32.xlu0 %v6158_v1, %s6129_s13 }
  0xec   :  { %952 = vrot.lane.b32.xlu1 %v6194_v6, %s6129_s13 }
  0xed   :  { %1028 = vrot.lane.b32.xlu0 %v6214_v8, %s6129_s13 }
  0xf0   :  { %1104 = vrot.lane.b32.xlu1 %v6227_v10, %s6129_s13 }
  0xf1   :  { %1180 = vrot.lane.b32.xlu0 %v6248_v12, %s6129_s13 }
  0xf4   :  { %1256 = vrot.lane.b32.xlu1 %v6261_v14, %s6129_s13 }
  0xf5   :  { %1334 = vrot.lane.b32.xlu0 %v6158_v1, %s6130_s14 }
  0xf8   :  { %1412 = vrot.lane.b32.xlu1 %v6165_v2, %s6130_s14 }
  0xf9   :  { %1332 = vrot.lane.b32.xlu0 %v6173_v3, %s6130_s14 }
  0xfc   :  { %1410 = vrot.lane.b32.xlu1 %v6186_v5, %s6130_s14 }
  0xfd   :  { %1490 = vrot.lane.b32.xlu0 %v6181_v4, %s6130_s14 }
 0x120   :  { %658 = vmax.xlane.f32.xlu1 %v657_v40 }
 0x131   :  { %1568 = vrot.lane.b32.xlu1 %v6194_v6, %s6130_s14 }
 0x150   :  { %v638_v41 = vpop.xlane.xlu0 %637 }
 0x151   :  { %v660_v42 = vsub.f32 %v100_v17, %v638_v41 }
 0x153   :  { %v668_v43 = vmul.f32 1.442695, %v660_v42 }
 0x154   :  { %v641_v44 = vpop.xlane.xlu0 %640  ;;  %v644_v45 = vpop.xlane.xlu1 %643 }
 0x155   :  { %5983 = vpow2.f32 %v668_v43  ;;  %v661_v46 = vsub.f32 %v176_v19, %v641_v44  ;;  %v662_v47 = vsub.f32 %v252_v23, %v644_v45 }
 0x157   :  { %v670_v48 = vmul.f32 1.442695, %v661_v46  ;;  %v672_v49 = vmul.f32 1.442695, %v662_v47 }
 0x158   :  { %v647_v50 = vpop.xlane.xlu1 %646  ;;  %v650_v51 = vpop.xlane.xlu0 %649 }
 0x159   :  { %5985 = vpow2.f32 %v670_v48  ;;  %v663_v52 = vsub.f32 %v328_v25, %v647_v50  ;;  %v664_v53 = vsub.f32 %v404_v29, %v650_v51 }
 0x15a   :  { %5987 = vpow2.f32 %v672_v49 }
 0x15b   :  { %v674_v54 = vmul.f32 1.442695, %v663_v52  ;;  %v676_v55 = vmul.f32 1.442695, %v664_v53 }
 0x15c   :  { %v653_v56 = vpop.xlane.xlu1 %652  ;;  %v656_v57 = vpop.xlane.xlu0 %655 }
 0x15d   :  { %5989 = vpow2.f32 %v674_v54  ;;  %v665_v58 = vsub.f32 %v480_v31, %v653_v56  ;;  %v666_v59 = vsub.f32 %v556_v35, %v656_v57 }
 0x15e   :  { %5991 = vpow2.f32 %v676_v55 }
 0x15f   :  { %v678_v60 = vmul.f32 1.442695, %v665_v58  ;;  %v680_v61 = vmul.f32 1.442695, %v666_v59 }
 0x160   :  { %v801_v62 = vpop.permute.xlu1 %800  ;;  %v725_v63 = vpop.permute.xlu0 %724 }
 0x161   :  { %5993 = vpow2.f32 %v678_v60  ;;  %5697 = vmatpush3.msra.mxu1 %v801_v62  ;;  %5692 = vmatpush3.msra.mxu0 %v725_v63 }
 0x162   :  { %v6327_v17 = vpop.eup %5983  ;;  %5995 = vpow2.f32 %v680_v61  ;;  %5701 = vmatprep.subr.mxu0 %v6127_v0  ;;  %5706 = vmatprep.subr.mxu1 %v6127_v0 }
 0x163   :  { %v684_v18 = vsel %vm27_vm0, %v6327_v17, 0.0 }
 0x164   :  { %685 = vadd.xlane.f32.xlu0 %v684_v18  ;;  %v877_v31 = vpop.permute.xlu1 %876  ;;  %v1029_v43 = vpop.permute.xlu0 %1028 }
 0x166   :  { %v6333_v19 = vpop.eup %5985 }
 0x167   :  { %v6335_v20 = vpop.eup %5987  ;;  %v687_v21 = vsel %vm27_vm0, %v6333_v19, 0.0 }
 0x168   :  { %688 = vadd.xlane.f32.xlu1 %v687_v21  ;;  %v690_v22 = vsel %vm27_vm0, %v6335_v20, 0.0  ;;  %v953_v32 = vpop.permute.xlu1 %952  ;;  %v1181_v44 = vpop.permute.xlu0 %1180 }
 0x169   :  { %691 = vadd.xlane.f32.xlu0 %v690_v22 }
 0x16a   :  { %v6341_v23 = vpop.eup %5989 }
 0x16b   :  { %v6343_v24 = vpop.eup %5991  ;;  %v693_v25 = vsel %vm27_vm0, %v6341_v23, 0.0 }
 0x16c   :  { %694 = vadd.xlane.f32.xlu1 %v693_v25  ;;  %v696_v26 = vsel %vm27_vm0, %v6343_v24, 0.0  ;;  %v6367_v33 = vpop.permute.xlu1 %1104 }
 0x16d   :  { %697 = vadd.xlane.f32.xlu0 %v696_v26 }
 0x16e   :  { %v6349_v27 = vpop.eup %5993 }
 0x16f   :  { %v6351_v28 = vpop.eup %5995  ;;  %v699_v29 = vsel %vm27_vm0, %v6349_v27, 0.0 }
 0x170   :  { %700 = vadd.xlane.f32.xlu1 %v699_v29  ;;  %v702_v30 = vsel %vm27_vm0, %v6351_v28, 0.0  ;;  %v6373_v34 = vpop.permute.xlu1 %1256 }
 0x171   :  { %703 = vadd.xlane.f32.xlu0 %v702_v30 }
 0x174   :  { %v6375_v35 = vpop.permute.xlu1 %1412 }
 0x178   :  { %v6377_v36 = vpop.permute.xlu1 %1410 }
 0x181   :  { %1566 = vrot.lane.b32.xlu1 %v6219_v9, %s6130_s14 }
 0x185   :  { %1724 = vrot.lane.b32.xlu1 %v6227_v10, %s6130_s14 }
 0x187   :  { %1488 = vrot.lane.b32.xlu0 %v6205_v7, %s6130_s14 }
 0x18b   :  { %1646 = vrot.lane.b32.xlu0 %v6214_v8, %s6130_s14 }
 0x18f   :  { %1644 = vrot.lane.b32.xlu0 %v6239_v11, %s6130_s14 }
 0x193   :  { %1802 = vrot.lane.b32.xlu0 %v6248_v12, %s6130_s14 }
 0x197   :  { %1800 = vrot.lane.b32.xlu0 %v6273_v15, %s6130_s14 }
 0x1a9   :  { %v659_v38 = vpop.xlane.xlu1 %658 }
 0x1aa   :  { %v667_v39 = vsub.f32 %v6303_v37, %v659_v38  ;;  %v1335_v37 = vpop.permute.xlu0 %1334 }
 0x1ac   :  { %v682_v40 = vmul.f32 1.442695, %v667_v39 }
 0x1ad   :  { %v6390_v47 = vpop.permute.xlu1 %1568 }
 0x1ae   :  { %5997 = vpow2.f32 %v682_v40  ;;  %v1333_v45 = vpop.permute.xlu0 %1332 }
 0x1b2   :  { %v1491_v46 = vpop.permute.xlu0 %1490 }
 0x1bb   :  { %v6380_v41 = vpop.eup %5997 }
 0x1bc   :  { %v705_v42 = vsel %vm27_vm0, %v6380_v41, 0.0 }
 0x1bd   :  { %706 = vadd.xlane.f32.xlu1 %v705_v42 }
 0x1ce   :  { %1722 = vrot.lane.b32.xlu1 %v6253_v13, %s6130_s14 }
 0x1d2   :  { %1880 = vrot.lane.b32.xlu1 %v6261_v14, %s6130_s14 }
 0x1d6   :  { %1878 = vrot.lane.b32.xlu1 %v6282_v16, %s6130_s14 }
 0x1ed   :  { %v686_v48 = vpop.xlane.xlu0 %685 }
 0x1ee   :  { %5999 = vrcp.f32 %v686_v48 }
 0x1f1   :  { %v689_v49 = vpop.xlane.xlu1 %688 }
 0x1f2   :  { %6001 = vrcp.f32 %v689_v49  ;;  %v692_v50 = vpop.xlane.xlu0 %691 }
 0x1f3   :  { %6003 = vrcp.f32 %v692_v50 }
 0x1f5   :  { %v695_v51 = vpop.xlane.xlu1 %694 }
 0x1f6   :  { %6005 = vrcp.f32 %v695_v51  ;;  %v698_v52 = vpop.xlane.xlu0 %697 }
 0x1f7   :  { %6007 = vrcp.f32 %v698_v52 }
 0x1f9   :  { %v701_v53 = vpop.xlane.xlu1 %700 }
 0x1fa   :  { %6009 = vrcp.f32 %v701_v53  ;;  %v704_v54 = vpop.xlane.xlu0 %703 }
 0x1fb   :  { %v6000_v55 = vpop.eup %5999  ;;  %6011 = vrcp.f32 %v704_v54 }
 0x1fc   :  { %v716_v56 = vmul.f32 %v6000_v55, %v6327_v17 }
 0x1fe   :  { %5694 = vmatmul.mubr.msk.f32.vlgmr.msra.gmra.mxu0 %vm27_vm0, %v716_v56  ;;  %v1489_v61 = vpop.permute.xlu0 %1488 }
 0x1ff   :  { %v6002_v57 = vpop.eup %6001  ;;  %5702 = vmatpush3.msra.mxu0 %v877_v31  ;;  %5703 = vmatprep.mubr.msk.f32.mxu0 %vm6128_vm1, %v6127_v0 }
 0x200   :  { %v6004_v58 = vpop.eup %6003  ;;  %v717_v59 = vmul.f32 %v6002_v57, %v6333_v19  ;;  %5711 = vmatprep.subr.mxu0 %v6127_v0 }
 0x201   :  { %v718_v60 = vmul.f32 %v6004_v58, %v6335_v20 }
 0x202   :  { %5699 = vmatmul.mubr.msk.f32.vlgmr.msra.gmra.mxu1 %vm27_vm0, %v717_v59  ;;  %v1647_v19 = vpop.permute.xlu0 %1646 }
 0x203   :  { %v6006_v62 = vpop.eup %6005  ;;  %5704 = vmatmul.mubr.msk.f32.vlgmr.msra.gmra.mxu0 %vm27_vm0, %v718_v60  ;;  %5707 = vmatpush3.msra.mxu1 %v953_v32 }
 0x204   :  { %v6008_v63 = vpop.eup %6007  ;;  %5708 = vmatprep.mubr.msk.f32.mxu1 %vm6128_vm1, %v6127_v0  ;;  %5712 = vmatpush3.msra.mxu0 %v1029_v43  ;;  %v719_v17 = vmul.f32 %v6006_v62, %v6341_v23 }
 0x205   :  { %5713 = vmatprep.mubr.msk.f32.mxu0 %vm6128_vm1, %v6127_v0  ;;  %5716 = vmatprep.subr.mxu1 %v6127_v0  ;;  %v720_v18 = vmul.f32 %v6008_v63, %v6343_v24 }
 0x206   :  { %5709 = vmatmul.mubr.msk.f32.vlgmr.msra.gmra.mxu1 %vm27_vm0, %v719_v17  ;;  %5721 = vmatprep.subr.mxu0 %v6127_v0  ;;  %v1645_v24 = vpop.permute.xlu0 %1644 }
 0x207   :  { %v6010_v20 = vpop.eup %6009  ;;  %5714 = vmatmul.mubr.msk.f32.vlgmr.msra.gmra.mxu0 %vm27_vm0, %v720_v18  ;;  %5717 = vmatpush3.msra.mxu1 %v6367_v33 }
 0x208   :  { %v6012_v21 = vpop.eup %6011  ;;  %5718 = vmatprep.mubr.msk.f32.mxu1 %vm6128_vm1, %v6127_v0  ;;  %5722 = vmatpush3.msra.mxu0 %v1181_v44  ;;  %v721_v22 = vmul.f32 %v6010_v20, %v6349_v27  ;;  %v1567_v27 = vpop.permute.xlu1 %1566 }
 0x209   :  { %5723 = vmatprep.mubr.msk.f32.mxu0 %vm6128_vm1, %v6127_v0  ;;  %5726 = vmatprep.subr.mxu1 %v6127_v0  ;;  %v722_v23 = vmul.f32 %v6012_v21, %v6351_v28 }
 0x20a   :  { %5719 = vmatmul.mubr.msk.f32.vlgmr.msra.gmra.mxu1 %vm27_vm0, %v721_v22  ;;  %5731 = vmatprep.subr.mxu0 %v6127_v0  ;;  %v1803_v25 = vpop.permute.xlu0 %1802 }
 0x20b   :  { %5724 = vmatmul.mubr.msk.f32.vlgmr.msra.gmra.mxu0 %vm27_vm0, %v722_v23  ;;  %5727 = vmatpush3.msra.mxu1 %v6373_v34 }
 0x20c   :  { %5732 = vmatpush3.xpose.msk.msra.mxu0 %vm27_vm0, %v1335_v37  ;;  %5733 = vmatprep.mubr.msk.f32.mxu0 %vm6128_vm1, %v6127_v0  ;;  %v1725_v28 = vpop.permute.xlu1 %1724 }
 0x20d   :  { %5741 = vmatprep.subr.mxu0 %v6127_v0  ;;  %5728 = vmatprep.mubr.msk.f32.mxu1 %vm6128_vm1, %v6127_v0 }
 0x20e   :  { %5736 = vmatprep.subr.mxu1 %v6127_v0  ;;  %v1801_v26 = vpop.permute.xlu0 %1800 }
 0x20f   :  { %5734 = vmatmul.mubr.msk.f32.vlgmr.msra.gmra.mxu0 %vm27_vm0, %v1333_v45 }
 0x210   :  { %5742 = vmatpush3.xpose.msk.msra.mxu0 %vm27_vm0, %v1491_v46  ;;  %5743 = vmatprep.mubr.msk.f32.mxu0 %vm6128_vm1, %v6127_v0 }
 0x211   :  { %5751 = vmatprep.subr.mxu0 %v6127_v0 }
 0x213   :  { %5744 = vmatmul.mubr.msk.f32.vlgmr.msra.gmra.mxu0 %vm27_vm0, %v1489_v61 }
 0x214   :  { %5752 = vmatpush3.xpose.msk.msra.mxu0 %vm27_vm0, %v1647_v19  ;;  %5753 = vmatprep.mubr.msk.f32.mxu0 %vm6128_vm1, %v6127_v0 }
 0x215   :  { %5761 = vmatprep.subr.mxu0 %v6127_v0 }
 0x217   :  { %5754 = vmatmul.mubr.msk.f32.vlgmr.msra.gmra.mxu0 %vm27_vm0, %v1645_v24 }
 0x218   :  { %5762 = vmatpush3.xpose.msk.msra.mxu0 %vm27_vm0, %v1803_v25  ;;  %5763 = vmatprep.mubr.msk.f32.mxu0 %vm6128_vm1, %v6127_v0 }
 0x219   :  { %5771 = vmatprep.subr.mxu0 %v6127_v0 }
 0x21b   :  { %5764 = vmatmul.mubr.msk.f32.vlgmr.msra.gmra.mxu0 %vm27_vm0, %v1801_v26 }
 0x21c   :  { %5773 = vmatprep.mubr.msk.f32.mxu0 %vm6128_vm1, %v6127_v0 }
 0x246   :  { %v707_v29 = vpop.xlane.xlu1 %706 }
 0x247   :  { %6013 = vrcp.f32 %v707_v29 }
 0x24a   :  { %v1723_v32 = vpop.permute.xlu1 %1722 }
 0x24e   :  { %v1881_v33 = vpop.permute.xlu1 %1880 }
 0x252   :  { %v1879_v34 = vpop.permute.xlu1 %1878 }
 0x254   :  { %v6014_v30 = vpop.eup %6013 }
 0x255   :  { %v723_v31 = vmul.f32 %v6014_v30, %v6380_v41 }
 0x257   :  { %5729 = vmatmul.mubr.msk.f32.vlgmr.msra.gmra.mxu1 %vm27_vm0, %v723_v31 }
 0x258   :  { %5737 = vmatpush3.xpose.msk.msra.mxu1 %vm27_vm0, %v6375_v35  ;;  %5738 = vmatprep.mubr.msk.f32.mxu1 %vm6128_vm1, %v6127_v0 }
 0x259   :  { %5746 = vmatprep.subr.mxu1 %v6127_v0 }
 0x25b   :  { %5739 = vmatmul.mubr.msk.f32.vlgmr.msra.gmra.mxu1 %vm27_vm0, %v6377_v36 }
 0x25c   :  { %5747 = vmatpush3.xpose.msk.msra.mxu1 %vm27_vm0, %v6390_v47  ;;  %5748 = vmatprep.mubr.msk.f32.mxu1 %vm6128_vm1, %v6127_v0 }
 0x25d   :  { %5756 = vmatprep.subr.mxu1 %v6127_v0 }
 0x25f   :  { %5749 = vmatmul.mubr.msk.f32.vlgmr.msra.gmra.mxu1 %vm27_vm0, %v1567_v27 }
 0x260   :  { %5757 = vmatpush3.xpose.msk.msra.mxu1 %vm27_vm0, %v1725_v28  ;;  %5758 = vmatprep.mubr.msk.f32.mxu1 %vm6128_vm1, %v6127_v0 }
 0x261   :  { %5766 = vmatprep.subr.mxu1 %v6127_v0 }
 0x263   :  { %5759 = vmatmul.mubr.msk.f32.vlgmr.msra.gmra.mxu1 %vm27_vm0, %v1723_v32 }
 0x264   :  { %5767 = vmatpush3.xpose.msk.msra.mxu1 %vm27_vm0, %v1881_v33  ;;  %5768 = vmatprep.mubr.msk.f32.mxu1 %vm6128_vm1, %v6127_v0 }
 0x265   :  { %5776 = vmatprep.subr.mxu1 %v6127_v0 }
 0x267   :  { %5769 = vmatmul.mubr.msk.f32.vlgmr.msra.gmra.mxu1 %vm27_vm0, %v1879_v34 }
 0x268   :  { %5778 = vmatprep.mubr.msk.f32.mxu1 %vm6128_vm1, %v6127_v0 }
 0x2be   :  { %v6475_v35 = vpop.f32.mrf.mxu0 }
 0x2c0   :  { %v5695_v36 = vpop.f32.mrf.mxu0 }
 0x2c2   :  { %v6477_v38 = vpop.f32.mrf.mxu1 }
 0x2c3   :  { %v6479_v39 = vpop.f32.mrf.mxu0 }
 0x2c4   :  { %v5700_v40 = vpop.f32.mrf.mxu1 }
 0x2c5   :  { %v5705_v41 = vpop.f32.mrf.mxu0 }
 0x2c6   :  { %v6481_v42 = vpop.f32.mrf.mxu1 }
 0x2c7   :  { %v6483_v43 = vpop.f32.mrf.mxu0 }
 0x2c8   :  { %v5710_v44 = vpop.f32.mrf.mxu1 }
 0x2c9   :  { %v5715_v37 = vpop.f32.mrf.mxu0 }
 0x2ca   :  { %v6485_v45 = vpop.f32.mrf.mxu1 }
 0x2cb   :  { %v6487_v46 = vpop.f32.mrf.mxu0 }
 0x2cc   :  { %v5720_v47 = vpop.f32.mrf.mxu1 }
 0x2cd   :  { %v5725_v48 = vpop.f32.mrf.mxu0 }
 0x2cf   :  { %v1406_v49 = vpop.f32.mrf.mxu0 }
 0x2d0   :  { %v1956_v50 = vsel %vm27_vm0, %v1406_v49, -inf }
 0x2d1   :  { %1957 = vmax.xlane.f32.xlu0 %v1956_v50  ;;  %v5735_v51 = vpop.f32.mrf.mxu0 }
 0x2d3   :  { %v1562_v52 = vpop.f32.mrf.mxu0 }
 0x2d4   :  { %v1962_v53 = vsel %vm27_vm0, %v1562_v52, -inf }
 0x2d5   :  { %1963 = vmax.xlane.f32.xlu0 %v1962_v53  ;;  %v5745_v54 = vpop.f32.mrf.mxu0 }
 0x2d7   :  { %v6491_v55 = vpop.f32.mrf.mxu0 }
 0x2d8   :  { %v1968_v20 = vsel %vm27_vm0, %v6491_v55, -inf }
 0x2d9   :  { %v5755_v56 = vpop.f32.mrf.mxu0 }
 0x2db   :  { %v6493_v57 = vpop.f32.mrf.mxu0 }
 0x2dc   :  { %v1974_v24 = vsel %vm27_vm0, %v6493_v57, -inf }
 0x2dd   :  { %v5765_v58 = vpop.f32.mrf.mxu0 }
 0x317   :  { %v6495_v59 = vpop.f32.mrf.mxu1 }
 0x319   :  { %v5730_v60 = vpop.f32.mrf.mxu1 }
 0x31b   :  { %v1484_v61 = vpop.f32.mrf.mxu1 }
 0x31c   :  { %v1959_v62 = vsel %vm27_vm0, %v1484_v61, -inf }
 0x31d   :  { %1960 = vmax.xlane.f32.xlu1 %v1959_v62  ;;  %v5740_v63 = vpop.f32.mrf.mxu1 }
 0x31f   :  { %v1640_v17 = vpop.f32.mrf.mxu1 }
 0x320   :  { %v1965_v18 = vsel %vm27_vm0, %v1640_v17, -inf }
 0x321   :  { %v5750_v19 = vpop.f32.mrf.mxu1  ;;  %1966 = vmax.xlane.f32.xlu0 %v1965_v18 }
 0x323   :  { %v1796_v21 = vpop.f32.mrf.mxu1 }
 0x324   :  { %v1971_v22 = vsel %vm27_vm0, %v1796_v21, -inf }
 0x325   :  { %1972 = vmax.xlane.f32.xlu1 %v1971_v22  ;;  %v5760_v23 = vpop.f32.mrf.mxu1  ;;  %1969 = vmax.xlane.f32.xlu0 %v1968_v20 }
 0x327   :  { %v6504_v25 = vpop.f32.mrf.mxu1 }
 0x329   :  { %1975 = vmax.xlane.f32.xlu0 %v1974_v24  ;;  %v5770_v26 = vpop.f32.mrf.mxu1 }
 0x336   :  { %2120 = vrot.lane.b32.xlu1 %v6165_v2, %s6131_s15 }
 0x33a   :  { %2196 = vrot.lane.b32.xlu1 %v6181_v4, %s6131_s15 }
 0x33e   :  { %2272 = vrot.lane.b32.xlu1 %v6194_v6, %s6131_s15 }
 0x33f   :  { %2044 = vrot.lane.b32.xlu0 %v6158_v1, %s6131_s15 }
 0x342   :  { %2424 = vrot.lane.b32.xlu1 %v6227_v10, %s6131_s15 }
 0x343   :  { %2348 = vrot.lane.b32.xlu0 %v6214_v8, %s6131_s15 }
 0x346   :  { %2576 = vrot.lane.b32.xlu1 %v6261_v14, %s6131_s15 }
 0x347   :  { %2500 = vrot.lane.b32.xlu0 %v6248_v12, %s6131_s15 }
 0x34a   :  { %2732 = vrot.lane.b32.xlu1 %v6165_v2, %s6132_s16 }
 0x34b   :  { %2654 = vrot.lane.b32.xlu0 %v6158_v1, %s6132_s16  ;;  %v1977_v1 = vsel %vm27_vm0, %v6504_v25, -inf }
 0x34e   :  { %2730 = vrot.lane.b32.xlu1 %v6186_v5, %s6132_s16 }
 0x34f   :  { %2652 = vrot.lane.b32.xlu0 %v6173_v3, %s6132_s16 }
 0x353   :  { %2810 = vrot.lane.b32.xlu0 %v6181_v4, %s6132_s16 }
 0x35a   :  { %v1958_v27 = vpop.xlane.xlu0 %1957 }
 0x35b   :  { %v1980_v28 = vsub.f32 %v1406_v49, %v1958_v27 }
 0x35d   :  { %v1988_v29 = vmul.f32 1.442695, %v1980_v28 }
 0x35e   :  { %v1964_v30 = vpop.xlane.xlu0 %1963 }
 0x35f   :  { %v1982_v31 = vsub.f32 %v1562_v52, %v1964_v30  ;;  %6015 = vpow2.f32 %v1988_v29 }
 0x361   :  { %v1992_v32 = vmul.f32 1.442695, %v1982_v31 }
 0x363   :  { %6017 = vpow2.f32 %v1992_v32 }
 0x36c   :  { %v6524_v2 = vpop.eup %6015 }
 0x36d   :  { %v2004_v5 = vsel %vm27_vm0, %v6524_v2, 0.0 }
 0x370   :  { %v6530_v3 = vpop.eup %6017 }
 0x371   :  { %v2010_v4 = vsel %vm27_vm0, %v6530_v3, 0.0 }
 0x372   :  { %1978 = vmax.xlane.f32.xlu1 %v1977_v1  ;;  %2005 = vadd.xlane.f32.xlu0 %v2004_v5 }
 0x376   :  { %2011 = vadd.xlane.f32.xlu0 %v2010_v4 }
 0x383   :  { %2888 = vrot.lane.b32.xlu1 %v6194_v6, %s6132_s16 }
 0x3a6   :  { %v1961_v33 = vpop.xlane.xlu1 %1960 }
 0x3a7   :  { %v1981_v34 = vsub.f32 %v1484_v61, %v1961_v33 }
 0x3a9   :  { %v1990_v36 = vmul.f32 1.442695, %v1981_v34 }
 0x3aa   :  { %v1967_v40 = vpop.xlane.xlu0 %1966 }
 0x3ab   :  { %6019 = vpow2.f32 %v1990_v36  ;;  %v1983_v41 = vsub.f32 %v1640_v17, %v1967_v40 }
 0x3ad   :  { %v1994_v44 = vmul.f32 1.442695, %v1983_v41 }
 0x3ae   :  { %v1973_v37 = vpop.xlane.xlu1 %1972  ;;  %v1970_v47 = vpop.xlane.xlu0 %1969 }
 0x3af   :  { %6021 = vpow2.f32 %v1994_v44  ;;  %v1985_v48 = vsub.f32 %v1796_v21, %v1973_v37  ;;  %v1984_v49 = vsub.f32 %v6491_v55, %v1970_v47 }
 0x3b1   :  { %v1998_v50 = vmul.f32 1.442695, %v1985_v48  ;;  %v1996_v51 = vmul.f32 1.442695, %v1984_v49 }
 0x3b2   :  { %v2121_v52 = vpop.permute.xlu1 %2120  ;;  %v1976_v53 = vpop.xlane.xlu0 %1975 }
 0x3b3   :  { %6023 = vpow2.f32 %v1998_v50  ;;  %v1986_v6 = vsub.f32 %v6493_v57, %v1976_v53  ;;  %5777 = vmatpush3.msra.mxu1 %v2121_v52 }
 0x3b4   :  { %6025 = vpow2.f32 %v1996_v51  ;;  %5786 = vmatprep.subr.mxu1 %v6127_v0 }
 0x3b5   :  { %v2000_v54 = vmul.f32 1.442695, %v1986_v6 }
 0x3b6   :  { %v2045_v56 = vpop.permute.xlu0 %2044  ;;  %v2197_v20 = vpop.permute.xlu1 %2196 }
 0x3b7   :  { %6027 = vpow2.f32 %v2000_v54  ;;  %5772 = vmatpush3.msra.mxu0 %v2045_v56 }
 0x3b8   :  { %v6539_v58 = vpop.eup %6019  ;;  %5781 = vmatprep.subr.mxu0 %v6127_v0 }
 0x3b9   :  { %v2007_v55 = vsel %vm27_vm0, %v6539_v58, 0.0 }
 0x3ba   :  { %2008 = vadd.xlane.f32.xlu1 %v2007_v55  ;;  %v2349_v21 = vpop.permute.xlu0 %2348  ;;  %v2273_v22 = vpop.permute.xlu1 %2272 }
 0x3bc   :  { %v6544_v60 = vpop.eup %6021 }
 0x3bd   :  { %v2013_v57 = vsel %vm27_vm0, %v6544_v60, 0.0 }
 0x3be   :  { %2014 = vadd.xlane.f32.xlu1 %v2013_v57  ;;  %v6568_v23 = vpop.permute.xlu0 %2500  ;;  %v2425_v24 = vpop.permute.xlu1 %2424 }
 0x3c0   :  { %v6548_v61 = vpop.eup %6023 }
 0x3c1   :  { %v6550_v62 = vpop.eup %6025  ;;  %v2019_v63 = vsel %vm27_vm0, %v6548_v61, 0.0 }
 0x3c2   :  { %2020 = vadd.xlane.f32.xlu1 %v2019_v63  ;;  %v2016_v17 = vsel %vm27_vm0, %v6550_v62, 0.0  ;;  %v6572_v26 = vpop.permute.xlu0 %2654 }
 0x3c3   :  { %2017 = vadd.xlane.f32.xlu0 %v2016_v17 }
 0x3c4   :  { %v6556_v18 = vpop.eup %6027 }
 0x3c5   :  { %v2022_v19 = vsel %vm27_vm0, %v6556_v18, 0.0 }
 0x3c7   :  { %2023 = vadd.xlane.f32.xlu0 %v2022_v19 }
 0x3d3   :  { %2886 = vrot.lane.b32.xlu1 %v6219_v9, %s6132_s16  ;;  %v6576_v9 = vpop.permute.xlu1 %2576 }
 0x3d7   :  { %3044 = vrot.lane.b32.xlu1 %v6227_v10, %s6132_s16  ;;  %v6582_v10 = vpop.permute.xlu1 %2732 }
 0x3db   :  { %v6586_v27 = vpop.permute.xlu1 %2730 }
 0x3dd   :  { %2808 = vrot.lane.b32.xlu0 %v6205_v7, %s6132_s16  ;;  %v6580_v7 = vpop.permute.xlu0 %2652 }
 0x3e1   :  { %2966 = vrot.lane.b32.xlu0 %v6214_v8, %s6132_s16  ;;  %v6584_v8 = vpop.permute.xlu0 %2810 }
 0x3e5   :  { %2964 = vrot.lane.b32.xlu0 %v6239_v11, %s6132_s16 }
 0x3e9   :  { %3122 = vrot.lane.b32.xlu0 %v6248_v12, %s6132_s16 }
 0x3ed   :  { %3120 = vrot.lane.b32.xlu0 %v6273_v15, %s6132_s16 }
 0x3fb   :  { %v1979_v28 = vpop.xlane.xlu1 %1978  ;;  %v2006_v11 = vpop.xlane.xlu0 %2005 }
 0x3fc   :  { %v1987_v29 = vsub.f32 %v6504_v25, %v1979_v28  ;;  %6029 = vrcp.f32 %v2006_v11 }
 0x3fe   :  { %v2002_v30 = vmul.f32 1.442695, %v1987_v29 }
 0x3ff   :  { %v2012_v12 = vpop.xlane.xlu0 %2011 }
 0x400   :  { %6031 = vpow2.f32 %v2002_v30 }
 0x401   :  { %6033 = vrcp.f32 %v2012_v12 }
 0x409   :  { %v6030_v31 = vpop.eup %6029 }
 0x40a   :  { %v2036_v15 = vmul.f32 %v6030_v31, %v6524_v2  ;;  %v6609_v2 = vpop.permute.xlu1 %2888 }
 0x40c   :  { %5774 = vmatmul.mubr.msk.f32.vlgmr.msra.gmra.mxu0 %vm27_vm0, %v2036_v15 }
 0x40d   :  { %v6591_v32 = vpop.eup %6031  ;;  %5782 = vmatpush3.msra.mxu0 %v2197_v20  ;;  %5783 = vmatprep.mubr.msk.f32.mxu0 %vm6128_vm1, %v6127_v0 }
 0x40e   :  { %v6034_v1 = vpop.eup %6033  ;;  %v2025_v25 = vsel %vm27_vm0, %v6591_v32, 0.0  ;;  %5791 = vmatprep.subr.mxu0 %v6127_v0 }
 0x40f   :  { %2026 = vadd.xlane.f32.xlu1 %v2025_v25  ;;  %v2038_v5 = vmul.f32 %v6034_v1, %v6530_v3 }
 0x411   :  { %5784 = vmatmul.mubr.msk.f32.vlgmr.msra.gmra.mxu0 %vm27_vm0, %v2038_v5 }
 0x412   :  { %5792 = vmatpush3.msra.mxu0 %v2349_v21  ;;  %5793 = vmatprep.mubr.msk.f32.mxu0 %vm6128_vm1, %v6127_v0 }
 0x413   :  { %5801 = vmatprep.subr.mxu0 %v6127_v0 }
 0x420   :  { %3042 = vrot.lane.b32.xlu1 %v6253_v13, %s6132_s16 }
 0x424   :  { %3200 = vrot.lane.b32.xlu1 %v6261_v14, %s6132_s16 }
 0x428   :  { %3198 = vrot.lane.b32.xlu1 %v6282_v16, %s6132_s16 }
 0x443   :  { %v2009_v3 = vpop.xlane.xlu1 %2008 }
 0x444   :  { %6035 = vrcp.f32 %v2009_v3 }
 0x447   :  { %v2015_v4 = vpop.xlane.xlu1 %2014 }
 0x448   :  { %6037 = vrcp.f32 %v2015_v4 }
 0x44b   :  { %v2021_v33 = vpop.xlane.xlu1 %2020 }
 0x44c   :  { %6039 = vrcp.f32 %v2021_v33  ;;  %v2018_v34 = vpop.xlane.xlu0 %2017 }
 0x44d   :  { %6041 = vrcp.f32 %v2018_v34 }
 0x44f   :  { %v2887_v54 = vpop.permute.xlu1 %2886 }
 0x450   :  { %v2024_v36 = vpop.xlane.xlu0 %2023 }
 0x451   :  { %v6036_v40 = vpop.eup %6035  ;;  %6043 = vrcp.f32 %v2024_v36 }
 0x452   :  { %v2037_v13 = vmul.f32 %v6036_v40, %v6539_v58 }
 0x453   :  { %v3045_v56 = vpop.permute.xlu1 %3044 }
 0x454   :  { %5779 = vmatmul.mubr.msk.f32.vlgmr.msra.gmra.mxu1 %vm27_vm0, %v2037_v13  ;;  %v2809_v41 = vpop.permute.xlu0 %2808 }
 0x455   :  { %v6038_v14 = vpop.eup %6037  ;;  %5787 = vmatpush3.msra.mxu1 %v2273_v22  ;;  %5788 = vmatprep.mubr.msk.f32.mxu1 %vm6128_vm1, %v6127_v0 }
 0x456   :  { %5796 = vmatprep.subr.mxu1 %v6127_v0  ;;  %v2039_v16 = vmul.f32 %v6038_v14, %v6544_v60 }
 0x458   :  { %5789 = vmatmul.mubr.msk.f32.vlgmr.msra.gmra.mxu1 %vm27_vm0, %v2039_v16  ;;  %v2967_v49 = vpop.permute.xlu0 %2966 }
 0x459   :  { %v6040_v44 = vpop.eup %6039  ;;  %5797 = vmatpush3.msra.mxu1 %v2425_v24  ;;  %5798 = vmatprep.mubr.msk.f32.mxu1 %vm6128_vm1, %v6127_v0 }
 0x45a   :  { %v6042_v37 = vpop.eup %6041  ;;  %5806 = vmatprep.subr.mxu1 %v6127_v0  ;;  %v2041_v47 = vmul.f32 %v6040_v44, %v6548_v61 }
 0x45b   :  { %v2040_v48 = vmul.f32 %v6042_v37, %v6550_v62 }
 0x45c   :  { %5799 = vmatmul.mubr.msk.f32.vlgmr.msra.gmra.mxu1 %vm27_vm0, %v2041_v47  ;;  %v2965_v52 = vpop.permute.xlu0 %2964  ;;  %v6724_v47 = vld [vmem:[%s7155_s1 + $0x8] sm:$0xff] }
 0x45d   :  { %5794 = vmatmul.mubr.msk.f32.vlgmr.msra.gmra.mxu0 %vm27_vm0, %v2040_v48  ;;  %5807 = vmatpush3.msra.mxu1 %v6576_v9  ;;  %v6730_v48 = vld [vmem:[%s7155_s1 + $0x10] sm:$0xff] }
 0x45e   :  { %v6044_v50 = vpop.eup %6043  ;;  %5802 = vmatpush3.msra.mxu0 %v6568_v23  ;;  %5803 = vmatprep.mubr.msk.f32.mxu0 %vm6128_vm1, %v6127_v0 }
 0x45f   :  { %5811 = vmatprep.subr.mxu0 %v6127_v0  ;;  %v2042_v51 = vmul.f32 %v6044_v50, %v6556_v18  ;;  %5808 = vmatprep.mubr.msk.f32.mxu1 %vm6128_vm1, %v6127_v0  ;;  %v6742_v50 = vld [vmem:[%s7155_s1] sm:$0xff] }
 0x460   :  { %5816 = vmatprep.subr.mxu1 %v6127_v0  ;;  %v3123_v53 = vpop.permute.xlu0 %3122 }
 0x461   :  { %5804 = vmatmul.mubr.msk.f32.vlgmr.msra.gmra.mxu0 %vm27_vm0, %v2042_v51  ;;  %v6748_v51 = vld [vmem:[%s7155_s1 + $0x28] sm:$0xff] }
 0x462   :  { %5812 = vmatpush3.xpose.msk.msra.mxu0 %vm27_vm0, %v6572_v26  ;;  %5813 = vmatprep.mubr.msk.f32.mxu0 %vm6128_vm1, %v6127_v0 }
 0x463   :  { %5821 = vmatprep.subr.mxu0 %v6127_v0 }
 0x464   :  { %v3121_v6 = vpop.permute.xlu0 %3120 }
 0x465   :  { %5814 = vmatmul.mubr.msk.f32.vlgmr.msra.gmra.mxu0 %vm27_vm0, %v6580_v7 }
 0x466   :  { %5822 = vmatpush3.xpose.msk.msra.mxu0 %vm27_vm0, %v6584_v8  ;;  %5823 = vmatprep.mubr.msk.f32.mxu0 %vm6128_vm1, %v6127_v0 }
 0x467   :  { %5831 = vmatprep.subr.mxu0 %v6127_v0 }
 0x469   :  { %5824 = vmatmul.mubr.msk.f32.vlgmr.msra.gmra.mxu0 %vm27_vm0, %v2809_v41 }
 0x46a   :  { %5832 = vmatpush3.xpose.msk.msra.mxu0 %vm27_vm0, %v2967_v49  ;;  %5833 = vmatprep.mubr.msk.f32.mxu0 %vm6128_vm1, %v6127_v0  ;;  %v6736_v49 = vld [vmem:[%s7155_s1 + $0x18] sm:$0xff] }
 0x46b   :  { %5841 = vmatprep.subr.mxu0 %v6127_v0 }
 0x46d   :  { %5834 = vmatmul.mubr.msk.f32.vlgmr.msra.gmra.mxu0 %vm27_vm0, %v2965_v52  ;;  %v6754_v52 = vld [vmem:[%s7155_s1 + $0x20] sm:$0xff] }
 0x46e   :  { %5842 = vmatpush3.xpose.msk.msra.mxu0 %vm27_vm0, %v3123_v53  ;;  %5843 = vmatprep.mubr.msk.f32.mxu0 %vm6128_vm1, %v6127_v0  ;;  %v6760_v53 = vld [vmem:[%s7155_s1 + $0x38] sm:$0xff] }
 0x46f   :  { %5851 = vmatprep.subr.mxu0 %v6127_v0 }
 0x471   :  { %5844 = vmatmul.mubr.msk.f32.vlgmr.msra.gmra.mxu0 %vm27_vm0, %v3121_v6  ;;  %v6766_v6 = vld [vmem:[%s7155_s1 + $0x30] sm:$0xff] }
 0x472   :  { %5853 = vmatprep.mubr.msk.f32.mxu0 %vm6128_vm1, %v6127_v0 }
 0x498   :  { %v2027_v58 = vpop.xlane.xlu1 %2026 }
 0x499   :  { %6045 = vrcp.f32 %v2027_v58 }
 0x49c   :  { %v3043_v57 = vpop.permute.xlu1 %3042 }
 0x4a0   :  { %v3201_v61 = vpop.permute.xlu1 %3200 }
 0x4a4   :  { %v3199_v62 = vpop.permute.xlu1 %3198 }
 0x4a6   :  { %v6046_v55 = vpop.eup %6045 }
 0x4a7   :  { %v2043_v60 = vmul.f32 %v6046_v55, %v6591_v32 }
 0x4a9   :  { %5809 = vmatmul.mubr.msk.f32.vlgmr.msra.gmra.mxu1 %vm27_vm0, %v2043_v60 }
 0x4aa   :  { %5817 = vmatpush3.xpose.msk.msra.mxu1 %vm27_vm0, %v6582_v10  ;;  %5818 = vmatprep.mubr.msk.f32.mxu1 %vm6128_vm1, %v6127_v0 }
 0x4ab   :  { %5826 = vmatprep.subr.mxu1 %v6127_v0 }
 0x4ad   :  { %5819 = vmatmul.mubr.msk.f32.vlgmr.msra.gmra.mxu1 %vm27_vm0, %v6586_v27 }
 0x4ae   :  { %5827 = vmatpush3.xpose.msk.msra.mxu1 %vm27_vm0, %v6609_v2  ;;  %5828 = vmatprep.mubr.msk.f32.mxu1 %vm6128_vm1, %v6127_v0 }
 0x4af   :  { %5836 = vmatprep.subr.mxu1 %v6127_v0 }
 0x4b1   :  { %5829 = vmatmul.mubr.msk.f32.vlgmr.msra.gmra.mxu1 %vm27_vm0, %v2887_v54  ;;  %v6119_v54 = vld [vmem:[%s7156_s0 + $0x8] sm:$0xff] }
 0x4b2   :  { %5837 = vmatpush3.xpose.msk.msra.mxu1 %vm27_vm0, %v3045_v56  ;;  %5838 = vmatprep.mubr.msk.f32.mxu1 %vm6128_vm1, %v6127_v0  ;;  %v6120_v56 = vld [vmem:[%s7156_s0] sm:$0xff] }
 0x4b3   :  { %5846 = vmatprep.subr.mxu1 %v6127_v0 }
 0x4b5   :  { %5839 = vmatmul.mubr.msk.f32.vlgmr.msra.gmra.mxu1 %vm27_vm0, %v3043_v57 }
 0x4b6   :  { %5847 = vmatpush3.xpose.msk.msra.mxu1 %vm27_vm0, %v3201_v61  ;;  %5848 = vmatprep.mubr.msk.f32.mxu1 %vm6128_vm1, %v6127_v0 }
 0x4b7   :  { %5856 = vmatprep.subr.mxu1 %v6127_v0 }
 0x4b9   :  { %5849 = vmatmul.mubr.msk.f32.vlgmr.msra.gmra.mxu1 %vm27_vm0, %v3199_v62 }
 0x4ba   :  { %5858 = vmatprep.mubr.msk.f32.mxu1 %vm6128_vm1, %v6127_v0 }
 0x4cc   :  { %v6687_v63 = vpop.f32.mrf.mxu0 }
 0x4ce   :  { %v5775_v17 = vpop.f32.mrf.mxu0 }
 0x4d1   :  { %v6689_v18 = vpop.f32.mrf.mxu0 }
 0x4d3   :  { %v5785_v19 = vpop.f32.mrf.mxu0 }
 0x514   :  { %v6691_v20 = vpop.f32.mrf.mxu1 }
 0x516   :  { %v5780_v21 = vpop.f32.mrf.mxu1 }
 0x518   :  { %v6693_v22 = vpop.f32.mrf.mxu1 }
 0x51a   :  { %v5790_v23 = vpop.f32.mrf.mxu1 }
 0x51c   :  { %v6695_v24 = vpop.f32.mrf.mxu1 }
 0x51d   :  { %v6697_v26 = vpop.f32.mrf.mxu0 }
 0x51e   :  { %v5800_v9 = vpop.f32.mrf.mxu1 }
 0x51f   :  { %v5795_v7 = vpop.f32.mrf.mxu0 }
 0x521   :  { %v6699_v10 = vpop.f32.mrf.mxu0 }
 0x523   :  { %v5805_v8 = vpop.f32.mrf.mxu0 }
 0x525   :  { %v2726_v27 = vpop.f32.mrf.mxu0 }
 0x526   :  { %v3276_v28 = vsel %vm27_vm0, %v2726_v27, -inf }
 0x527   :  { %3277 = vmax.xlane.f32.xlu0 %v3276_v28  ;;  %v5815_v11 = vpop.f32.mrf.mxu0 }
 0x529   :  { %v2882_v29 = vpop.f32.mrf.mxu0 }
 0x52a   :  { %v3282_v30 = vsel %vm27_vm0, %v2882_v29, -inf }
 0x52b   :  { %3283 = vmax.xlane.f32.xlu0 %v3282_v30  ;;  %v5825_v12 = vpop.f32.mrf.mxu0 }
 0x52d   :  { %v6703_v31 = vpop.f32.mrf.mxu0 }
 0x52e   :  { %v3288_v40 = vsel %vm27_vm0, %v6703_v31, -inf }
 0x52f   :  { %v5835_v15 = vpop.f32.mrf.mxu0 }
 0x531   :  { %v6705_v32 = vpop.f32.mrf.mxu0 }
 0x532   :  { %v3294_v41 = vsel %vm27_vm0, %v6705_v32, -inf }
 0x533   :  { %v5845_v1 = vpop.f32.mrf.mxu0 }
 0x569   :  { %v6707_v25 = vpop.f32.mrf.mxu1 }
 0x56b   :  { %v5810_v5 = vpop.f32.mrf.mxu1 }
 0x56d   :  { %v2804_v2 = vpop.f32.mrf.mxu1 }
 0x56e   :  { %v3279_v3 = vsel %vm27_vm0, %v2804_v2, -inf }
 0x56f   :  { %3280 = vmax.xlane.f32.xlu1 %v3279_v3  ;;  %v5820_v4 = vpop.f32.mrf.mxu1 }
 0x571   :  { %v2960_v33 = vpop.f32.mrf.mxu1 }
 0x572   :  { %v3285_v34 = vsel %vm27_vm0, %v2960_v33, -inf }
 0x573   :  { %v5830_v36 = vpop.f32.mrf.mxu1  ;;  %3286 = vmax.xlane.f32.xlu0 %v3285_v34 }
 0x575   :  { %v6713_v13 = vpop.f32.mrf.mxu1 }
 0x576   :  { %v3291_v14 = vsel %vm27_vm0, %v6713_v13, -inf }
 0x577   :  { %3292 = vmax.xlane.f32.xlu1 %v3291_v14  ;;  %v5840_v16 = vpop.f32.mrf.mxu1  ;;  %3289 = vmax.xlane.f32.xlu0 %v3288_v40 }
 0x579   :  { %v6719_v44 = vpop.f32.mrf.mxu1 }
 0x57a   :  { %v3297_v17 = vsel %vm27_vm0, %v6719_v44, -inf }
 0x57b   :  { %3295 = vmax.xlane.f32.xlu0 %v3294_v41  ;;  %v5850_v37 = vpop.f32.mrf.mxu1 }
 0x588   :  { %3440 = vrot.lane.b32.xlu1 %v6724_v47, %s6133_s19 }
 0x58c   :  { %3516 = vrot.lane.b32.xlu1 %v6730_v48, %s6133_s19 }
 0x590   :  { %3592 = vrot.lane.b32.xlu1 %v6736_v49, %s6133_s19 }
 0x591   :  { %3364 = vrot.lane.b32.xlu0 %v6742_v50, %s6133_s19 }
 0x594   :  { %3744 = vrot.lane.b32.xlu1 %v6748_v51, %s6133_s19 }
 0x595   :  { %3668 = vrot.lane.b32.xlu0 %v6754_v52, %s6133_s19 }
 0x598   :  { %3896 = vrot.lane.b32.xlu1 %v6760_v53, %s6133_s19 }
 0x599   :  { %3820 = vrot.lane.b32.xlu0 %v6766_v6, %s6133_s19 }
 0x59c   :  { %4052 = vrot.lane.b32.xlu1 %v6724_v47, %s6134_s6 }
 0x59d   :  { %3974 = vrot.lane.b32.xlu0 %v6742_v50, %s6134_s6 }
 0x5a0   :  { %4050 = vrot.lane.b32.xlu1 %v6119_v54, %s6134_s6 }
 0x5a1   :  { %3972 = vrot.lane.b32.xlu0 %v6120_v56, %s6134_s6 }
 0x5a5   :  { %4130 = vrot.lane.b32.xlu0 %v6730_v48, %s6134_s6 }
 0x5b0   :  { %v3278_v58 = vpop.xlane.xlu0 %3277 }
 0x5b1   :  { %v3300_v55 = vsub.f32 %v2726_v27, %v3278_v58  ;;  %v6121_v58 = vld [vmem:[%s7156_s0 + $0x18] sm:$0xff] }
 0x5b3   :  { %v3308_v60 = vmul.f32 1.442695, %v3300_v55 }
 0x5b4   :  { %v3284_v57 = vpop.xlane.xlu0 %3283 }
 0x5b5   :  { %6047 = vpow2.f32 %v3308_v60  ;;  %v3302_v61 = vsub.f32 %v2882_v29, %v3284_v57  ;;  %v6122_v57 = vld [vmem:[%s7156_s0 + $0x10] sm:$0xff] }
 0x5b7   :  { %v3312_v62 = vmul.f32 1.442695, %v3302_v61 }
 0x5b9   :  { %6049 = vpow2.f32 %v3312_v62 }
 0x5c2   :  { %v6785_v19 = vpop.eup %6047 }
 0x5c3   :  { %v3324_v21 = vsel %vm27_vm0, %v6785_v19, 0.0 }
 0x5c4   :  { %3298 = vmax.xlane.f32.xlu1 %v3297_v17  ;;  %3325 = vadd.xlane.f32.xlu0 %v3324_v21  ;;  %v6123_v21 = vld [vmem:[%s7156_s0 + $0x20] sm:$0xff] }
 0x5c6   :  { %v6789_v23 = vpop.eup %6049 }
 0x5c7   :  { %v3330_v9 = vsel %vm27_vm0, %v6789_v23, 0.0 }
 0x5c8   :  { %3331 = vadd.xlane.f32.xlu0 %v3330_v9 }
 0x5d5   :  { %4208 = vrot.lane.b32.xlu1 %v6736_v49, %s6134_s6 }
 0x5f8   :  { %v3281_v7 = vpop.xlane.xlu1 %3280 }
 0x5f9   :  { %v3301_v8 = vsub.f32 %v2804_v2, %v3281_v7 }
 0x5fb   :  { %v3310_v27 = vmul.f32 1.442695, %v3301_v8  ;;  %v6124_v8 = vld [vmem:[%s7156_s0 + $0x30] sm:$0xff] }
 0x5fc   :  { %v3287_v28 = vpop.xlane.xlu0 %3286 }
 0x5fd   :  { %6051 = vpow2.f32 %v3310_v27  ;;  %v3303_v11 = vsub.f32 %v2960_v33, %v3287_v28 }
 0x5ff   :  { %v3314_v29 = vmul.f32 1.442695, %v3303_v11 }
 0x600   :  { %v3293_v30 = vpop.xlane.xlu1 %3292  ;;  %v3290_v12 = vpop.xlane.xlu0 %3289 }
 0x601   :  { %6053 = vpow2.f32 %v3314_v29  ;;  %v3305_v15 = vsub.f32 %v6713_v13, %v3293_v30  ;;  %v3304_v1 = vsub.f32 %v6703_v31, %v3290_v12 }
 0x603   :  { %v3318_v5 = vmul.f32 1.442695, %v3305_v15  ;;  %v3316_v3 = vmul.f32 1.442695, %v3304_v1 }
 0x604   :  { %v3441_v4 = vpop.permute.xlu1 %3440  ;;  %v3296_v34 = vpop.xlane.xlu0 %3295 }
 0x605   :  { %6055 = vpow2.f32 %v3318_v5  ;;  %v3306_v36 = vsub.f32 %v6705_v32, %v3296_v34  ;;  %5857 = vmatpush3.msra.mxu1 %v3441_v4 }
 0x606   :  { %6057 = vpow2.f32 %v3316_v3  ;;  %5866 = vmatprep.subr.mxu1 %v6127_v0 }
 0x607   :  { %v3320_v2 = vmul.f32 1.442695, %v3306_v36 }
 0x608   :  { %v3365_v33 = vpop.permute.xlu0 %3364  ;;  %v3517_v55 = vpop.permute.xlu1 %3516 }
 0x609   :  { %6059 = vpow2.f32 %v3320_v2  ;;  %5852 = vmatpush3.msra.mxu0 %v3365_v33 }
 0x60a   :  { %v6799_v40 = vpop.eup %6051  ;;  %5861 = vmatprep.subr.mxu0 %v6127_v0 }
 0x60b   :  { %v3327_v31 = vsel %vm27_vm0, %v6799_v40, 0.0 }
 0x60c   :  { %3328 = vadd.xlane.f32.xlu1 %v3327_v31  ;;  %v3669_v60 = vpop.permute.xlu0 %3668  ;;  %v3593_v61 = vpop.permute.xlu1 %3592 }
 0x60e   :  { %v6804_v13 = vpop.eup %6053 }
 0x60f   :  { %v3333_v32 = vsel %vm27_vm0, %v6804_v13, 0.0 }
 0x610   :  { %3334 = vadd.xlane.f32.xlu1 %v3333_v32  ;;  %v6832_v62 = vpop.permute.xlu0 %3820  ;;  %v3745_v17 = vpop.permute.xlu1 %3744 }
 0x612   :  { %v6808_v14 = vpop.eup %6055 }
 0x613   :  { %v6810_v16 = vpop.eup %6057  ;;  %v3339_v41 = vsel %vm27_vm0, %v6808_v14, 0.0 }
 0x614   :  { %3340 = vadd.xlane.f32.xlu1 %v3339_v41  ;;  %v3336_v37 = vsel %vm27_vm0, %v6810_v16, 0.0  ;;  %v6838_v9 = vpop.permute.xlu0 %3974  ;;  %v6842_v7 = vpop.permute.xlu1 %3896 }
 0x615   :  { %3337 = vadd.xlane.f32.xlu0 %v3336_v37 }
 0x616   :  { %v6816_v54 = vpop.eup %6059 }
 0x617   :  { %v3342_v56 = vsel %vm27_vm0, %v6816_v54, 0.0 }
 0x618   :  { %v6848_v27 = vpop.permute.xlu0 %3972  ;;  %v6850_v28 = vpop.permute.xlu1 %4052 }
 0x619   :  { %3343 = vadd.xlane.f32.xlu0 %v3342_v56 }
 0x61c   :  { %v6852_v11 = vpop.permute.xlu0 %4130  ;;  %v6854_v29 = vpop.permute.xlu1 %4050 }
 0x625   :  { %4206 = vrot.lane.b32.xlu1 %v6121_v58, %s6134_s6 }
 0x629   :  { %4364 = vrot.lane.b32.xlu1 %v6748_v51, %s6134_s6 }
 0x62f   :  { %4128 = vrot.lane.b32.xlu0 %v6122_v57, %s6134_s6 }
 0x633   :  { %4286 = vrot.lane.b32.xlu0 %v6754_v52, %s6134_s6 }
 0x637   :  { %4284 = vrot.lane.b32.xlu0 %v6123_v21, %s6134_s6 }
 0x63b   :  { %4442 = vrot.lane.b32.xlu0 %v6766_v6, %s6134_s6 }
 0x63f   :  { %4440 = vrot.lane.b32.xlu0 %v6124_v8, %s6134_s6 }
 0x64d   :  { %v3299_v30 = vpop.xlane.xlu1 %3298  ;;  %v3326_v12 = vpop.xlane.xlu0 %3325 }
 0x64e   :  { %v3307_v15 = vsub.f32 %v6719_v44, %v3299_v30  ;;  %6061 = vrcp.f32 %v3326_v12 }
 0x650   :  { %v3322_v1 = vmul.f32 1.442695, %v3307_v15 }
 0x651   :  { %v3332_v5 = vpop.xlane.xlu0 %3331  ;;  %v6881_v33 = vpop.permute.xlu1 %4208 }
 0x652   :  { %6063 = vpow2.f32 %v3322_v1 }
 0x653   :  { %6065 = vrcp.f32 %v3332_v5 }
 0x65b   :  { %v6062_v3 = vpop.eup %6061 }
 0x65c   :  { %v3356_v4 = vmul.f32 %v6062_v3, %v6785_v19  ;;  %v6125_v19 = vld [vmem:[%s7156_s0 + $0x28] sm:$0xff] }
 0x65e   :  { %5854 = vmatmul.mubr.msk.f32.vlgmr.msra.gmra.mxu0 %vm27_vm0, %v3356_v4 }
 0x65f   :  { %v6859_v34 = vpop.eup %6063  ;;  %5862 = vmatpush3.msra.mxu0 %v3517_v55  ;;  %5863 = vmatprep.mubr.msk.f32.mxu0 %vm6128_vm1, %v6127_v0 }
 0x660   :  { %v6066_v36 = vpop.eup %6065  ;;  %v3345_v44 = vsel %vm27_vm0, %v6859_v34, 0.0  ;;  %5871 = vmatprep.subr.mxu0 %v6127_v0 }
 0x661   :  { %3346 = vadd.xlane.f32.xlu1 %v3345_v44  ;;  %v3358_v2 = vmul.f32 %v6066_v36, %v6789_v23  ;;  %v6126_v23 = vld [vmem:[%s7156_s0 + $0x38] sm:$0xff]  ;;  %s6135_s0 = smov 72  }
 0x663   :  { %5864 = vmatmul.mubr.msk.f32.vlgmr.msra.gmra.mxu0 %vm27_vm0, %v3358_v2 }
 0x664   :  { %5872 = vmatpush3.msra.mxu0 %v3669_v60  ;;  %5873 = vmatprep.mubr.msk.f32.mxu0 %vm6128_vm1, %v6127_v0 }
 0x665   :  { %5881 = vmatprep.subr.mxu0 %v6127_v0 }
 0x672   :  { %4362 = vrot.lane.b32.xlu1 %v6125_v19, %s6134_s6 }
 0x676   :  { %4520 = vrot.lane.b32.xlu1 %v6760_v53, %s6134_s6 }
 0x67a   :  { %4518 = vrot.lane.b32.xlu1 %v6126_v23, %s6134_s6 }
 0x695   :  { %v3329_v31 = vpop.xlane.xlu1 %3328 }
 0x696   :  { %6067 = vrcp.f32 %v3329_v31 }
 0x699   :  { %v3335_v32 = vpop.xlane.xlu1 %3334 }
 0x69a   :  { %6069 = vrcp.f32 %v3335_v32 }
 0x69d   :  { %v3341_v41 = vpop.xlane.xlu1 %3340 }
 0x69e   :  { %6071 = vrcp.f32 %v3341_v41  ;;  %v3338_v37 = vpop.xlane.xlu0 %3337 }
 0x69f   :  { %6073 = vrcp.f32 %v3338_v37 }
 0x6a2   :  { %v3344_v56 = vpop.xlane.xlu0 %3343 }
 0x6a3   :  { %v6068_v58 = vpop.eup %6067  ;;  %6075 = vrcp.f32 %v3344_v56 }
 0x6a4   :  { %v3357_v55 = vmul.f32 %v6068_v58, %v6799_v40 }
 0x6a6   :  { %5859 = vmatmul.mubr.msk.f32.vlgmr.msra.gmra.mxu1 %vm27_vm0, %v3357_v55  ;;  %v4129_v21 = vpop.permute.xlu0 %4128 }
 0x6a7   :  { %v6070_v60 = vpop.eup %6069  ;;  %5867 = vmatpush3.msra.mxu1 %v3593_v61  ;;  %5868 = vmatprep.mubr.msk.f32.mxu1 %vm6128_vm1, %v6127_v0 }
 0x6a8   :  { %5876 = vmatprep.subr.mxu1 %v6127_v0  ;;  %v3359_v57 = vmul.f32 %v6070_v60, %v6804_v13 }
 0x6aa   :  { %5869 = vmatmul.mubr.msk.f32.vlgmr.msra.gmra.mxu1 %vm27_vm0, %v3359_v57  ;;  %v4287_v12 = vpop.permute.xlu0 %4286 }
 0x6ab   :  { %v6072_v8 = vpop.eup %6071  ;;  %5877 = vmatpush3.msra.mxu1 %v3745_v17  ;;  %5878 = vmatprep.mubr.msk.f32.mxu1 %vm6128_vm1, %v6127_v0 }
 0x6ac   :  { %v6074_v40 = vpop.eup %6073  ;;  %5886 = vmatprep.subr.mxu1 %v6127_v0  ;;  %v3361_v61 = vmul.f32 %v6072_v8, %v6808_v14 }
 0x6ad   :  { %v3360_v30 = vmul.f32 %v6074_v40, %v6810_v16 }
 0x6ae   :  { %5879 = vmatmul.mubr.msk.f32.vlgmr.msra.gmra.mxu1 %vm27_vm0, %v3361_v61  ;;  %v4285_v14 = vpop.permute.xlu0 %4284 }
 0x6af   :  { %5874 = vmatmul.mubr.msk.f32.vlgmr.msra.gmra.mxu0 %vm27_vm0, %v3360_v30  ;;  %5887 = vmatpush3.msra.mxu1 %v6842_v7 }
 0x6b0   :  { %v6076_v13 = vpop.eup %6075  ;;  %5882 = vmatpush3.msra.mxu0 %v6832_v62  ;;  %5883 = vmatprep.mubr.msk.f32.mxu0 %vm6128_vm1, %v6127_v0  ;;  %v4207_v62 = vpop.permute.xlu1 %4206 }
 0x6b1   :  { %5891 = vmatprep.subr.mxu0 %v6127_v0  ;;  %v3362_v17 = vmul.f32 %v6076_v13, %v6816_v54  ;;  %5888 = vmatprep.mubr.msk.f32.mxu1 %vm6128_vm1, %v6127_v0 }
 0x6b2   :  { %5896 = vmatprep.subr.mxu1 %v6127_v0  ;;  %v4443_v16 = vpop.permute.xlu0 %4442 }
 0x6b3   :  { %5884 = vmatmul.mubr.msk.f32.vlgmr.msra.gmra.mxu0 %vm27_vm0, %v3362_v17 }
 0x6b4   :  { %5892 = vmatpush3.xpose.msk.msra.mxu0 %vm27_vm0, %v6838_v9  ;;  %5893 = vmatprep.mubr.msk.f32.mxu0 %vm6128_vm1, %v6127_v0  ;;  %v4365_v9 = vpop.permute.xlu1 %4364 }
 0x6b5   :  { %5901 = vmatprep.subr.mxu0 %v6127_v0 }
 0x6b6   :  { %v4441_v54 = vpop.permute.xlu0 %4440 }
 0x6b7   :  { %5894 = vmatmul.mubr.msk.f32.vlgmr.msra.gmra.mxu0 %vm27_vm0, %v6848_v27 }
 0x6b8   :  { %5902 = vmatpush3.xpose.msk.msra.mxu0 %vm27_vm0, %v6852_v11  ;;  %5903 = vmatprep.mubr.msk.f32.mxu0 %vm6128_vm1, %v6127_v0 }
 0x6b9   :  { %5911 = vmatprep.subr.mxu0 %v6127_v0 }
 0x6bb   :  { %5904 = vmatmul.mubr.msk.f32.vlgmr.msra.gmra.mxu0 %vm27_vm0, %v4129_v21 }
 0x6bc   :  { %5912 = vmatpush3.xpose.msk.msra.mxu0 %vm27_vm0, %v4287_v12  ;;  %5913 = vmatprep.mubr.msk.f32.mxu0 %vm6128_vm1, %v6127_v0 }
 0x6bd   :  { %5921 = vmatprep.subr.mxu0 %v6127_v0 }
 0x6bf   :  { %5914 = vmatmul.mubr.msk.f32.vlgmr.msra.gmra.mxu0 %vm27_vm0, %v4285_v14 }
 0x6c0   :  { %5922 = vmatpush3.xpose.msk.msra.mxu0 %vm27_vm0, %v4443_v16  ;;  %5923 = vmatprep.mubr.msk.f32.mxu0 %vm6128_vm1, %v6127_v0 }
 0x6c1   :  { %5931 = vmatprep.subr.mxu0 %v6127_v0 }
 0x6c3   :  { %5924 = vmatmul.mubr.msk.f32.vlgmr.msra.gmra.mxu0 %vm27_vm0, %v4441_v54 }
 0x6c4   :  { %5933 = vmatprep.mubr.msk.f32.mxu0 %vm6128_vm1, %v6127_v0 }
 0x6ea   :  { %v3347_v7 = vpop.xlane.xlu1 %3346 }
 0x6eb   :  { %6077 = vrcp.f32 %v3347_v7 }
 0x6ee   :  { %v4363_v15 = vpop.permute.xlu1 %4362 }
 0x6f2   :  { %v4521_v1 = vpop.permute.xlu1 %4520 }
 0x6f8   :  { %v6078_v27 = vpop.eup %6077 }
 0x6f9   :  { %v3363_v11 = vmul.f32 %v6078_v27, %v6859_v34 }
 0x6fb   :  { %5889 = vmatmul.mubr.msk.f32.vlgmr.msra.gmra.mxu1 %vm27_vm0, %v3363_v11 }
 0x6fc   :  { %5897 = vmatpush3.xpose.msk.msra.mxu1 %vm27_vm0, %v6850_v28  ;;  %5898 = vmatprep.mubr.msk.f32.mxu1 %vm6128_vm1, %v6127_v0  ;;  %v4519_v28 = vpop.permute.xlu1 %4518 }
 0x6fd   :  { %5906 = vmatprep.subr.mxu1 %v6127_v0 }
 0x6ff   :  { %5899 = vmatmul.mubr.msk.f32.vlgmr.msra.gmra.mxu1 %vm27_vm0, %v6854_v29 }
 0x700   :  { %5907 = vmatpush3.xpose.msk.msra.mxu1 %vm27_vm0, %v6881_v33  ;;  %5908 = vmatprep.mubr.msk.f32.mxu1 %vm6128_vm1, %v6127_v0 }
 0x701   :  { %5916 = vmatprep.subr.mxu1 %v6127_v0 }
 0x703   :  { %5909 = vmatmul.mubr.msk.f32.vlgmr.msra.gmra.mxu1 %vm27_vm0, %v4207_v62 }
 0x704   :  { %5917 = vmatpush3.xpose.msk.msra.mxu1 %vm27_vm0, %v4365_v9  ;;  %5918 = vmatprep.mubr.msk.f32.mxu1 %vm6128_vm1, %v6127_v0 }
 0x705   :  { %5926 = vmatprep.subr.mxu1 %v6127_v0 }
 0x707   :  { %5919 = vmatmul.mubr.msk.f32.vlgmr.msra.gmra.mxu1 %vm27_vm0, %v4363_v15 }
 0x708   :  { %5927 = vmatpush3.xpose.msk.msra.mxu1 %vm27_vm0, %v4521_v1  ;;  %5928 = vmatprep.mubr.msk.f32.mxu1 %vm6128_vm1, %v6127_v0 }
 0x709   :  { %5936 = vmatprep.subr.mxu1 %v6127_v0 }
 0x70b   :  { %5929 = vmatmul.mubr.msk.f32.vlgmr.msra.gmra.mxu1 %vm27_vm0, %v4519_v28 }
 0x70c   :  { %5938 = vmatprep.mubr.msk.f32.mxu1 %vm6128_vm1, %v6127_v0 }
 0x71e   :  { %v6959_v29 = vpop.f32.mrf.mxu0 }
 0x720   :  { %v5855_v5 = vpop.f32.mrf.mxu0 }
 0x723   :  { %v6961_v3 = vpop.f32.mrf.mxu0 }
 0x725   :  { %v5865_v4 = vpop.f32.mrf.mxu0 }
 0x766   :  { %v6963_v34 = vpop.f32.mrf.mxu1 }
 0x768   :  { %v5860_v36 = vpop.f32.mrf.mxu1 }
 0x76a   :  { %v6965_v44 = vpop.f32.mrf.mxu1 }
 0x76c   :  { %v5870_v2 = vpop.f32.mrf.mxu1 }
 0x76e   :  { %v6967_v19 = vpop.f32.mrf.mxu1 }
 0x76f   :  { %v6969_v23 = vpop.f32.mrf.mxu0 }
 0x770   :  { %v5880_v33 = vpop.f32.mrf.mxu1 }
 0x771   :  { %v5875_v31 = vpop.f32.mrf.mxu0 }
 0x773   :  { %v6971_v32 = vpop.f32.mrf.mxu0 }
 0x775   :  { %v5885_v41 = vpop.f32.mrf.mxu0 }
 0x777   :  { %v4046_v37 = vpop.f32.mrf.mxu0 }
 0x778   :  { %v4596_v56 = vsel %vm27_vm0, %v4046_v37, -inf }
 0x779   :  { %4597 = vmax.xlane.f32.xlu0 %v4596_v56  ;;  %v5895_v58 = vpop.f32.mrf.mxu0 }
 0x77b   :  { %v4202_v55 = vpop.f32.mrf.mxu0 }
 0x77c   :  { %v4602_v60 = vsel %vm27_vm0, %v4202_v55, -inf }
 0x77d   :  { %4603 = vmax.xlane.f32.xlu0 %v4602_v60  ;;  %v5905_v57 = vpop.f32.mrf.mxu0 }
 0x77f   :  { %v4358_v21 = vpop.f32.mrf.mxu0 }
 0x780   :  { %v4608_v27 = vsel %vm27_vm0, %v4358_v21, -inf }
 0x781   :  { %v5915_v8 = vpop.f32.mrf.mxu0 }
 0x783   :  { %v6975_v40 = vpop.f32.mrf.mxu0 }
 0x784   :  { %v4614_v15 = vsel %vm27_vm0, %v6975_v40, -inf }
 0x785   :  { %v5925_v61 = vpop.f32.mrf.mxu0 }
 0x7bb   :  { %v6977_v30 = vpop.f32.mrf.mxu1 }
 0x7bd   :  { %v5890_v12 = vpop.f32.mrf.mxu1 }
 0x7bf   :  { %v4124_v13 = vpop.f32.mrf.mxu1 }
 0x7c0   :  { %v4599_v17 = vsel %vm27_vm0, %v4124_v13, -inf }
 0x7c1   :  { %4600 = vmax.xlane.f32.xlu1 %v4599_v17  ;;  %v5900_v14 = vpop.f32.mrf.mxu1 }
 0x7c3   :  { %v4280_v16 = vpop.f32.mrf.mxu1 }
 0x7c4   :  { %v4605_v54 = vsel %vm27_vm0, %v4280_v16, -inf }
 0x7c5   :  { %v5910_v62 = vpop.f32.mrf.mxu1  ;;  %4606 = vmax.xlane.f32.xlu0 %v4605_v54 }
 0x7c7   :  { %v4436_v9 = vpop.f32.mrf.mxu1 }
 0x7c8   :  { %v4611_v7 = vsel %vm27_vm0, %v4436_v9, -inf }
 0x7c9   :  { %4612 = vmax.xlane.f32.xlu1 %v4611_v7  ;;  %v5920_v11 = vpop.f32.mrf.mxu1  ;;  %4609 = vmax.xlane.f32.xlu0 %v4608_v27 }
 0x7cb   :  { %v4592_v1 = vpop.f32.mrf.mxu1 }
 0x7cc   :  { %v4617_v28 = vsel %vm27_vm0, %v4592_v1, -inf }
 0x7cd   :  { %4618 = vmax.xlane.f32.xlu1 %v4617_v28  ;;  %v5930_v5 = vpop.f32.mrf.mxu1  ;;  %4615 = vmax.xlane.f32.xlu0 %v4614_v15 }
 0x7de   :  { %4760 = vrot.lane.b32.xlu1 %v6724_v47, %s6135_s0 }
 0x7e2   :  { %4836 = vrot.lane.b32.xlu1 %v6730_v48, %s6135_s0 }
 0x7e3   :  { %4684 = vrot.lane.b32.xlu0 %v6742_v50, %s6135_s0 }
 0x7e6   :  { %4912 = vrot.lane.b32.xlu1 %v6736_v49, %s6135_s0 }
 0x7e7   :  { %4988 = vrot.lane.b32.xlu0 %v6754_v52, %s6135_s0 }
 0x7ea   :  { %5064 = vrot.lane.b32.xlu1 %v6748_v51, %s6135_s0 }
 0x802   :  { %v4598_v4 = vpop.xlane.xlu0 %4597 }
 0x803   :  { %v4620_v36 = vsub.f32 %v4046_v37, %v4598_v4 }
 0x805   :  { %v4628_v2 = vmul.f32 1.442695, %v4620_v36 }
 0x806   :  { %v4604_v33 = vpop.xlane.xlu0 %4603 }
 0x807   :  { %6079 = vpow2.f32 %v4628_v2  ;;  %v4622_v47 = vsub.f32 %v4202_v55, %v4604_v33 }
 0x809   :  { %v4632_v31 = vmul.f32 1.442695, %v4622_v47 }
 0x80b   :  { %6081 = vpow2.f32 %v4632_v31 }
 0x814   :  { %v6998_v48 = vpop.eup %6079 }
 0x815   :  { %v4644_v50 = vsel %vm27_vm0, %v6998_v48, 0.0 }
 0x816   :  { %4645 = vadd.xlane.f32.xlu0 %v4644_v50 }
 0x818   :  { %v7002_v49 = vpop.eup %6081 }
 0x819   :  { %v4650_v52 = vsel %vm27_vm0, %v7002_v49, 0.0 }
 0x81a   :  { %4651 = vadd.xlane.f32.xlu0 %v4650_v52 }
 0x84a   :  { %v4601_v51 = vpop.xlane.xlu1 %4600 }
 0x84b   :  { %v4621_v41 = vsub.f32 %v4124_v13, %v4601_v51 }
 0x84d   :  { %v4630_v37 = vmul.f32 1.442695, %v4621_v41 }
 0x84e   :  { %v4607_v56 = vpop.xlane.xlu0 %4606 }
 0x84f   :  { %6083 = vpow2.f32 %v4630_v37  ;;  %v4623_v58 = vsub.f32 %v4280_v16, %v4607_v56 }
 0x851   :  { %v4634_v55 = vmul.f32 1.442695, %v4623_v58 }
 0x852   :  { %v4613_v60 = vpop.xlane.xlu1 %4612  ;;  %v4610_v57 = vpop.xlane.xlu0 %4609 }
 0x853   :  { %6085 = vpow2.f32 %v4634_v55  ;;  %v4625_v8 = vsub.f32 %v4436_v9, %v4613_v60  ;;  %v4624_v61 = vsub.f32 %v4358_v21, %v4610_v57 }
 0x855   :  { %v4638_v12 = vmul.f32 1.442695, %v4625_v8  ;;  %v4636_v17 = vmul.f32 1.442695, %v4624_v61 }
 0x856   :  { %v4619_v14 = vpop.xlane.xlu1 %4618  ;;  %v4616_v54 = vpop.xlane.xlu0 %4615 }
 0x857   :  { %6087 = vpow2.f32 %v4638_v12  ;;  %v4627_v62 = vsub.f32 %v4592_v1, %v4619_v14  ;;  %v4626_v7 = vsub.f32 %v6975_v40, %v4616_v54 }
 0x858   :  { %6089 = vpow2.f32 %v4636_v17 }
 0x859   :  { %v4642_v13 = vmul.f32 1.442695, %v4627_v62  ;;  %v4640_v27 = vmul.f32 1.442695, %v4626_v7 }
 0x85a   :  { %v4685_v11 = vpop.permute.xlu0 %4684  ;;  %v4761_v15 = vpop.permute.xlu1 %4760 }
 0x85b   :  { %6091 = vpow2.f32 %v4642_v13  ;;  %5937 = vmatpush3.msra.mxu1 %v4761_v15  ;;  %5932 = vmatpush3.msra.mxu0 %v4685_v11 }
 0x85c   :  { %v7007_v16 = vpop.eup %6083  ;;  %6093 = vpow2.f32 %v4640_v27  ;;  %5941 = vmatprep.subr.mxu0 %v6127_v0  ;;  %5946 = vmatprep.subr.mxu1 %v6127_v0 }
 0x85d   :  { %v4647_v21 = vsel %vm27_vm0, %v7007_v16, 0.0 }
 0x85e   :  { %4648 = vadd.xlane.f32.xlu1 %v4647_v21 }
 0x860   :  { %v7013_v40 = vpop.eup %6085 }
 0x861   :  { %v4653_v9 = vsel %vm27_vm0, %v7013_v40, 0.0 }
 0x862   :  { %4654 = vadd.xlane.f32.xlu1 %v4653_v9 }
 0x864   :  { %v7017_v1 = vpop.eup %6087 }
 0x865   :  { %v7019_v28 = vpop.eup %6089  ;;  %v4659_v5 = vsel %vm27_vm0, %v7017_v1, 0.0 }
 0x866   :  { %4660 = vadd.xlane.f32.xlu1 %v4659_v5  ;;  %v4656_v4 = vsel %vm27_vm0, %v7019_v28, 0.0 }
 0x867   :  { %4657 = vadd.xlane.f32.xlu0 %v4656_v4 }
 0x868   :  { %v7025_v36 = vpop.eup %6091 }
 0x869   :  { %v7027_v2 = vpop.eup %6093  ;;  %v4665_v33 = vsel %vm27_vm0, %v7025_v36, 0.0 }
 0x86a   :  { %4666 = vadd.xlane.f32.xlu1 %v4665_v33  ;;  %v4662_v47 = vsel %vm27_vm0, %v7027_v2, 0.0 }
 0x86b   :  { %4663 = vadd.xlane.f32.xlu0 %v4662_v47 }
 0x87b   :  { %5216 = vrot.lane.b32.xlu1 %v6760_v53, %s6135_s0 }
 0x87f   :  { %5302 = vrot.lane.b32.xlu1 %v6691_v20, %s6136_s22 }
 0x881   :  { %5140 = vrot.lane.b32.xlu0 %v6766_v6, %s6135_s0 }
 0x883   :  { %5306 = vrot.lane.b32.xlu1 %v6693_v22, %s6136_s22 }
 0x885   :  { %5300 = vrot.lane.b32.xlu0 %v6687_v63, %s6136_s22  ;;  %v4989_v63 = vpop.permute.xlu0 %4988 }
 0x887   :  { %5310 = vrot.lane.b32.xlu1 %v6695_v24, %s6136_s22 }
 0x889   :  { %5304 = vrot.lane.b32.xlu0 %v6689_v18, %s6136_s22 }
 0x88b   :  { %5314 = vrot.lane.b32.xlu1 %v6707_v25, %s6136_s22 }
 0x88d   :  { %5308 = vrot.lane.b32.xlu0 %v6697_v26, %s6136_s22  ;;  %v4837_v26 = vpop.permute.xlu1 %4836 }
 0x88f   :  { %5334 = vrot.lane.b32.xlu1 %v6963_v34, %s6137_s23 }
 0x891   :  { %5312 = vrot.lane.b32.xlu0 %v6699_v10, %s6136_s22  ;;  %v4913_v53 = vpop.permute.xlu1 %4912 }
 0x893   :  { %5338 = vrot.lane.b32.xlu1 %v6965_v44, %s6137_s23 }
 0x895   :  { %5332 = vrot.lane.b32.xlu0 %v6959_v29, %s6137_s23  ;;  %v5065_v6 = vpop.permute.xlu1 %5064 }
 0x897   :  { %5342 = vrot.lane.b32.xlu1 %v6967_v19, %s6137_s23 }
 0x899   :  { %5336 = vrot.lane.b32.xlu0 %v6961_v3, %s6137_s23 }
 0x89b   :  { %5346 = vrot.lane.b32.xlu1 %v6977_v30, %s6137_s23 }
 0x89d   :  { %5340 = vrot.lane.b32.xlu0 %v6969_v23, %s6137_s23 }
 0x89f   :  { %v4646_v18 = vpop.xlane.xlu0 %4645 }
 0x8a0   :  { %6095 = vrcp.f32 %v4646_v18 }
 0x8a1   :  { %5344 = vrot.lane.b32.xlu0 %v6971_v32, %s6137_s23 }
 0x8a3   :  { %v4652_v20 = vpop.xlane.xlu0 %4651 }
 0x8a4   :  { %6097 = vrcp.f32 %v4652_v20 }
 0x8ad   :  { %v6096_v22 = vpop.eup %6095 }
 0x8ae   :  { %v4676_v24 = vmul.f32 %v6096_v22, %v6998_v48 }
 0x8b0   :  { %5934 = vmatmul.mubr.msk.f32.vlgmr.msra.gmra.mxu0 %vm27_vm0, %v4676_v24 }
 0x8b1   :  { %v6098_v10 = vpop.eup %6097  ;;  %5942 = vmatpush3.msra.mxu0 %v4837_v26  ;;  %5943 = vmatprep.mubr.msk.f32.mxu0 %vm6128_vm1, %v6127_v0 }
 0x8b2   :  { %5951 = vmatprep.subr.mxu0 %v6127_v0  ;;  %v4678_v25 = vmul.f32 %v6098_v10, %v7002_v49 }
 0x8b4   :  { %5944 = vmatmul.mubr.msk.f32.vlgmr.msra.gmra.mxu0 %vm27_vm0, %v4678_v25 }
 0x8b5   :  { %5952 = vmatpush3.msra.mxu0 %v4989_v63  ;;  %5953 = vmatprep.mubr.msk.f32.mxu0 %vm6128_vm1, %v6127_v0 }
 0x8b6   :  { %5961 = vmatprep.subr.mxu0 %v6127_v0 }
 0x8e7   :  { %v4649_v29 = vpop.xlane.xlu1 %4648 }
 0x8e8   :  { %6099 = vrcp.f32 %v4649_v29 }
 0x8eb   :  { %v4655_v3 = vpop.xlane.xlu1 %4654 }
 0x8ec   :  { %6101 = vrcp.f32 %v4655_v3 }
 0x8ef   :  { %v4661_v34 = vpop.xlane.xlu1 %4660 }
 0x8f0   :  { %6103 = vrcp.f32 %v4661_v34  ;;  %v4658_v44 = vpop.xlane.xlu0 %4657 }
 0x8f1   :  { %6105 = vrcp.f32 %v4658_v44 }
 0x8f3   :  { %v4667_v19 = vpop.xlane.xlu1 %4666 }
 0x8f4   :  { %6107 = vrcp.f32 %v4667_v19  ;;  %v4664_v23 = vpop.xlane.xlu0 %4663 }
 0x8f5   :  { %v6100_v32 = vpop.eup %6099  ;;  %6109 = vrcp.f32 %v4664_v23 }
 0x8f6   :  { %v4677_v30 = vmul.f32 %v6100_v32, %v7007_v16 }
 0x8f7   :  { %v5217_v56 = vpop.permute.xlu1 %5216 }
 0x8f8   :  { %v5141_v31 = vpop.permute.xlu0 %5140  ;;  %5939 = vmatmul.mubr.msk.f32.vlgmr.msra.gmra.mxu1 %vm27_vm0, %v4677_v30 }
 0x8f9   :  { %v6102_v48 = vpop.eup %6101  ;;  %5947 = vmatpush3.msra.mxu1 %v4913_v53  ;;  %5948 = vmatprep.mubr.msk.f32.mxu1 %vm6128_vm1, %v6127_v0 }
 0x8fa   :  { %5956 = vmatprep.subr.mxu1 %v6127_v0  ;;  %v4679_v50 = vmul.f32 %v6102_v48, %v7013_v40 }
 0x8fc   :  { %v5301_v49 = vpop.permute.xlu0 %5300  ;;  %5949 = vmatmul.mubr.msk.f32.vlgmr.msra.gmra.mxu1 %vm27_vm0, %v4679_v50 }
 0x8fd   :  { %v6104_v52 = vpop.eup %6103  ;;  %5957 = vmatpush3.msra.mxu1 %v5065_v6  ;;  %5958 = vmatprep.mubr.msk.f32.mxu1 %vm6128_vm1, %v6127_v0  ;;  %v5388_v63 = vsel %vm27_vm0, %v6475_v35, %v5301_v49  ;;  %v5303_v35 = vpop.permute.xlu1 %5302 }
 0x8fe   :  { %v6106_v51 = vpop.eup %6105  ;;  %v4681_v41 = vmul.f32 %v6104_v52, %v7017_v1  ;;  %5966 = vmatprep.subr.mxu1 %v6127_v0 }
 0x8ff   :  { %v4680_v37 = vmul.f32 %v6106_v51, %v7019_v28 }
 0x900   :  { %v5305_v58 = vpop.permute.xlu0 %5304  ;;  %5959 = vmatmul.mubr.msk.f32.vlgmr.msra.gmra.mxu1 %vm27_vm0, %v4681_v41 }
 0x901   :  { %v6108_v55 = vpop.eup %6107  ;;  %5954 = vmatmul.mubr.msk.f32.vlgmr.msra.gmra.mxu0 %vm27_vm0, %v4680_v37  ;;  %5967 = vmatpush3.msra.mxu1 %v5217_v56  ;;  %v5390_v24 = vsel %vm27_vm0, %v6479_v39, %v5305_v58  ;;  %v5307_v53 = vpop.permute.xlu1 %5306  ;;  %v5389_v39 = vsel %vm27_vm0, %v6477_v38, %v5303_v35 }
 0x902   :  { %v6110_v60 = vpop.eup %6109  ;;  %5962 = vmatpush3.msra.mxu0 %v5141_v31  ;;  %5968 = vmatprep.mubr.msk.f32.mxu1 %vm6128_vm1, %v6127_v0  ;;  %v4683_v57 = vmul.f32 %v6108_v55, %v7025_v36  ;;  %v5391_v31 = vsel %vm27_vm0, %v6481_v42, %v5307_v53 }
 0x903   :  { %5963 = vmatprep.mubr.msk.f32.mxu0 %vm6128_vm1, %v6127_v0  ;;  %v4682_v8 = vmul.f32 %v6110_v60, %v7027_v2 }
 0x904   :  { %v5309_v61 = vpop.permute.xlu0 %5308  ;;  %5969 = vmatmul.mubr.msk.f32.vlgmr.msra.gmra.mxu1 %vm27_vm0, %v4683_v57 }
 0x905   :  { %5964 = vmatmul.mubr.msk.f32.vlgmr.msra.gmra.mxu0 %vm27_vm0, %v4682_v8  ;;  %v5392_v54 = vsel %vm27_vm0, %v6483_v43, %v5309_v61  ;;  %v5311_v6 = vpop.permute.xlu1 %5310 }
 0x906   :  { %v5393_v38 = vsel %vm27_vm0, %v6485_v45, %v5311_v6 }
 0x908   :  { %v5313_v12 = vpop.permute.xlu0 %5312 }
 0x909   :  { %v5394_v0 = vsel %vm27_vm0, %v6487_v46, %v5313_v12  ;;  %v5315_v29 = vpop.permute.xlu1 %5314 }
 0x90a   :  { %v5395_v56 = vsel %vm27_vm0, %v6495_v59, %v5315_v29 }
 0x90c   :  { %v5333_v17 = vpop.permute.xlu0 %5332 }
 0x90d   :  { %v5397_v18 = vsel %vm5396_vm2, %v5388_v63, %v5333_v17  ;;  %v5335_v3 = vpop.permute.xlu1 %5334 }
 0x90e   :  { %v5398_v23 = vsel %vm5396_vm2, %v5389_v39, %v5335_v3 }
 0x910   :  { %v5337_v14 = vpop.permute.xlu0 %5336 }
 0x911   :  { %v5399_v26 = vsel %vm5396_vm2, %v5390_v24, %v5337_v14  ;;  %v5339_v34 = vpop.permute.xlu1 %5338 }
 0x912   :  { %v5400_v48 = vsel %vm5396_vm2, %v5391_v31, %v5339_v34 }
 0x914   :  { %v5341_v62 = vpop.permute.xlu0 %5340 }
 0x915   :  { %v7088_v7 = vsel %vm5396_vm2, %v5392_v54, %v5341_v62  ;;  %v5343_v44 = vpop.permute.xlu1 %5342 }
 0x916   :  { %v5402_v52 = vsel %vm5396_vm2, %v5393_v38, %v5343_v44 }
 0x918   :  { %v5345_v13 = vpop.permute.xlu0 %5344 }
 0x919   :  { %v7093_v27 = vsel %vm5396_vm2, %v5394_v0, %v5345_v13  ;;  %v5347_v19 = vpop.permute.xlu1 %5346 }
 0x91a   :  { %v5404_v45 = vsel %vm5396_vm2, %v5395_v56, %v5347_v19 }
 0x970   :  { %v4756_v11 = vpop.f32.mrf.mxu0 }
 0x971   :  { %5364 = vrot.lane.b32.xlu0 %v4756_v11, %s6138_s24 }
 0x972   :  { %v5935_v15 = vpop.f32.mrf.mxu0 }
 0x974   :  { %v4908_v16 = vpop.f32.mrf.mxu0 }
 0x975   :  { %5368 = vrot.lane.b32.xlu0 %v4908_v16, %s6138_s24 }
 0x976   :  { %v5945_v21 = vpop.f32.mrf.mxu0 }
 0x9b8   :  { %v4832_v43 = vpop.f32.mrf.mxu1 }
 0x9b9   :  { %5366 = vrot.lane.b32.xlu1 %v4832_v43, %s6138_s24 }
 0x9ba   :  { %v5940_v40 = vpop.f32.mrf.mxu1 }
 0x9bc   :  { %v4984_v9 = vpop.f32.mrf.mxu1 }
 0x9bd   :  { %5370 = vrot.lane.b32.xlu1 %v4984_v9, %s6138_s24 }
 0x9be   :  { %v5950_v1 = vpop.f32.mrf.mxu1 }
 0x9c0   :  { %v5136_v28 = vpop.f32.mrf.mxu1 }
 0x9c1   :  { %v5060_v5 = vpop.f32.mrf.mxu0  ;;  %5374 = vrot.lane.b32.xlu1 %v5136_v28, %s6138_s24 }
 0x9c2   :  { %5372 = vrot.lane.b32.xlu0 %v5060_v5, %s6138_s24  ;;  %v5960_v46 = vpop.f32.mrf.mxu1 }
 0x9c3   :  { %v5955_v4 = vpop.f32.mrf.mxu0 }
 0x9c4   :  { %v5288_v36 = vpop.f32.mrf.mxu1 }
 0x9c5   :  { %v5212_v2 = vpop.f32.mrf.mxu0  ;;  %5378 = vrot.lane.b32.xlu1 %v5288_v36, %s6138_s24 }
 0x9c6   :  { %5376 = vrot.lane.b32.xlu0 %v5212_v2, %s6138_s24  ;;  %v5970_v33 = vpop.f32.mrf.mxu1 }
 0x9c7   :  { %v5965_v47 = vpop.f32.mrf.mxu0 }
 0x9e3   :  { %v5365_v20 = vpop.permute.xlu0 %5364 }
 0x9e4   :  { %v5406_v22 = vsel %vm5405_vm3, %v5397_v18, %v5365_v20 }
 0x9e5   :  { %5415 = vst.msk [vmem:[%s7157_s2] sm:$0xff] %vm5414_vm4, %v5406_v22 }
 0x9e7   :  { %v5369_v10 = vpop.permute.xlu0 %5368 }
 0x9e8   :  { %v5408_v25 = vsel %vm5405_vm3, %v5399_v26, %v5369_v10 }
 0x9e9   :  { %5417 = vst.msk [vmem:[%s7157_s2 + $0x10] sm:$0xff] %vm5414_vm4, %v5408_v25 }
 0xa2b   :  { %v5367_v32 = vpop.permute.xlu1 %5366 }
 0xa2c   :  { %v5407_v30 = vsel %vm5405_vm3, %v5398_v23, %v5367_v32 }
 0xa2d   :  { %5416 = vst.msk [vmem:[%s7157_s2 + $0x8] sm:$0xff] %vm5414_vm4, %v5407_v30 }
 0xa2f   :  { %v5371_v50 = vpop.permute.xlu1 %5370 }
 0xa30   :  { %v5409_v49 = vsel %vm5405_vm3, %v5400_v48, %v5371_v50 }
 0xa31   :  { %5418 = vst.msk [vmem:[%s7157_s2 + $0x18] sm:$0xff] %vm5414_vm4, %v5409_v49 }
 0xa33   :  { %v5375_v51 = vpop.permute.xlu1 %5374 }
 0xa34   :  { %v5411_v41 = vsel %vm5405_vm3, %v5402_v52, %v5375_v51  ;;  %v5373_v37 = vpop.permute.xlu0 %5372 }
 0xa35   :  { %5420 = vst.msk [vmem:[%s7157_s2 + $0x28] sm:$0xff] %vm5414_vm4, %v5411_v41  ;;  %v5410_v42 = vsel %vm5405_vm3, %v7088_v7, %v5373_v37 }
 0xa36   :  { %5419 = vst.msk [vmem:[%s7157_s2 + $0x20] sm:$0xff] %vm5414_vm4, %v5410_v42 }
 0xa37   :  { %v5379_v58 = vpop.permute.xlu1 %5378 }
 0xa38   :  { %v5413_v55 = vsel %vm5405_vm3, %v5404_v45, %v5379_v58  ;;  %v5377_v60 = vpop.permute.xlu0 %5376 }
 0xa39   :  { %5422 = vst.msk [vmem:[%s7157_s2 + $0x38] sm:$0xff] %vm5414_vm4, %v5413_v55  ;;  %v5412_v57 = vsel %vm5405_vm3, %v7093_v27, %v5377_v60 }
 0xa3a   :  { %5421 = vst.msk [vmem:[%s7157_s2 + $0x30] sm:$0xff] %vm5414_vm4, %v5412_v57 }

</bundles_post_ra>
